<compile_context>
chip_gen: v6e
topology: v6e:2x2x1
jax: 0.10.0
libtpu: 0.0.40
codegen_flags: <defaults>
</compile_context>

<pallas_src>
from functools import partial

import jax
import jax.numpy as jnp
from jax.experimental import pallas as pl
from jax.experimental.pallas import tpu as pltpu


# ----------------------------------------------------------------------------
# Pallas kernels: one coupling group,  y = xs[i] + relu((A_hat @ y_in) @ W + b)
#   a_ref   : [TM, TK]  bf16  A_hat tile
#   y_ref   : [TK, CG]  bf16  y_in K-slice
#   xi_ref  : [TM, CG]  f32   xs[i] row tile
#   w_ref   : [CG, CG]  f32   Fm_i weight (VMEM-resident)
#   b_ref   : [1,  CG]  f32   Fm_i bias   (VMEM-resident)
#   out refs: [TM, CG]        y row tile (f32 always; bf16 copy for non-final
#                             groups so the next group streams bf16 directly)
#   acc_ref : [TM, CG]  f32   VMEM accumulator for the K reduction
# ----------------------------------------------------------------------------
def _group_fm_body(a_ref, y_ref, xi_ref, w_ref, b_ref, out_refs, acc_ref):
    k = pl.program_id(1)

    @pl.when(k == 0)
    def _():
        acc_ref[...] = jnp.zeros_like(acc_ref)

    # (TM, TK) @ (TK, CG) bf16 on the MXU, f32 accumulation.
    acc_ref[...] += jnp.dot(a_ref[...], y_ref[...],
                            preferred_element_type=jnp.float32)

    @pl.when(k == pl.num_programs(1) - 1)
    def _():
        # Epilogue once per row-tile: small weight matmul + bias + relu + add,
        # then full-width (lane-dense) output store(s).
        fmd = jnp.dot(acc_ref[...], w_ref[...],
                      preferred_element_type=jnp.float32)
        fmd = jnp.maximum(fmd + b_ref[...], 0.0)
        y = xi_ref[...] + fmd
        for o_ref in out_refs:
            o_ref[...] = y.astype(o_ref.dtype)


def _group_fm_kernel(a_ref, y_ref, xi_ref, w_ref, b_ref, out_ref, acc_ref):
    _group_fm_body(a_ref, y_ref, xi_ref, w_ref, b_ref, (out_ref,), acc_ref)


def _group_fm_kernel_dual(a_ref, y_ref, xi_ref, w_ref, b_ref,
                          out_f32_ref, out_bf16_ref, acc_ref):
    _group_fm_body(a_ref, y_ref, xi_ref, w_ref, b_ref,
                   (out_f32_ref, out_bf16_ref), acc_ref)


def _pick_tile(dim, cap, align):
    """Largest t <= cap with dim % t == 0 and t % align == 0; else the full dim
    (a full-extent block is always layout-legal)."""
    if dim <= cap:
        return dim
    for t in range(cap, align - 1, -1):
        if t % align == 0 and dim % t == 0:
            return t
    return dim


def _fm_coupling_step(a_bf16, y_in_bf16, x_i, w_i, b_i, *, tm, tk, emit_bf16):
    n = a_bf16.shape[0]
    cg = x_i.shape[1]
    grid = (n // tm, n // tk)          # reduction axis last (convention)

    in_specs = [
        pl.BlockSpec((tm, tk), lambda m, k: (m, k)),   # A_hat tile (bf16)
        pl.BlockSpec((tk, cg), lambda m, k: (k, 0)),   # y_in K-slice (bf16)
        pl.BlockSpec((tm, cg), lambda m, k: (m, 0)),   # xs[i] row tile
        pl.BlockSpec((cg, cg), lambda m, k: (0, 0)),   # W_i (VMEM-resident)
        pl.BlockSpec((1, cg),  lambda m, k: (0, 0)),   # b_i (VMEM-resident)
    ]
    out_spec = pl.BlockSpec((tm, cg), lambda m, k: (m, 0))

    if emit_bf16:
        kernel = _group_fm_kernel_dual
        out_shape = (jax.ShapeDtypeStruct((n, cg), jnp.float32),
                     jax.ShapeDtypeStruct((n, cg), jnp.bfloat16))
        out_specs = (out_spec, out_spec)
    else:
        kernel = _group_fm_kernel
        out_shape = jax.ShapeDtypeStruct((n, cg), jnp.float32)
        out_specs = out_spec

    res = pl.pallas_call(
        kernel,
        out_shape=out_shape,
        grid=grid,
        in_specs=in_specs,
        out_specs=out_specs,
        scratch_shapes=[pltpu.VMEM((tm, cg), jnp.float32)],
        compiler_params=pltpu.CompilerParams(
            dimension_semantics=("parallel", "arbitrary")),
    )(a_bf16, y_in_bf16, x_i, w_i, b_i)

    if emit_bf16:
        return res[0], res[1]
    return res, None


@partial(jax.jit, static_argnames=("group", "tm_cap", "tk_cap"))
def group_additive_coupling_forward(x, a_hat, w, b, *, group=2,
                                    tm_cap=512, tk_cap=512):
    """GroupAdditiveCoupling forward with synthetic GCN-layer Fms.

    x:     [N, C]        f32 node features
    a_hat: [N, N]        f32 normalized adjacency (cast to bf16 for the kernel)
    w:     [G, C/G, C/G] f32 per-group Fm weights
    b:     [G, 1, C/G]   f32 per-group Fm biases
    """
    n, c = x.shape
    assert group >= 2, "GroupAdditiveCoupling requires group >= 2"
    assert c % group == 0, "channel dim must be divisible by group"
    cg = c // group

    tm = _pick_tile(n, tm_cap, 8)      # row tile (second-to-last dim: /8)
    tk = _pick_tile(n, tk_cap, 128)    # K tile   (lane dim: /128)

    a_bf16 = a_hat.astype(jnp.bfloat16)        # dominant HBM operand -> bf16
    xs = [x[:, i * cg:(i + 1) * cg] for i in range(group)]

    # y_in = 2 * sum(xs[1:])  — cheap elementwise glue; the heavy Fm work is
    # inside the Pallas kernel.  After group 0, the bf16 y_in comes straight
    # out of the previous group's kernel (no wrapper cast pass).
    y_in_bf16 = (2.0 * sum(xs[1:])).astype(jnp.bfloat16)

    ys = []
    for i in range(group):
        last = (i == group - 1)
        # Sequential sweep: group i consumes the full y of group i-1.
        y_f32, y_bf16 = _fm_coupling_step(a_bf16, y_in_bf16, xs[i],
                                          w[i], b[i], tm=tm, tk=tk,
                                          emit_bf16=not last)
        ys.append(y_f32)
        if not last:
            y_in_bf16 = y_bf16
    return jnp.concatenate(ys, axis=-1)


# ----------------------------------------------------------------------------
# Plain-JAX glue: densify edge_index into a GCN-normalized adjacency.
# (Exactly one self-loop per node; duplicate edges are deduplicated.)
# ----------------------------------------------------------------------------
def build_gcn_adjacency(edge_index, num_nodes):
    src, dst = edge_index[0], edge_index[1]
    adj = jnp.zeros((num_nodes, num_nodes), jnp.float32)
    adj = adj.at[dst, src].set(1.0)
    eye = jnp.eye(num_nodes, dtype=bool)
    adj = jnp.where(eye, 1.0, adj)                     # add self-loops (no 2.0)
    deg = jnp.sum(adj, axis=1)
    d_inv_sqrt = jax.lax.rsqrt(jnp.maximum(deg, 1e-12))
    return d_inv_sqrt[:, None] * adj * d_inv_sqrt[None, :]


# ----------------------------------------------------------------------------
# Pure-JAX reference.  input_dtype=bfloat16 emulates the kernel's quantization
# of the A_hat / y_in matmul operands (accumulation stays f32), which gives a
# tight, non-flaky correctness check; input_dtype=float32 is the exact module.
# ----------------------------------------------------------------------------
def reference_forward(x, a_hat, w, b, group, input_dtype=jnp.float32):
    cg = x.shape[1] // group
    xs = [x[:, i * cg:(i + 1) * cg] for i in range(group)]
    a = a_hat.astype(input_dtype).astype(jnp.float32)
    y_in = 2.0 * sum(xs[1:])
    ys = []
    for i in range(group):
        y_q = y_in.astype(input_dtype).astype(jnp.float32)
        agg = jnp.dot(a, y_q, precision="highest")
        fmd = jnp.maximum(jnp.dot(agg, w[i], precision="highest") + b[i], 0.0)
        y = xs[i] + fmd
        ys.append(y)
        y_in = y
    return jnp.concatenate(ys, axis=-1)


if __name__ == "__main__":
    key = jax.random.PRNGKey(0)
    k_x, k_e, k_w, k_b = jax.random.split(key, 4)

    # Small but MXU/lane-friendly sizes: N multiple of 128 so tiles are aligned,
    # CG = 128 so per-group output stores are lane-dense.
    N = 1024          # nodes
    C = 256           # channels (split_dim = -1)
    GROUP = 2
    CG = C // GROUP   # 128
    E = 4096          # edges

    x = jax.random.normal(k_x, (N, C), dtype=jnp.float32)
    edge_index = jax.random.randint(k_e, (2, E), 0, N, dtype=jnp.int32)

    # Deterministic synthetic Fm parameters (one GCN layer per group).
    w = jax.random.normal(k_w, (GROUP, CG, CG), dtype=jnp.float32) / jnp.sqrt(CG)
    b = jax.random.normal(k_b, (GROUP, 1, CG), dtype=jnp.float32) * 0.1

    a_hat = build_gcn_adjacency(edge_index, N)

    out = group_additive_coupling_forward(x, a_hat, w, b, group=GROUP)
    out = jax.block_until_ready(out)

    ref_matched = reference_forward(x, a_hat, w, b, GROUP,
                                    input_dtype=jnp.bfloat16)
    ref_f32 = reference_forward(x, a_hat, w, b, GROUP,
                                input_dtype=jnp.float32)

    assert out.shape == (N, C)
    assert jnp.allclose(out, ref_matched, atol=5e-3, rtol=5e-3), \
        "mismatch vs matched-precision reference"
    assert jnp.allclose(out, ref_f32, atol=1.5e-1, rtol=1.5e-1), \
        "mismatch vs f32 reference"

    print("KERNEL_OK")
</pallas_src>

<mosaic_0001>
module attributes {stable_mosaic.version = 11 : i64} {
  func.func @_group_fm_kernel(%arg0: i32, %arg1: i32, %arg2: memref<512x512xbf16, #tpu.memory_space<vmem>>, %arg3: memref<512x128xbf16, #tpu.memory_space<vmem>>, %arg4: memref<512x128xf32, #tpu.memory_space<vmem>>, %arg5: memref<128x128xf32, #tpu.memory_space<vmem>>, %arg6: memref<1x128xf32, #tpu.memory_space<vmem>>, %arg7: memref<512x128xf32, #tpu.memory_space<vmem>>, %arg8: memref<512x128xf32, #tpu.memory_space<vmem>>) attributes {dimension_semantics = [#tpu.dimension_semantics<parallel>, #tpu.dimension_semantics<arbitrary>], iteration_bounds = array<i64: 2, 2>, scalar_prefetch = 0 : i64, scratch_operands = 1 : i64, tpu.core_type = #tpu.core_type<tc>, window_params = [{transform_indices = @transform_0, window_bounds = array<i64: 512, 512>}, {transform_indices = @transform_1, window_bounds = array<i64: 512, 128>}, {transform_indices = @transform_2, window_bounds = array<i64: 512, 128>}, {pipeline_mode = #tpu.pipeline_mode<synchronous>, transform_indices = @transform_3, window_bounds = array<i64: 128, 128>}, {pipeline_mode = #tpu.pipeline_mode<synchronous>, transform_indices = @transform_4, window_bounds = array<i64: 1, 128>}, {transform_indices = @transform_5, window_bounds = array<i64: 512, 128>}]} {
    %c0_i32 = arith.constant 0 : i32
    %0 = arith.cmpi eq, %arg1, %c0_i32 : i32
    %1 = arith.extui %0 : i1 to i32
    %c0_i32_0 = arith.constant 0 : i32
    %2 = arith.cmpi ne, %1, %c0_i32_0 : i32
    scf.if %2 {
      %cst_9 = arith.constant 0.000000e+00 : f32
      %12 = vector.broadcast %cst_9 : f32 to vector<512x128xf32>
      %c0_10 = arith.constant 0 : index
      %c0_11 = arith.constant 0 : index
      %13 = vector.load %arg8[%c0_10, %c0_11] : memref<512x128xf32, #tpu.memory_space<vmem>>, vector<512x128xf32>
      tpu.vector_store %arg8[%c0_10, %c0_11], %12 {strides = array<i32>} : memref<512x128xf32, #tpu.memory_space<vmem>>, vector<512x128xf32>,
    } else {
    }
    %c0 = arith.constant 0 : index
    %c0_1 = arith.constant 0 : index
    %3 = vector.load %arg8[%c0, %c0_1] : memref<512x128xf32, #tpu.memory_space<vmem>>, vector<512x128xf32>
    %c0_2 = arith.constant 0 : index
    %c0_3 = arith.constant 0 : index
    %4 = vector.load %arg2[%c0_2, %c0_3] : memref<512x512xbf16, #tpu.memory_space<vmem>>, vector<512x512xbf16>
    %c0_4 = arith.constant 0 : index
    %c0_5 = arith.constant 0 : index
    %5 = vector.load %arg3[%c0_4, %c0_5] : memref<512x128xbf16, #tpu.memory_space<vmem>>, vector<512x128xbf16>
    %cst = arith.constant dense<0.000000e+00> : vector<512x128xf32>
    %6 = tpu.matmul %4, %5, %cst {dimension_numbers = #tpu.dot_dimension_numbers<[1], [0], [0], [1], [0, 0, 1, 1], [], []>} : vector<512x512xbf16>, vector<512x128xbf16>, vector<512x128xf32> -> vector<512x128xf32>
    %7 = arith.addf %3, %6 : vector<512x128xf32>
    %c0_6 = arith.constant 0 : index
    %c0_7 = arith.constant 0 : index
    %8 = vector.load %arg8[%c0_6, %c0_7] : memref<512x128xf32, #tpu.memory_space<vmem>>, vector<512x128xf32>
    tpu.vector_store %arg8[%c0_6, %c0_7], %7 {strides = array<i32>} : memref<512x128xf32, #tpu.memory_space<vmem>>, vector<512x128xf32>,
    %c1_i32 = arith.constant 1 : i32
    %9 = arith.cmpi eq, %arg1, %c1_i32 : i32
    %10 = arith.extui %9 : i1 to i32
    %c0_i32_8 = arith.constant 0 : i32
    %11 = arith.cmpi ne, %10, %c0_i32_8 : i32
    scf.if %11 {
      %c0_9 = arith.constant 0 : index
      %c0_10 = arith.constant 0 : index
      %12 = vector.load %arg8[%c0_9, %c0_10] : memref<512x128xf32, #tpu.memory_space<vmem>>, vector<512x128xf32>
      %c0_11 = arith.constant 0 : index
      %c0_12 = arith.constant 0 : index
      %13 = vector.load %arg5[%c0_11, %c0_12] : memref<128x128xf32, #tpu.memory_space<vmem>>, vector<128x128xf32>
      %cst_13 = arith.constant dense<0.000000e+00> : vector<512x128xf32>
      %14 = tpu.matmul %12, %13, %cst_13 {dimension_numbers = #tpu.dot_dimension_numbers<[1], [0], [0], [1], [0, 0, 1, 1], [], []>} : vector<512x128xf32>, vector<128x128xf32>, vector<512x128xf32> -> vector<512x128xf32>
      %c0_14 = arith.constant 0 : index
      %c0_15 = arith.constant 0 : index
      %15 = vector.load %arg6[%c0_14, %c0_15] : memref<1x128xf32, #tpu.memory_space<vmem>>, vector<1x128xf32>
      %16 = vector.broadcast %15 : vector<1x128xf32> to vector<512x128xf32>
      %17 = arith.addf %14, %16 : vector<512x128xf32>
      %cst_16 = arith.constant 0.000000e+00 : f32
      %18 = vector.broadcast %cst_16 : f32 to vector<512x128xf32>
      %19 = arith.maximumf %17, %18 : vector<512x128xf32>
      %c0_17 = arith.constant 0 : index
      %c0_18 = arith.constant 0 : index
      %20 = vector.load %arg4[%c0_17, %c0_18] : memref<512x128xf32, #tpu.memory_space<vmem>>, vector<512x128xf32>
      %21 = arith.addf %20, %19 : vector<512x128xf32>
      %c0_19 = arith.constant 0 : index
      %c0_20 = arith.constant 0 : index
      %22 = vector.load %arg7[%c0_19, %c0_20] : memref<512x128xf32, #tpu.memory_space<vmem>>, vector<512x128xf32>
      tpu.vector_store %arg7[%c0_19, %c0_20], %21 {strides = array<i32>} : memref<512x128xf32, #tpu.memory_space<vmem>>, vector<512x128xf32>,
    } else {
    }
    return
  }
  func.func @transform_0(%arg0: i32, %arg1: i32) -> (i32, i32) {
    %c0_i32 = arith.constant 0 : i32
    return %arg0, %arg1 : i32, i32
  }
  func.func @transform_1(%arg0: i32, %arg1: i32) -> (i32, i32) {
    %c0_i32 = arith.constant 0 : i32
    %c0_i32_0 = arith.constant 0 : i32
    return %arg1, %c0_i32 : i32, i32
  }
  func.func @transform_2(%arg0: i32, %arg1: i32) -> (i32, i32) {
    %c0_i32 = arith.constant 0 : i32
    %c0_i32_0 = arith.constant 0 : i32
    return %arg0, %c0_i32 : i32, i32
  }
  func.func @transform_3(%arg0: i32, %arg1: i32) -> (i32, i32) {
    %c0_i32 = arith.constant 0 : i32
    %c0_i32_0 = arith.constant 0 : i32
    %c0_i32_1 = arith.constant 0 : i32
    return %c0_i32, %c0_i32_0 : i32, i32
  }
  func.func @transform_4(%arg0: i32, %arg1: i32) -> (i32, i32) {
    %c0_i32 = arith.constant 0 : i32
    %c0_i32_0 = arith.constant 0 : i32
    %c0_i32_1 = arith.constant 0 : i32
    return %c0_i32, %c0_i32_0 : i32, i32
  }
  func.func @transform_5(%arg0: i32, %arg1: i32) -> (i32, i32) {
    %c0_i32 = arith.constant 0 : i32
    %c0_i32_0 = arith.constant 0 : i32
    return %arg0, %c0_i32 : i32, i32
  }
}

module attributes {stable_mosaic.version = 11 : i64} {
  func.func @_group_fm_kernel_dual(%arg0: i32, %arg1: i32, %arg2: memref<512x512xbf16, #tpu.memory_space<vmem>>, %arg3: memref<512x128xbf16, #tpu.memory_space<vmem>>, %arg4: memref<512x128xf32, #tpu.memory_space<vmem>>, %arg5: memref<128x128xf32, #tpu.memory_space<vmem>>, %arg6: memref<1x128xf32, #tpu.memory_space<vmem>>, %arg7: memref<512x128xf32, #tpu.memory_space<vmem>>, %arg8: memref<512x128xbf16, #tpu.memory_space<vmem>>, %arg9: memref<512x128xf32, #tpu.memory_space<vmem>>) attributes {dimension_semantics = [#tpu.dimension_semantics<parallel>, #tpu.dimension_semantics<arbitrary>], iteration_bounds = array<i64: 2, 2>, scalar_prefetch = 0 : i64, scratch_operands = 1 : i64, tpu.core_type = #tpu.core_type<tc>, window_params = [{transform_indices = @transform_0, window_bounds = array<i64: 512, 512>}, {transform_indices = @transform_1, window_bounds = array<i64: 512, 128>}, {transform_indices = @transform_2, window_bounds = array<i64: 512, 128>}, {pipeline_mode = #tpu.pipeline_mode<synchronous>, transform_indices = @transform_3, window_bounds = array<i64: 128, 128>}, {pipeline_mode = #tpu.pipeline_mode<synchronous>, transform_indices = @transform_4, window_bounds = array<i64: 1, 128>}, {transform_indices = @transform_5, window_bounds = array<i64: 512, 128>}, {transform_indices = @transform_6, window_bounds = array<i64: 512, 128>}]} {
    %c0_i32 = arith.constant 0 : i32
    %0 = arith.cmpi eq, %arg1, %c0_i32 : i32
    %1 = arith.extui %0 : i1 to i32
    %c0_i32_0 = arith.constant 0 : i32
    %2 = arith.cmpi ne, %1, %c0_i32_0 : i32
    scf.if %2 {
      %cst_9 = arith.constant 0.000000e+00 : f32
      %12 = vector.broadcast %cst_9 : f32 to vector<512x128xf32>
      %c0_10 = arith.constant 0 : index
      %c0_11 = arith.constant 0 : index
      %13 = vector.load %arg9[%c0_10, %c0_11] : memref<512x128xf32, #tpu.memory_space<vmem>>, vector<512x128xf32>
      tpu.vector_store %arg9[%c0_10, %c0_11], %12 {strides = array<i32>} : memref<512x128xf32, #tpu.memory_space<vmem>>, vector<512x128xf32>,
    } else {
    }
    %c0 = arith.constant 0 : index
    %c0_1 = arith.constant 0 : index
    %3 = vector.load %arg9[%c0, %c0_1] : memref<512x128xf32, #tpu.memory_space<vmem>>, vector<512x128xf32>
    %c0_2 = arith.constant 0 : index
    %c0_3 = arith.constant 0 : index
    %4 = vector.load %arg2[%c0_2, %c0_3] : memref<512x512xbf16, #tpu.memory_space<vmem>>, vector<512x512xbf16>
    %c0_4 = arith.constant 0 : index
    %c0_5 = arith.constant 0 : index
    %5 = vector.load %arg3[%c0_4, %c0_5] : memref<512x128xbf16, #tpu.memory_space<vmem>>, vector<512x128xbf16>
    %cst = arith.constant dense<0.000000e+00> : vector<512x128xf32>
    %6 = tpu.matmul %4, %5, %cst {dimension_numbers = #tpu.dot_dimension_numbers<[1], [0], [0], [1], [0, 0, 1, 1], [], []>} : vector<512x512xbf16>, vector<512x128xbf16>, vector<512x128xf32> -> vector<512x128xf32>
    %7 = arith.addf %3, %6 : vector<512x128xf32>
    %c0_6 = arith.constant 0 : index
    %c0_7 = arith.constant 0 : index
    %8 = vector.load %arg9[%c0_6, %c0_7] : memref<512x128xf32, #tpu.memory_space<vmem>>, vector<512x128xf32>
    tpu.vector_store %arg9[%c0_6, %c0_7], %7 {strides = array<i32>} : memref<512x128xf32, #tpu.memory_space<vmem>>, vector<512x128xf32>,
    %c1_i32 = arith.constant 1 : i32
    %9 = arith.cmpi eq, %arg1, %c1_i32 : i32
    %10 = arith.extui %9 : i1 to i32
    %c0_i32_8 = arith.constant 0 : i32
    %11 = arith.cmpi ne, %10, %c0_i32_8 : i32
    scf.if %11 {
      %c0_9 = arith.constant 0 : index
      %c0_10 = arith.constant 0 : index
      %12 = vector.load %arg9[%c0_9, %c0_10] : memref<512x128xf32, #tpu.memory_space<vmem>>, vector<512x128xf32>
      %c0_11 = arith.constant 0 : index
      %c0_12 = arith.constant 0 : index
      %13 = vector.load %arg5[%c0_11, %c0_12] : memref<128x128xf32, #tpu.memory_space<vmem>>, vector<128x128xf32>
      %cst_13 = arith.constant dense<0.000000e+00> : vector<512x128xf32>
      %14 = tpu.matmul %12, %13, %cst_13 {dimension_numbers = #tpu.dot_dimension_numbers<[1], [0], [0], [1], [0, 0, 1, 1], [], []>} : vector<512x128xf32>, vector<128x128xf32>, vector<512x128xf32> -> vector<512x128xf32>
      %c0_14 = arith.constant 0 : index
      %c0_15 = arith.constant 0 : index
      %15 = vector.load %arg6[%c0_14, %c0_15] : memref<1x128xf32, #tpu.memory_space<vmem>>, vector<1x128xf32>
      %16 = vector.broadcast %15 : vector<1x128xf32> to vector<512x128xf32>
      %17 = arith.addf %14, %16 : vector<512x128xf32>
      %cst_16 = arith.constant 0.000000e+00 : f32
      %18 = vector.broadcast %cst_16 : f32 to vector<512x128xf32>
      %19 = arith.maximumf %17, %18 : vector<512x128xf32>
      %c0_17 = arith.constant 0 : index
      %c0_18 = arith.constant 0 : index
      %20 = vector.load %arg4[%c0_17, %c0_18] : memref<512x128xf32, #tpu.memory_space<vmem>>, vector<512x128xf32>
      %21 = arith.addf %20, %19 : vector<512x128xf32>
      %c0_19 = arith.constant 0 : index
      %c0_20 = arith.constant 0 : index
      %22 = vector.load %arg7[%c0_19, %c0_20] : memref<512x128xf32, #tpu.memory_space<vmem>>, vector<512x128xf32>
      tpu.vector_store %arg7[%c0_19, %c0_20], %21 {strides = array<i32>} : memref<512x128xf32, #tpu.memory_space<vmem>>, vector<512x128xf32>,
      %23 = arith.truncf %21 : vector<512x128xf32> to vector<512x128xbf16>
      %c0_21 = arith.constant 0 : index
      %c0_22 = arith.constant 0 : index
      %24 = vector.load %arg8[%c0_21, %c0_22] : memref<512x128xbf16, #tpu.memory_space<vmem>>, vector<512x128xbf16>
      tpu.vector_store %arg8[%c0_21, %c0_22], %23 {strides = array<i32>} : memref<512x128xbf16, #tpu.memory_space<vmem>>, vector<512x128xbf16>,
    } else {
    }
    return
  }
  func.func @transform_0(%arg0: i32, %arg1: i32) -> (i32, i32) {
    %c0_i32 = arith.constant 0 : i32
    return %arg0, %arg1 : i32, i32
  }
  func.func @transform_1(%arg0: i32, %arg1: i32) -> (i32, i32) {
    %c0_i32 = arith.constant 0 : i32
    %c0_i32_0 = arith.constant 0 : i32
    return %arg1, %c0_i32 : i32, i32
  }
  func.func @transform_2(%arg0: i32, %arg1: i32) -> (i32, i32) {
    %c0_i32 = arith.constant 0 : i32
    %c0_i32_0 = arith.constant 0 : i32
    return %arg0, %c0_i32 : i32, i32
  }
  func.func @transform_3(%arg0: i32, %arg1: i32) -> (i32, i32) {
    %c0_i32 = arith.constant 0 : i32
    %c0_i32_0 = arith.constant 0 : i32
    %c0_i32_1 = arith.constant 0 : i32
    return %c0_i32, %c0_i32_0 : i32, i32
  }
  func.func @transform_4(%arg0: i32, %arg1: i32) -> (i32, i32) {
    %c0_i32 = arith.constant 0 : i32
    %c0_i32_0 = arith.constant 0 : i32
    %c0_i32_1 = arith.constant 0 : i32
    return %c0_i32, %c0_i32_0 : i32, i32
  }
  func.func @transform_5(%arg0: i32, %arg1: i32) -> (i32, i32) {
    %c0_i32 = arith.constant 0 : i32
    %c0_i32_0 = arith.constant 0 : i32
    return %arg0, %c0_i32 : i32, i32
  }
  func.func @transform_6(%arg0: i32, %arg1: i32) -> (i32, i32) {
    %c0_i32 = arith.constant 0 : i32
    %c0_i32_0 = arith.constant 0 : i32
    return %arg0, %c0_i32 : i32, i32
  }
}

</mosaic_0001>

<bundles_post_ra>
// kernel: group_additive_coupling_forward.3
= control target key start
LH: loop header
LB: loop body
LE: loop exit
PB: predicated region body
PF: predicated region fallthrough
CT: control target
= control target key end

     0   :  { %s4052_s18 = smov 0   ;;  %s4054_s19 = smov 0   ;;  %s4918_s0 = inlined_call_operand.vmem [shape: bf16[1024,1024], index: 0, kind: input, shape index: {}]   ;;  %s4919_s1 = inlined_call_operand.vmem [shape: bf16[1024,128], index: 1, kind: input, shape index: {}]   ;;  %s4920_s2 = inlined_call_operand.vmem [shape: f32[1024,128], index: 2, kind: input, shape index: {}]   ;;  %s4921_s3 = inlined_call_operand.vmem [shape: f32[128,128], index: 3, kind: input, shape index: {}]   ;;  %s4922_s4 = inlined_call_operand.vmem [shape: f32[1,128], index: 4, kind: input, shape index: {}]   ;;  %s4923_s5 = inlined_call_operand.vmem [shape: f32[1024,128], index: 5, kind: output, shape index: {}]  }
   0x1   :  { %s4056_s20 = smov 0   ;;  %s4058_s21 = smov 0  }
   0x2   :  { %s4060_s22 = smov 0   ;;  %s4062_s23 = smov 0  }
   0x3   :  { %s4064_s24 = smov 0  }
   0x4 LB: > { %s24_s25 = sadd.s32 1, %s4010_s22  ;;  %s27_s26 = sadd.s32 1, %s4014_s23  ;;  %s4018_s24 = sphi %s4064_s24, %s15_s24   ;;  %s4014_s23 = sphi %s4062_s23, %s4929_s23   ;;  %s4010_s22 = sphi %s4060_s22, %s4928_s22   ;;  %s4006_s21 = sphi %s4058_s21, %s4927_s21   ;;  %s4002_s20 = sphi %s4056_s20, %s4926_s20   ;;  %s3998_s19 = sphi %s4054_s19, %s4925_s19   ;;  %s3994_s18 = sphi %s4052_s18, %s4924_s18  }
   0x5   : > { %p25_p0 = scmp.ge.s32.totalorder %s24_s25, 2  ;;  %p43_p1 = scmp.ne.s32.totalorder %s3998_s19, %s3994_s18 }
   0x6   : > { %p44_p2 = scmp.eq.s32.totalorder %s4018_s24, 0  ;;  %s36_s30 = sadd.s32 1, %s3998_s19 }
   0x7   : > { %s4931_s25 = smov (%p25_p0, %s24_s25), 0  ;;  %s4933_s26 = smov (!%p25_p0, %s27_s26), %s4014_s23 }
   0x8   : > { %p45_p3 = por %p44_p2, %p43_p1  ;;  %p29_p4 = scmp.ge.s32.totalorder %s4933_s26, 2 }
   0x9   : > { %s32_s27 = ssub.s32 %s4010_s22, %s4931_s25  ;;  %p3262_p6 = scmp.ge.s32.totalorder %s4018_s24, 4 }
   0xa   : > { %s4935_s26 = smov (%p29_p4, %s4933_s26), 0 }
   0xb   : > { %s31_s28 = ssub.s32 %s4014_s23, %s4935_s26  ;;  %195 = sbr.rel (%p3262_p6) target bundleno = 87 (0x57), region = 24 }
   0xc   : > { %s33_s29 = sor.u32 %s32_s27, %s31_s28 }
   0xd   : > { %p34_p5 = scmp.eq.s32.totalorder %s33_s29, 0 }
   0xf   : > { %s4103_s6 = scalar_select %p34_p5, %s3998_s19, %s36_s30  }
  0x10   : > { %198 = sbr.rel (!%p45_p3) target bundleno = 87 (0x57), region = 28  ;;  %s200_s7 = sand.u32 (%p45_p3), 1, %s3998_s19  }
  0x11   : > { %s3265_s8 = sshll.u32 (%p45_p3), %s4010_s22, 2  ;;  %s3263_s9 = sshll.u32 (%p45_p3), %s200_s7, 10 }
  0x12   : > { %s3441_s10 = sshll.u32 (%p45_p3), %s4014_s23, 9  ;;  %s4117_s16 = scalar_lea.vmem (%p45_p3), [#allocation3], %s3263_s9 }
  0x13   : > { %s206_s11 = sadd.s32 (%p45_p3), %s3441_s10, %s3265_s8 }
  0x14   : > { %s3267_s12 = sshll.u32 (%p45_p3), %s206_s11, 2 }
  0x15   : > { %s4112_s15 = scalar_lea.vmem %s4918_s0, %s3267_s12 }
  0x16   : > { %v221_v0 = vld [vmem:[%s4112_s15] sm:$0xff]  ;;  %v223_v1 = vld [vmem:[%s4112_s15 + $0x8] sm:$0xff] }
  0x17   : > { %v225_v2 = vld [vmem:[%s4112_s15 + $0x20] sm:$0xff]  ;;  %222 = vst [vmem:[%s4117_s16] sm:$0xff] %v221_v0  ;;  %224 = vst [vmem:[%s4117_s16 + $0x8] sm:$0xff] %v223_v1  ;;  %v227_v3 = vld [vmem:[%s4112_s15 + $0x28] sm:$0xff] }
  0x18   : > { %226 = vst [vmem:[%s4117_s16 + $0x10] sm:$0xff] %v225_v2  ;;  %v229_v4 = vld [vmem:[%s4112_s15 + $0x40] sm:$0xff]  ;;  %v231_v5 = vld [vmem:[%s4112_s15 + $0x48] sm:$0xff]  ;;  %228 = vst [vmem:[%s4117_s16 + $0x18] sm:$0xff] %v227_v3 }
  0x19   : > { %230 = vst [vmem:[%s4117_s16 + $0x20] sm:$0xff] %v229_v4  ;;  %232 = vst [vmem:[%s4117_s16 + $0x28] sm:$0xff] %v231_v5  ;;  %v233_v6 = vld [vmem:[%s4112_s15 + $0x60] sm:$0xff]  ;;  %v235_v7 = vld [vmem:[%s4112_s15 + $0x68] sm:$0xff] }
  0x1a   : > { %v237_v8 = vld [vmem:[%s4112_s15 + $0x80] sm:$0xff]  ;;  %234 = vst [vmem:[%s4117_s16 + $0x30] sm:$0xff] %v233_v6  ;;  %236 = vst [vmem:[%s4117_s16 + $0x38] sm:$0xff] %v235_v7  ;;  %v239_v9 = vld [vmem:[%s4112_s15 + $0x88] sm:$0xff] }
  0x1b   : > { %238 = vst [vmem:[%s4117_s16 + $0x40] sm:$0xff] %v237_v8  ;;  %v241_v10 = vld [vmem:[%s4112_s15 + $0xa0] sm:$0xff]  ;;  %v243_v11 = vld [vmem:[%s4112_s15 + $0xa8] sm:$0xff]  ;;  %240 = vst [vmem:[%s4117_s16 + $0x48] sm:$0xff] %v239_v9 }
  0x1c   : > { %242 = vst [vmem:[%s4117_s16 + $0x50] sm:$0xff] %v241_v10  ;;  %244 = vst [vmem:[%s4117_s16 + $0x58] sm:$0xff] %v243_v11  ;;  %v245_v12 = vld [vmem:[%s4112_s15 + $0xc0] sm:$0xff]  ;;  %v247_v13 = vld [vmem:[%s4112_s15 + $0xc8] sm:$0xff] }
  0x1d   : > { %v249_v14 = vld [vmem:[%s4112_s15 + $0xe0] sm:$0xff]  ;;  %246 = vst [vmem:[%s4117_s16 + $0x60] sm:$0xff] %v245_v12  ;;  %248 = vst [vmem:[%s4117_s16 + $0x68] sm:$0xff] %v247_v13  ;;  %v251_v15 = vld [vmem:[%s4112_s15 + $0xe8] sm:$0xff] }
  0x1e   : > { %250 = vst [vmem:[%s4117_s16 + $0x70] sm:$0xff] %v249_v14  ;;  %v253_v16 = vld [vmem:[%s4112_s15 + $0x100] sm:$0xff]  ;;  %v255_v17 = vld [vmem:[%s4112_s15 + $0x108] sm:$0xff]  ;;  %252 = vst [vmem:[%s4117_s16 + $0x78] sm:$0xff] %v251_v15 }
  0x1f   : > { %254 = vst [vmem:[%s4117_s16 + $0x80] sm:$0xff] %v253_v16  ;;  %256 = vst [vmem:[%s4117_s16 + $0x88] sm:$0xff] %v255_v17  ;;  %v257_v18 = vld [vmem:[%s4112_s15 + $0x120] sm:$0xff]  ;;  %v259_v19 = vld [vmem:[%s4112_s15 + $0x128] sm:$0xff] }
  0x20   : > { %v261_v20 = vld [vmem:[%s4112_s15 + $0x140] sm:$0xff]  ;;  %258 = vst [vmem:[%s4117_s16 + $0x90] sm:$0xff] %v257_v18  ;;  %260 = vst [vmem:[%s4117_s16 + $0x98] sm:$0xff] %v259_v19  ;;  %v263_v21 = vld [vmem:[%s4112_s15 + $0x148] sm:$0xff] }
  0x21   : > { %262 = vst [vmem:[%s4117_s16 + $0xa0] sm:$0xff] %v261_v20  ;;  %v265_v22 = vld [vmem:[%s4112_s15 + $0x160] sm:$0xff]  ;;  %v267_v23 = vld [vmem:[%s4112_s15 + $0x168] sm:$0xff]  ;;  %264 = vst [vmem:[%s4117_s16 + $0xa8] sm:$0xff] %v263_v21 }
  0x22   : > { %266 = vst [vmem:[%s4117_s16 + $0xb0] sm:$0xff] %v265_v22  ;;  %268 = vst [vmem:[%s4117_s16 + $0xb8] sm:$0xff] %v267_v23  ;;  %v269_v24 = vld [vmem:[%s4112_s15 + $0x180] sm:$0xff]  ;;  %v271_v25 = vld [vmem:[%s4112_s15 + $0x188] sm:$0xff] }
  0x23   : > { %v273_v26 = vld [vmem:[%s4112_s15 + $0x1a0] sm:$0xff]  ;;  %270 = vst [vmem:[%s4117_s16 + $0xc0] sm:$0xff] %v269_v24  ;;  %272 = vst [vmem:[%s4117_s16 + $0xc8] sm:$0xff] %v271_v25  ;;  %v275_v27 = vld [vmem:[%s4112_s15 + $0x1a8] sm:$0xff] }
  0x24   : > { %274 = vst [vmem:[%s4117_s16 + $0xd0] sm:$0xff] %v273_v26  ;;  %v277_v28 = vld [vmem:[%s4112_s15 + $0x1c0] sm:$0xff]  ;;  %v279_v29 = vld [vmem:[%s4112_s15 + $0x1c8] sm:$0xff]  ;;  %276 = vst [vmem:[%s4117_s16 + $0xd8] sm:$0xff] %v275_v27 }
  0x25   : > { %278 = vst [vmem:[%s4117_s16 + $0xe0] sm:$0xff] %v277_v28  ;;  %280 = vst [vmem:[%s4117_s16 + $0xe8] sm:$0xff] %v279_v29  ;;  %v281_v30 = vld [vmem:[%s4112_s15 + $0x1e0] sm:$0xff]  ;;  %v283_v31 = vld [vmem:[%s4112_s15 + $0x1e8] sm:$0xff] }
  0x26   : > { %v285_v32 = vld [vmem:[%s4112_s15 + $0x200] sm:$0xff]  ;;  %282 = vst [vmem:[%s4117_s16 + $0xf0] sm:$0xff] %v281_v30  ;;  %284 = vst [vmem:[%s4117_s16 + $0xf8] sm:$0xff] %v283_v31  ;;  %v287_v33 = vld [vmem:[%s4112_s15 + $0x208] sm:$0xff] }
  0x27   : > { %286 = vst [vmem:[%s4117_s16 + $0x100] sm:$0xff] %v285_v32  ;;  %v289_v34 = vld [vmem:[%s4112_s15 + $0x220] sm:$0xff]  ;;  %v291_v35 = vld [vmem:[%s4112_s15 + $0x228] sm:$0xff]  ;;  %288 = vst [vmem:[%s4117_s16 + $0x108] sm:$0xff] %v287_v33 }
  0x28   : > { %290 = vst [vmem:[%s4117_s16 + $0x110] sm:$0xff] %v289_v34  ;;  %292 = vst [vmem:[%s4117_s16 + $0x118] sm:$0xff] %v291_v35  ;;  %v293_v36 = vld [vmem:[%s4112_s15 + $0x240] sm:$0xff]  ;;  %v295_v37 = vld [vmem:[%s4112_s15 + $0x248] sm:$0xff] }
  0x29   : > { %v297_v38 = vld [vmem:[%s4112_s15 + $0x260] sm:$0xff]  ;;  %294 = vst [vmem:[%s4117_s16 + $0x120] sm:$0xff] %v293_v36  ;;  %296 = vst [vmem:[%s4117_s16 + $0x128] sm:$0xff] %v295_v37  ;;  %v299_v39 = vld [vmem:[%s4112_s15 + $0x268] sm:$0xff] }
  0x2a   : > { %298 = vst [vmem:[%s4117_s16 + $0x130] sm:$0xff] %v297_v38  ;;  %v301_v40 = vld [vmem:[%s4112_s15 + $0x280] sm:$0xff]  ;;  %v303_v41 = vld [vmem:[%s4112_s15 + $0x288] sm:$0xff]  ;;  %300 = vst [vmem:[%s4117_s16 + $0x138] sm:$0xff] %v299_v39 }
  0x2b   : > { %302 = vst [vmem:[%s4117_s16 + $0x140] sm:$0xff] %v301_v40  ;;  %304 = vst [vmem:[%s4117_s16 + $0x148] sm:$0xff] %v303_v41  ;;  %v305_v42 = vld [vmem:[%s4112_s15 + $0x2a0] sm:$0xff]  ;;  %v307_v43 = vld [vmem:[%s4112_s15 + $0x2a8] sm:$0xff] }
  0x2c   : > { %v309_v44 = vld [vmem:[%s4112_s15 + $0x2c0] sm:$0xff]  ;;  %306 = vst [vmem:[%s4117_s16 + $0x150] sm:$0xff] %v305_v42  ;;  %308 = vst [vmem:[%s4117_s16 + $0x158] sm:$0xff] %v307_v43  ;;  %v311_v45 = vld [vmem:[%s4112_s15 + $0x2c8] sm:$0xff] }
  0x2d   : > { %310 = vst [vmem:[%s4117_s16 + $0x160] sm:$0xff] %v309_v44  ;;  %v313_v46 = vld [vmem:[%s4112_s15 + $0x2e0] sm:$0xff]  ;;  %v315_v47 = vld [vmem:[%s4112_s15 + $0x2e8] sm:$0xff]  ;;  %312 = vst [vmem:[%s4117_s16 + $0x168] sm:$0xff] %v311_v45 }
  0x2e   : > { %314 = vst [vmem:[%s4117_s16 + $0x170] sm:$0xff] %v313_v46  ;;  %316 = vst [vmem:[%s4117_s16 + $0x178] sm:$0xff] %v315_v47  ;;  %v317_v48 = vld [vmem:[%s4112_s15 + $0x300] sm:$0xff]  ;;  %v319_v49 = vld [vmem:[%s4112_s15 + $0x308] sm:$0xff] }
  0x2f   : > { %v321_v50 = vld [vmem:[%s4112_s15 + $0x320] sm:$0xff]  ;;  %318 = vst [vmem:[%s4117_s16 + $0x180] sm:$0xff] %v317_v48  ;;  %320 = vst [vmem:[%s4117_s16 + $0x188] sm:$0xff] %v319_v49  ;;  %v323_v51 = vld [vmem:[%s4112_s15 + $0x328] sm:$0xff] }
  0x30   : > { %322 = vst [vmem:[%s4117_s16 + $0x190] sm:$0xff] %v321_v50  ;;  %v325_v52 = vld [vmem:[%s4112_s15 + $0x340] sm:$0xff]  ;;  %v327_v53 = vld [vmem:[%s4112_s15 + $0x348] sm:$0xff]  ;;  %324 = vst [vmem:[%s4117_s16 + $0x198] sm:$0xff] %v323_v51 }
  0x31   : > { %326 = vst [vmem:[%s4117_s16 + $0x1a0] sm:$0xff] %v325_v52  ;;  %328 = vst [vmem:[%s4117_s16 + $0x1a8] sm:$0xff] %v327_v53  ;;  %v329_v54 = vld [vmem:[%s4112_s15 + $0x360] sm:$0xff]  ;;  %v331_v55 = vld [vmem:[%s4112_s15 + $0x368] sm:$0xff] }
  0x32   : > { %v333_v56 = vld [vmem:[%s4112_s15 + $0x380] sm:$0xff]  ;;  %330 = vst [vmem:[%s4117_s16 + $0x1b0] sm:$0xff] %v329_v54  ;;  %332 = vst [vmem:[%s4117_s16 + $0x1b8] sm:$0xff] %v331_v55  ;;  %v335_v57 = vld [vmem:[%s4112_s15 + $0x388] sm:$0xff] }
  0x33   : > { %334 = vst [vmem:[%s4117_s16 + $0x1c0] sm:$0xff] %v333_v56  ;;  %v337_v58 = vld [vmem:[%s4112_s15 + $0x3a0] sm:$0xff]  ;;  %v339_v59 = vld [vmem:[%s4112_s15 + $0x3a8] sm:$0xff]  ;;  %336 = vst [vmem:[%s4117_s16 + $0x1c8] sm:$0xff] %v335_v57 }
  0x34   : > { %338 = vst [vmem:[%s4117_s16 + $0x1d0] sm:$0xff] %v337_v58  ;;  %340 = vst [vmem:[%s4117_s16 + $0x1d8] sm:$0xff] %v339_v59  ;;  %v341_v60 = vld [vmem:[%s4112_s15 + $0x3c0] sm:$0xff]  ;;  %v343_v61 = vld [vmem:[%s4112_s15 + $0x3c8] sm:$0xff] }
  0x35   : > { %v345_v62 = vld [vmem:[%s4112_s15 + $0x3e0] sm:$0xff]  ;;  %342 = vst [vmem:[%s4117_s16 + $0x1e0] sm:$0xff] %v341_v60  ;;  %344 = vst [vmem:[%s4117_s16 + $0x1e8] sm:$0xff] %v343_v61  ;;  %v347_v63 = vld [vmem:[%s4112_s15 + $0x3e8] sm:$0xff] }
  0x36   : > { %346 = vst [vmem:[%s4117_s16 + $0x1f0] sm:$0xff] %v345_v62  ;;  %v349_v0 = vld [vmem:[%s4112_s15 + $0x400] sm:$0xff]  ;;  %v351_v1 = vld [vmem:[%s4112_s15 + $0x408] sm:$0xff]  ;;  %348 = vst [vmem:[%s4117_s16 + $0x1f8] sm:$0xff] %v347_v63 }
  0x37   : > { %350 = vst [vmem:[%s4117_s16 + $0x200] sm:$0xff] %v349_v0  ;;  %352 = vst [vmem:[%s4117_s16 + $0x208] sm:$0xff] %v351_v1  ;;  %v353_v2 = vld [vmem:[%s4112_s15 + $0x420] sm:$0xff]  ;;  %v355_v3 = vld [vmem:[%s4112_s15 + $0x428] sm:$0xff] }
  0x38   : > { %v357_v4 = vld [vmem:[%s4112_s15 + $0x440] sm:$0xff]  ;;  %354 = vst [vmem:[%s4117_s16 + $0x210] sm:$0xff] %v353_v2  ;;  %356 = vst [vmem:[%s4117_s16 + $0x218] sm:$0xff] %v355_v3  ;;  %v359_v5 = vld [vmem:[%s4112_s15 + $0x448] sm:$0xff] }
  0x39   : > { %358 = vst [vmem:[%s4117_s16 + $0x220] sm:$0xff] %v357_v4  ;;  %v361_v6 = vld [vmem:[%s4112_s15 + $0x460] sm:$0xff]  ;;  %v363_v7 = vld [vmem:[%s4112_s15 + $0x468] sm:$0xff]  ;;  %360 = vst [vmem:[%s4117_s16 + $0x228] sm:$0xff] %v359_v5 }
  0x3a   : > { %362 = vst [vmem:[%s4117_s16 + $0x230] sm:$0xff] %v361_v6  ;;  %364 = vst [vmem:[%s4117_s16 + $0x238] sm:$0xff] %v363_v7  ;;  %v365_v8 = vld [vmem:[%s4112_s15 + $0x480] sm:$0xff]  ;;  %v367_v9 = vld [vmem:[%s4112_s15 + $0x488] sm:$0xff] }
  0x3b   : > { %v369_v10 = vld [vmem:[%s4112_s15 + $0x4a0] sm:$0xff]  ;;  %366 = vst [vmem:[%s4117_s16 + $0x240] sm:$0xff] %v365_v8  ;;  %368 = vst [vmem:[%s4117_s16 + $0x248] sm:$0xff] %v367_v9  ;;  %v371_v11 = vld [vmem:[%s4112_s15 + $0x4a8] sm:$0xff] }
  0x3c   : > { %370 = vst [vmem:[%s4117_s16 + $0x250] sm:$0xff] %v369_v10  ;;  %v373_v12 = vld [vmem:[%s4112_s15 + $0x4c0] sm:$0xff]  ;;  %v375_v13 = vld [vmem:[%s4112_s15 + $0x4c8] sm:$0xff]  ;;  %372 = vst [vmem:[%s4117_s16 + $0x258] sm:$0xff] %v371_v11 }
  0x3d   : > { %374 = vst [vmem:[%s4117_s16 + $0x260] sm:$0xff] %v373_v12  ;;  %376 = vst [vmem:[%s4117_s16 + $0x268] sm:$0xff] %v375_v13  ;;  %v377_v14 = vld [vmem:[%s4112_s15 + $0x4e0] sm:$0xff]  ;;  %v379_v15 = vld [vmem:[%s4112_s15 + $0x4e8] sm:$0xff] }
  0x3e   : > { %v381_v16 = vld [vmem:[%s4112_s15 + $0x500] sm:$0xff]  ;;  %378 = vst [vmem:[%s4117_s16 + $0x270] sm:$0xff] %v377_v14  ;;  %380 = vst [vmem:[%s4117_s16 + $0x278] sm:$0xff] %v379_v15  ;;  %v383_v17 = vld [vmem:[%s4112_s15 + $0x508] sm:$0xff] }
  0x3f   : > { %382 = vst [vmem:[%s4117_s16 + $0x280] sm:$0xff] %v381_v16  ;;  %v385_v18 = vld [vmem:[%s4112_s15 + $0x520] sm:$0xff]  ;;  %v387_v19 = vld [vmem:[%s4112_s15 + $0x528] sm:$0xff]  ;;  %384 = vst [vmem:[%s4117_s16 + $0x288] sm:$0xff] %v383_v17 }
  0x40   : > { %386 = vst [vmem:[%s4117_s16 + $0x290] sm:$0xff] %v385_v18  ;;  %388 = vst [vmem:[%s4117_s16 + $0x298] sm:$0xff] %v387_v19  ;;  %v389_v20 = vld [vmem:[%s4112_s15 + $0x540] sm:$0xff]  ;;  %v391_v21 = vld [vmem:[%s4112_s15 + $0x548] sm:$0xff] }
  0x41   : > { %v393_v22 = vld [vmem:[%s4112_s15 + $0x560] sm:$0xff]  ;;  %390 = vst [vmem:[%s4117_s16 + $0x2a0] sm:$0xff] %v389_v20  ;;  %392 = vst [vmem:[%s4117_s16 + $0x2a8] sm:$0xff] %v391_v21  ;;  %v395_v23 = vld [vmem:[%s4112_s15 + $0x568] sm:$0xff] }
  0x42   : > { %394 = vst [vmem:[%s4117_s16 + $0x2b0] sm:$0xff] %v393_v22  ;;  %v397_v24 = vld [vmem:[%s4112_s15 + $0x580] sm:$0xff]  ;;  %v399_v25 = vld [vmem:[%s4112_s15 + $0x588] sm:$0xff]  ;;  %396 = vst [vmem:[%s4117_s16 + $0x2b8] sm:$0xff] %v395_v23 }
  0x43   : > { %398 = vst [vmem:[%s4117_s16 + $0x2c0] sm:$0xff] %v397_v24  ;;  %400 = vst [vmem:[%s4117_s16 + $0x2c8] sm:$0xff] %v399_v25  ;;  %v401_v26 = vld [vmem:[%s4112_s15 + $0x5a0] sm:$0xff]  ;;  %v403_v27 = vld [vmem:[%s4112_s15 + $0x5a8] sm:$0xff] }
  0x44   : > { %v405_v28 = vld [vmem:[%s4112_s15 + $0x5c0] sm:$0xff]  ;;  %402 = vst [vmem:[%s4117_s16 + $0x2d0] sm:$0xff] %v401_v26  ;;  %404 = vst [vmem:[%s4117_s16 + $0x2d8] sm:$0xff] %v403_v27  ;;  %v407_v29 = vld [vmem:[%s4112_s15 + $0x5c8] sm:$0xff] }
  0x45   : > { %406 = vst [vmem:[%s4117_s16 + $0x2e0] sm:$0xff] %v405_v28  ;;  %v409_v30 = vld [vmem:[%s4112_s15 + $0x5e0] sm:$0xff]  ;;  %v411_v31 = vld [vmem:[%s4112_s15 + $0x5e8] sm:$0xff]  ;;  %408 = vst [vmem:[%s4117_s16 + $0x2e8] sm:$0xff] %v407_v29 }
  0x46   : > { %410 = vst [vmem:[%s4117_s16 + $0x2f0] sm:$0xff] %v409_v30  ;;  %412 = vst [vmem:[%s4117_s16 + $0x2f8] sm:$0xff] %v411_v31  ;;  %v413_v32 = vld [vmem:[%s4112_s15 + $0x600] sm:$0xff]  ;;  %v415_v33 = vld [vmem:[%s4112_s15 + $0x608] sm:$0xff] }
  0x47   : > { %v417_v34 = vld [vmem:[%s4112_s15 + $0x620] sm:$0xff]  ;;  %414 = vst [vmem:[%s4117_s16 + $0x300] sm:$0xff] %v413_v32  ;;  %416 = vst [vmem:[%s4117_s16 + $0x308] sm:$0xff] %v415_v33  ;;  %v419_v35 = vld [vmem:[%s4112_s15 + $0x628] sm:$0xff] }
  0x48   : > { %418 = vst [vmem:[%s4117_s16 + $0x310] sm:$0xff] %v417_v34  ;;  %v421_v36 = vld [vmem:[%s4112_s15 + $0x640] sm:$0xff]  ;;  %v423_v37 = vld [vmem:[%s4112_s15 + $0x648] sm:$0xff]  ;;  %420 = vst [vmem:[%s4117_s16 + $0x318] sm:$0xff] %v419_v35 }
  0x49   : > { %422 = vst [vmem:[%s4117_s16 + $0x320] sm:$0xff] %v421_v36  ;;  %424 = vst [vmem:[%s4117_s16 + $0x328] sm:$0xff] %v423_v37  ;;  %v425_v38 = vld [vmem:[%s4112_s15 + $0x660] sm:$0xff]  ;;  %v427_v39 = vld [vmem:[%s4112_s15 + $0x668] sm:$0xff] }
  0x4a   : > { %v429_v40 = vld [vmem:[%s4112_s15 + $0x680] sm:$0xff]  ;;  %426 = vst [vmem:[%s4117_s16 + $0x330] sm:$0xff] %v425_v38  ;;  %428 = vst [vmem:[%s4117_s16 + $0x338] sm:$0xff] %v427_v39  ;;  %v431_v41 = vld [vmem:[%s4112_s15 + $0x688] sm:$0xff] }
  0x4b   : > { %430 = vst [vmem:[%s4117_s16 + $0x340] sm:$0xff] %v429_v40  ;;  %v433_v42 = vld [vmem:[%s4112_s15 + $0x6a0] sm:$0xff]  ;;  %v435_v43 = vld [vmem:[%s4112_s15 + $0x6a8] sm:$0xff]  ;;  %432 = vst [vmem:[%s4117_s16 + $0x348] sm:$0xff] %v431_v41 }
  0x4c   : > { %434 = vst [vmem:[%s4117_s16 + $0x350] sm:$0xff] %v433_v42  ;;  %436 = vst [vmem:[%s4117_s16 + $0x358] sm:$0xff] %v435_v43  ;;  %v437_v44 = vld [vmem:[%s4112_s15 + $0x6c0] sm:$0xff]  ;;  %v439_v45 = vld [vmem:[%s4112_s15 + $0x6c8] sm:$0xff] }
  0x4d   : > { %v441_v46 = vld [vmem:[%s4112_s15 + $0x6e0] sm:$0xff]  ;;  %438 = vst [vmem:[%s4117_s16 + $0x360] sm:$0xff] %v437_v44  ;;  %440 = vst [vmem:[%s4117_s16 + $0x368] sm:$0xff] %v439_v45  ;;  %v443_v47 = vld [vmem:[%s4112_s15 + $0x6e8] sm:$0xff] }
  0x4e   : > { %442 = vst [vmem:[%s4117_s16 + $0x370] sm:$0xff] %v441_v46  ;;  %v445_v48 = vld [vmem:[%s4112_s15 + $0x700] sm:$0xff]  ;;  %v447_v49 = vld [vmem:[%s4112_s15 + $0x708] sm:$0xff]  ;;  %444 = vst [vmem:[%s4117_s16 + $0x378] sm:$0xff] %v443_v47 }
  0x4f   : > { %446 = vst [vmem:[%s4117_s16 + $0x380] sm:$0xff] %v445_v48  ;;  %448 = vst [vmem:[%s4117_s16 + $0x388] sm:$0xff] %v447_v49  ;;  %v449_v50 = vld [vmem:[%s4112_s15 + $0x720] sm:$0xff]  ;;  %v451_v51 = vld [vmem:[%s4112_s15 + $0x728] sm:$0xff] }
  0x50   : > { %v453_v52 = vld [vmem:[%s4112_s15 + $0x740] sm:$0xff]  ;;  %450 = vst [vmem:[%s4117_s16 + $0x390] sm:$0xff] %v449_v50  ;;  %452 = vst [vmem:[%s4117_s16 + $0x398] sm:$0xff] %v451_v51  ;;  %v455_v53 = vld [vmem:[%s4112_s15 + $0x748] sm:$0xff] }
  0x51   : > { %454 = vst [vmem:[%s4117_s16 + $0x3a0] sm:$0xff] %v453_v52  ;;  %v457_v54 = vld [vmem:[%s4112_s15 + $0x760] sm:$0xff]  ;;  %v459_v55 = vld [vmem:[%s4112_s15 + $0x768] sm:$0xff]  ;;  %456 = vst [vmem:[%s4117_s16 + $0x3a8] sm:$0xff] %v455_v53 }
  0x52   : > { %458 = vst [vmem:[%s4117_s16 + $0x3b0] sm:$0xff] %v457_v54  ;;  %460 = vst [vmem:[%s4117_s16 + $0x3b8] sm:$0xff] %v459_v55  ;;  %v461_v56 = vld [vmem:[%s4112_s15 + $0x780] sm:$0xff]  ;;  %v463_v57 = vld [vmem:[%s4112_s15 + $0x788] sm:$0xff] }
  0x53   : > { %v465_v58 = vld [vmem:[%s4112_s15 + $0x7a0] sm:$0xff]  ;;  %462 = vst [vmem:[%s4117_s16 + $0x3c0] sm:$0xff] %v461_v56  ;;  %464 = vst [vmem:[%s4117_s16 + $0x3c8] sm:$0xff] %v463_v57  ;;  %v467_v59 = vld [vmem:[%s4112_s15 + $0x7a8] sm:$0xff] }
  0x54   : > { %466 = vst [vmem:[%s4117_s16 + $0x3d0] sm:$0xff] %v465_v58  ;;  %v469_v60 = vld [vmem:[%s4112_s15 + $0x7c0] sm:$0xff]  ;;  %v471_v61 = vld [vmem:[%s4112_s15 + $0x7c8] sm:$0xff]  ;;  %468 = vst [vmem:[%s4117_s16 + $0x3d8] sm:$0xff] %v467_v59 }
  0x55   : > { %470 = vst [vmem:[%s4117_s16 + $0x3e0] sm:$0xff] %v469_v60  ;;  %472 = vst [vmem:[%s4117_s16 + $0x3e8] sm:$0xff] %v471_v61  ;;  %v473_v62 = vld [vmem:[%s4112_s15 + $0x7e0] sm:$0xff]  ;;  %v475_v63 = vld [vmem:[%s4112_s15 + $0x7e8] sm:$0xff] }
  0x56   : > { %474 = vst [vmem:[%s4117_s16 + $0x3f0] sm:$0xff] %v473_v62  ;;  %476 = vst [vmem:[%s4117_s16 + $0x3f8] sm:$0xff] %v475_v63 }
  0x57 PF: > { %p3268_p7 = scmp.ge.s32.totalorder %s4018_s24, 1  ;;  %p499_p8 = scmp.lt.s32.totalorder %s4018_s24, 5 }
  0x59   : > { %p500_p9 = pnand %p3268_p7, %p499_p8 }
  0x5a   : > { %s506_s17 = sand.u32 (!%p500_p9), 1, %s3994_s18   ;;  %s3270_s27 = sshll.u32 (!%p500_p9), %s4002_s20, 6 }
  0x5b   : > { %503 = sbr.rel (%p500_p9) target bundleno = 948 (0x3b4), region = 59  ;;  %s3269_s28 = sshll.u32 (!%p500_p9), %s506_s17, 10 }
  0x5c   : > { %p546_p10 = scmp.lt.s32.totalorder (!%p500_p9), %s3270_s27, 127  ;;  %s3272_s29 = sshll.u32 (!%p500_p9), %s4006_s21, 6 }
  0x5d   : > { %p552_p11 = scmp.lt.s32.totalorder (!%p500_p9), %s3272_s29, 127  ;;  %s4392_s21 = scalar_lea.vmem (!%p500_p9), [#allocation3], %s3269_s28 }
  0x5e   : > { %p3276_p12 = scmp.ne.s32.totalorder (!%p500_p9), %s4002_s20, 0 }
  0x60   : > { %s4937_s27 = smov (!%p546_p10, %s3270_s27), 127  ;;  %s4939_s29 = smov (!%p552_p11, %s3272_s29), 127 }
  0x61   : > { %s3271_s30 = sshll.u32 %s4937_s27, 2  ;;  %s3273_s10 = sshll.u32 %s4939_s29, 3 }
  0x62   : > { %s4380_s9 = scalar_lea.vmem %s4919_s1, %s3271_s30  ;;  %s4385_s13 = scalar_lea.vmem %s4920_s2, %s3273_s10 }
  0x63   : > { %s4390_s15 = scalar_lea.vmem %s4923_s5, %s3273_s10  ;;  %567 = sbr.rel (%p3276_p12) target bundleno = 137 (0x89), region = 67 }
  0x68   : > { %v4020_v0 = vmov 0.0  }
  0x69   : > { %568 = vst [vmem:[#allocation2 + $0xb0] sm:$0xff] %v4020_v0  ;;  %569 = vst [vmem:[#allocation2 + $0x1b0] sm:$0xff] %v4020_v0 }
  0x6a   : > { %570 = vst [vmem:[#allocation2 + $0xd8] sm:$0xff] %v4020_v0  ;;  %571 = vst [vmem:[#allocation2 + $0x18] sm:$0xff] %v4020_v0 }
  0x6b   : > { %572 = vst [vmem:[#allocation2 + $0x50] sm:$0xff] %v4020_v0  ;;  %573 = vst [vmem:[#allocation2 + $0x168] sm:$0xff] %v4020_v0 }
  0x6c   : > { %574 = vst [vmem:[#allocation2 + $0x130] sm:$0xff] %v4020_v0  ;;  %575 = vst [vmem:[#allocation2 + $0x48] sm:$0xff] %v4020_v0 }
  0x6d   : > { %576 = vst [vmem:[#allocation2 + $0x180] sm:$0xff] %v4020_v0  ;;  %577 = vst [vmem:[#allocation2 + $0x110] sm:$0xff] %v4020_v0 }
  0x6e   : > { %578 = vst [vmem:[#allocation2 + $0x118] sm:$0xff] %v4020_v0  ;;  %579 = vst [vmem:[#allocation2 + $0x98] sm:$0xff] %v4020_v0 }
  0x6f   : > { %580 = vst [vmem:[#allocation2 + $0x120] sm:$0xff] %v4020_v0  ;;  %581 = vst [vmem:[#allocation2 + $0x150] sm:$0xff] %v4020_v0 }
  0x70   : > { %582 = vst [vmem:[#allocation2 + $0x108] sm:$0xff] %v4020_v0  ;;  %583 = vst [vmem:[#allocation2 + $0x60] sm:$0xff] %v4020_v0 }
  0x71   : > { %584 = vst [vmem:[#allocation2 + $0xe0] sm:$0xff] %v4020_v0  ;;  %585 = vst [vmem:[#allocation2 + $0x188] sm:$0xff] %v4020_v0 }
  0x72   : > { %586 = vst [vmem:[#allocation2 + $0x138] sm:$0xff] %v4020_v0  ;;  %587 = vst [vmem:[#allocation2 + $0x140] sm:$0xff] %v4020_v0 }
  0x73   : > { %588 = vst [vmem:[#allocation2 + $0x80] sm:$0xff] %v4020_v0  ;;  %589 = vst [vmem:[#allocation2 + $0x1a8] sm:$0xff] %v4020_v0 }
  0x74   : > { %590 = vst [vmem:[#allocation2 + $0x1b8] sm:$0xff] %v4020_v0  ;;  %591 = vst [vmem:[#allocation2 + $0x28] sm:$0xff] %v4020_v0 }
  0x75   : > { %592 = vst [vmem:[#allocation2 + $0x1e8] sm:$0xff] %v4020_v0  ;;  %593 = vst [vmem:[#allocation2 + $0xf8] sm:$0xff] %v4020_v0 }
  0x76   : > { %594 = vst [vmem:[#allocation2 + $0x160] sm:$0xff] %v4020_v0  ;;  %595 = vst [vmem:[#allocation2 + $0x30] sm:$0xff] %v4020_v0 }
  0x77   : > { %596 = vst [vmem:[#allocation2 + $0x1e0] sm:$0xff] %v4020_v0  ;;  %597 = vst [vmem:[#allocation2] sm:$0xff] %v4020_v0 }
  0x78   : > { %598 = vst [vmem:[#allocation2 + $0xf0] sm:$0xff] %v4020_v0  ;;  %599 = vst [vmem:[#allocation2 + $0x8] sm:$0xff] %v4020_v0 }
  0x79   : > { %600 = vst [vmem:[#allocation2 + $0x148] sm:$0xff] %v4020_v0  ;;  %601 = vst [vmem:[#allocation2 + $0x1d0] sm:$0xff] %v4020_v0 }
  0x7a   : > { %602 = vst [vmem:[#allocation2 + $0x100] sm:$0xff] %v4020_v0  ;;  %603 = vst [vmem:[#allocation2 + $0xc8] sm:$0xff] %v4020_v0 }
  0x7b   : > { %604 = vst [vmem:[#allocation2 + $0x40] sm:$0xff] %v4020_v0  ;;  %605 = vst [vmem:[#allocation2 + $0x1f8] sm:$0xff] %v4020_v0 }
  0x7c   : > { %606 = vst [vmem:[#allocation2 + $0x20] sm:$0xff] %v4020_v0  ;;  %607 = vst [vmem:[#allocation2 + $0x128] sm:$0xff] %v4020_v0 }
  0x7d   : > { %608 = vst [vmem:[#allocation2 + $0x1a0] sm:$0xff] %v4020_v0  ;;  %609 = vst [vmem:[#allocation2 + $0x1f0] sm:$0xff] %v4020_v0 }
  0x7e   : > { %610 = vst [vmem:[#allocation2 + $0xe8] sm:$0xff] %v4020_v0  ;;  %611 = vst [vmem:[#allocation2 + $0x78] sm:$0xff] %v4020_v0 }
  0x7f   : > { %612 = vst [vmem:[#allocation2 + $0x70] sm:$0xff] %v4020_v0  ;;  %613 = vst [vmem:[#allocation2 + $0x90] sm:$0xff] %v4020_v0 }
  0x80   : > { %614 = vst [vmem:[#allocation2 + $0x1d8] sm:$0xff] %v4020_v0  ;;  %615 = vst [vmem:[#allocation2 + $0xd0] sm:$0xff] %v4020_v0 }
  0x81   : > { %616 = vst [vmem:[#allocation2 + $0xb8] sm:$0xff] %v4020_v0  ;;  %617 = vst [vmem:[#allocation2 + $0x88] sm:$0xff] %v4020_v0 }
  0x82   : > { %618 = vst [vmem:[#allocation2 + $0xa8] sm:$0xff] %v4020_v0  ;;  %619 = vst [vmem:[#allocation2 + $0x1c8] sm:$0xff] %v4020_v0 }
  0x83   : > { %620 = vst [vmem:[#allocation2 + $0x170] sm:$0xff] %v4020_v0  ;;  %621 = vst [vmem:[#allocation2 + $0x178] sm:$0xff] %v4020_v0 }
  0x84   : > { %622 = vst [vmem:[#allocation2 + $0x68] sm:$0xff] %v4020_v0  ;;  %623 = vst [vmem:[#allocation2 + $0x190] sm:$0xff] %v4020_v0 }
  0x85   : > { %624 = vst [vmem:[#allocation2 + $0x198] sm:$0xff] %v4020_v0  ;;  %625 = vst [vmem:[#allocation2 + $0x38] sm:$0xff] %v4020_v0 }
  0x86   : > { %626 = vst [vmem:[#allocation2 + $0xc0] sm:$0xff] %v4020_v0  ;;  %627 = vst [vmem:[#allocation2 + $0x1c0] sm:$0xff] %v4020_v0 }
  0x87   : > { %628 = vst [vmem:[#allocation2 + $0x158] sm:$0xff] %v4020_v0  ;;  %629 = vst [vmem:[#allocation2 + $0x10] sm:$0xff] %v4020_v0 }
  0x88   : > { %630 = vst [vmem:[#allocation2 + $0x58] sm:$0xff] %v4020_v0  ;;  %631 = vst [vmem:[#allocation2 + $0xa0] sm:$0xff] %v4020_v0 }
  0x89 PF: > { %v3740_v1 = vld [vmem:[%s4380_s9 + $0x38] sm:$0xff]   ;;  %v4021_v2 = vmov 0   ;;  %v3742_v4 = vld [vmem:[%s4380_s9 + $0x30] sm:$0xff]   ;;  %v3744_v6 = vld [vmem:[%s4380_s9 + $0x28] sm:$0xff]   ;;  %p3437_p13 = scmp.ne.s32.totalorder %s4002_s20, 1 }
  0x8a   : > { %1720 = vmatprep.subr.bf16.mxu0 %v4021_v2  ;;  %2009 = vmatprep.subr.bf16.mxu1 %v4021_v2  ;;  %v3741_v3 = vld [vmem:[%s4380_s9 + $0xb8] sm:$0xff]   ;;  %v3743_v5 = vld [vmem:[%s4380_s9 + $0xb0] sm:$0xff]   ;;  %v3745_v7 = vld [vmem:[%s4380_s9 + $0xa8] sm:$0xff]  }
  0x8b   : > { %1721 = vmatpush1.bf16.msra.mxu0 %v3740_v1  ;;  %2010 = vmatpush1.bf16.msra.mxu1 %v3741_v3  ;;  %v3746_v8 = vld [vmem:[%s4380_s9 + $0x20] sm:$0xff]   ;;  %v3748_v10 = vld [vmem:[%s4380_s9 + $0x18] sm:$0xff]   ;;  %v3750_v12 = vld [vmem:[%s4380_s9 + $0x10] sm:$0xff]  }
  0x8c   : > { %1722 = vmatprep.subr.bf16.mxu0 %v4021_v2  ;;  %2011 = vmatprep.subr.bf16.mxu1 %v4021_v2  ;;  %v3747_v9 = vld [vmem:[%s4380_s9 + $0xa0] sm:$0xff]   ;;  %v3749_v11 = vld [vmem:[%s4380_s9 + $0x98] sm:$0xff]   ;;  %v3751_v13 = vld [vmem:[%s4380_s9 + $0x90] sm:$0xff]  }
  0x8d   : > { %v3752_v14 = vld [vmem:[%s4380_s9 + $0x8] sm:$0xff]   ;;  %v3754_v16 = vld [vmem:[%s4380_s9] sm:$0xff]   ;;  %v3756_v18 = vld [vmem:[%s4380_s9 + $0x78] sm:$0xff]  }
  0x8e   : > { %v3753_v15 = vld [vmem:[%s4380_s9 + $0x88] sm:$0xff]   ;;  %v3755_v17 = vld [vmem:[%s4380_s9 + $0x80] sm:$0xff]   ;;  %v3757_v19 = vld [vmem:[%s4380_s9 + $0xf8] sm:$0xff]  }
  0x8f   : > { %1723 = vmatpush1.bf16.msra.mxu0 %v3742_v4  ;;  %2012 = vmatpush1.bf16.msra.mxu1 %v3743_v5  ;;  %v3774_v20 = vld [vmem:[%s4392_s21 + $0x4] ss:$16 sps:$4 sm:$0xff]   ;;  %v3777_v22 = vld [vmem:[%s4392_s21 + $0xc] ss:$16 sps:$4 sm:$0xff]   ;;  %v3772_v36 = vld [vmem:[%s4392_s21] ss:$16 sps:$4 sm:$0xff]  }
  0x90   : > { %1724 = vmatprep.subr.bf16.mxu0 %v4021_v2  ;;  %2013 = vmatprep.subr.bf16.mxu1 %v4021_v2  ;;  %v3758_v21 = vld [vmem:[%s4380_s9 + $0x70] sm:$0xff]   ;;  %v3760_v24 = vld [vmem:[%s4380_s9 + $0x68] sm:$0xff]   ;;  %v3762_v26 = vld [vmem:[%s4380_s9 + $0x60] sm:$0xff]  }
  0x91   : > { %v3759_v23 = vld [vmem:[%s4380_s9 + $0xf0] sm:$0xff]   ;;  %1752 = vmatprep.mubr.bf16.mxu0 %v3774_v20  ;;  %2041 = vmatprep.mubr.bf16.mxu1 %v3777_v22  ;;  %v3761_v25 = vld [vmem:[%s4380_s9 + $0xe8] sm:$0xff]   ;;  %v3763_v27 = vld [vmem:[%s4380_s9 + $0xe0] sm:$0xff]  }
  0x92   : > { %v3764_v28 = vld [vmem:[%s4380_s9 + $0x58] sm:$0xff]   ;;  %v3766_v30 = vld [vmem:[%s4380_s9 + $0x50] sm:$0xff]   ;;  %v3768_v32 = vld [vmem:[%s4380_s9 + $0x48] sm:$0xff]  }
  0x93   : > { %1725 = vmatpush1.bf16.msra.mxu0 %v3744_v6  ;;  %2014 = vmatpush1.bf16.msra.mxu1 %v3745_v7  ;;  %v3765_v29 = vld [vmem:[%s4380_s9 + $0xd8] sm:$0xff]   ;;  %v3767_v31 = vld [vmem:[%s4380_s9 + $0xd0] sm:$0xff]   ;;  %v3769_v33 = vld [vmem:[%s4380_s9 + $0xc8] sm:$0xff]  }
  0x94   : > { %1726 = vmatprep.subr.bf16.mxu0 %v4021_v2  ;;  %2015 = vmatprep.subr.bf16.mxu1 %v4021_v2  ;;  %v3770_v34 = vld [vmem:[%s4380_s9 + $0x40] sm:$0xff]   ;;  %v3775_v37 = vld [vmem:[%s4392_s21 + $0x8] ss:$16 sps:$4 sm:$0xff]   ;;  %v3780_v39 = vld [vmem:[%s4392_s21 + $0x2c] ss:$16 sps:$4 sm:$0xff]  }
  0x95   : > { %v3771_v35 = vld [vmem:[%s4380_s9 + $0xc0] sm:$0xff]   ;;  %v3783_v41 = vld [vmem:[%s4392_s21 + $0x28] ss:$16 sps:$4 sm:$0xff]   ;;  %v3786_v43 = vld [vmem:[%s4392_s21 + $0x4c] ss:$16 sps:$4 sm:$0xff]  }
  0x96   : > { %v3778_v38 = vld [vmem:[%s4392_s21 + $0x24] ss:$16 sps:$4 sm:$0xff]   ;;  %v3782_v40 = vld [vmem:[%s4392_s21 + $0x20] ss:$16 sps:$4 sm:$0xff]   ;;  %v3789_v45 = vld [vmem:[%s4392_s21 + $0x48] ss:$16 sps:$4 sm:$0xff]  }
  0x97   : > { %1727 = vmatpush1.bf16.msra.mxu0 %v3746_v8  ;;  %2016 = vmatpush1.bf16.msra.mxu1 %v3747_v9  ;;  %v3784_v42 = vld [vmem:[%s4392_s21 + $0x44] ss:$16 sps:$4 sm:$0xff]   ;;  %v3788_v44 = vld [vmem:[%s4392_s21 + $0x40] ss:$16 sps:$4 sm:$0xff]   ;;  %v3792_v47 = vld [vmem:[%s4392_s21 + $0x6c] ss:$16 sps:$4 sm:$0xff]  }
  0x98   : > { %1728 = vmatprep.subr.bf16.mxu0 %v4021_v2  ;;  %2017 = vmatprep.subr.bf16.mxu1 %v4021_v2  ;;  %v3790_v46 = vld [vmem:[%s4392_s21 + $0x64] ss:$16 sps:$4 sm:$0xff]   ;;  %v3794_v48 = vld [vmem:[%s4392_s21 + $0x60] ss:$16 sps:$4 sm:$0xff]   ;;  %v3795_v49 = vld [vmem:[%s4392_s21 + $0x68] ss:$16 sps:$4 sm:$0xff]  }
  0x99   : > { %v3796_v50 = vld [vmem:[%s4392_s21 + $0x84] ss:$16 sps:$4 sm:$0xff]   ;;  %v3798_v51 = vld [vmem:[%s4392_s21 + $0x8c] ss:$16 sps:$4 sm:$0xff]   ;;  %v3800_v52 = vld [vmem:[%s4392_s21 + $0x80] ss:$16 sps:$4 sm:$0xff]  }
  0x9a   : > { %v3801_v53 = vld [vmem:[%s4392_s21 + $0x88] ss:$16 sps:$4 sm:$0xff]   ;;  %v3802_v54 = vld [vmem:[%s4392_s21 + $0xa4] ss:$16 sps:$4 sm:$0xff]   ;;  %v3804_v55 = vld [vmem:[%s4392_s21 + $0xac] ss:$16 sps:$4 sm:$0xff]  }
  0x9b   : > { %1729 = vmatpush1.bf16.msra.mxu0 %v3748_v10  ;;  %2018 = vmatpush1.bf16.msra.mxu1 %v3749_v11  ;;  %v3806_v56 = vld [vmem:[%s4392_s21 + $0xa0] ss:$16 sps:$4 sm:$0xff]   ;;  %v3807_v57 = vld [vmem:[%s4392_s21 + $0xa8] ss:$16 sps:$4 sm:$0xff]   ;;  %v3808_v58 = vld [vmem:[%s4392_s21 + $0xc4] ss:$16 sps:$4 sm:$0xff]  }
  0x9c   : > { %1730 = vmatprep.subr.bf16.mxu0 %v4021_v2  ;;  %2019 = vmatprep.subr.bf16.mxu1 %v4021_v2  ;;  %v3810_v59 = vld [vmem:[%s4392_s21 + $0xcc] ss:$16 sps:$4 sm:$0xff]   ;;  %v3812_v60 = vld [vmem:[%s4392_s21 + $0xc0] ss:$16 sps:$4 sm:$0xff]   ;;  %v3813_v61 = vld [vmem:[%s4392_s21 + $0xc8] ss:$16 sps:$4 sm:$0xff]  }
  0x9d   : > { %v3814_v62 = vld [vmem:[%s4392_s21 + $0xe4] ss:$16 sps:$4 sm:$0xff]   ;;  %v3816_v63 = vld [vmem:[%s4392_s21 + $0xec] ss:$16 sps:$4 sm:$0xff]   ;;  %v3818_v0 = vld [vmem:[%s4392_s21 + $0xe0] ss:$16 sps:$4 sm:$0xff]  }
  0x9e   : > { %v3819_v1 = vld [vmem:[%s4392_s21 + $0xe8] ss:$16 sps:$4 sm:$0xff]   ;;  %v3822_v3 = vld [vmem:[%s4392_s21 + $0x10c] ss:$16 sps:$4 sm:$0xff]   ;;  %v3824_v4 = vld [vmem:[%s4392_s21 + $0x100] ss:$16 sps:$4 sm:$0xff]  }
  0x9f   : > { %1731 = vmatpush1.bf16.msra.mxu0 %v3750_v12  ;;  %2020 = vmatpush1.bf16.msra.mxu1 %v3751_v13  ;;  %v3825_v5 = vld [vmem:[%s4392_s21 + $0x108] ss:$16 sps:$4 sm:$0xff]   ;;  %v3826_v6 = vld [vmem:[%s4392_s21 + $0x124] ss:$16 sps:$4 sm:$0xff]   ;;  %v3828_v7 = vld [vmem:[%s4392_s21 + $0x12c] ss:$16 sps:$4 sm:$0xff]  }
  0xa0   : > { %1732 = vmatprep.subr.bf16.mxu0 %v4021_v2  ;;  %2021 = vmatprep.subr.bf16.mxu1 %v4021_v2  ;;  %v3830_v8 = vld [vmem:[%s4392_s21 + $0x120] ss:$16 sps:$4 sm:$0xff]   ;;  %v3831_v9 = vld [vmem:[%s4392_s21 + $0x128] ss:$16 sps:$4 sm:$0xff]   ;;  %v3832_v10 = vld [vmem:[%s4392_s21 + $0x144] ss:$16 sps:$4 sm:$0xff]  }
  0xa1   : > { %v3834_v11 = vld [vmem:[%s4392_s21 + $0x14c] ss:$16 sps:$4 sm:$0xff]   ;;  %v3836_v12 = vld [vmem:[%s4392_s21 + $0x140] ss:$16 sps:$4 sm:$0xff]   ;;  %v3837_v13 = vld [vmem:[%s4392_s21 + $0x148] ss:$16 sps:$4 sm:$0xff]  }
  0xa2   : > { %v3848_v20 = vld [vmem:[%s4392_s21 + $0x180] ss:$16 sps:$4 sm:$0xff]   ;;  %v3850_v22 = vld [vmem:[%s4392_s21 + $0x1a4] ss:$16 sps:$4 sm:$0xff]  }
  0xa3   : > { %1733 = vmatpush1.bf16.msra.mxu0 %v3752_v14  ;;  %2022 = vmatpush1.bf16.msra.mxu1 %v3753_v15  ;;  %v3838_v14 = vld [vmem:[%s4392_s21 + $0x164] ss:$16 sps:$4 sm:$0xff]   ;;  %v3840_v15 = vld [vmem:[%s4392_s21 + $0x16c] ss:$16 sps:$4 sm:$0xff]  }
  0xa4   : > { %1734 = vmatprep.subr.bf16.mxu0 %v4021_v2  ;;  %2023 = vmatprep.subr.bf16.mxu1 %v4021_v2 }
  0xa7   : > { %1735 = vmatpush1.bf16.msra.mxu0 %v3754_v16  ;;  %2024 = vmatpush1.bf16.msra.mxu1 %v3755_v17  ;;  %v3842_v16 = vld [vmem:[%s4392_s21 + $0x160] ss:$16 sps:$4 sm:$0xff]   ;;  %v3843_v17 = vld [vmem:[%s4392_s21 + $0x168] ss:$16 sps:$4 sm:$0xff]  }
  0xa8   : > { %1736 = vmatprep.subr.bf16.mxu0 %v4021_v2  ;;  %2025 = vmatprep.subr.bf16.mxu1 %v4021_v2 }
  0xab   : > { %1737 = vmatpush2.bf16.msra.mxu0 %v3756_v18  ;;  %2026 = vmatpush2.bf16.msra.mxu1 %v3757_v19  ;;  %v3844_v18 = vld [vmem:[%s4392_s21 + $0x184] ss:$16 sps:$4 sm:$0xff]   ;;  %v3846_v19 = vld [vmem:[%s4392_s21 + $0x18c] ss:$16 sps:$4 sm:$0xff]  }
  0xac   : > { %1738 = vmatprep.subr.bf16.mxu0 %v4021_v2  ;;  %2027 = vmatprep.subr.bf16.mxu1 %v4021_v2 }
  0xaf   : > { %1739 = vmatpush2.bf16.msra.mxu0 %v3758_v21  ;;  %2028 = vmatpush2.bf16.msra.mxu1 %v3759_v23  ;;  %v3849_v21 = vld [vmem:[%s4392_s21 + $0x188] ss:$16 sps:$4 sm:$0xff]   ;;  %v3852_v23 = vld [vmem:[%s4392_s21 + $0x1ac] ss:$16 sps:$4 sm:$0xff]  }
  0xb0   : > { %1740 = vmatprep.subr.bf16.mxu0 %v4021_v2  ;;  %2029 = vmatprep.subr.bf16.mxu1 %v4021_v2 }
  0xb3   : > { %1741 = vmatpush2.bf16.msra.mxu0 %v3760_v24  ;;  %2030 = vmatpush2.bf16.msra.mxu1 %v3761_v25  ;;  %v3854_v24 = vld [vmem:[%s4392_s21 + $0x1a0] ss:$16 sps:$4 sm:$0xff]   ;;  %v3855_v25 = vld [vmem:[%s4392_s21 + $0x1a8] ss:$16 sps:$4 sm:$0xff]  }
  0xb4   : > { %1742 = vmatprep.subr.bf16.mxu0 %v4021_v2  ;;  %2031 = vmatprep.subr.bf16.mxu1 %v4021_v2 }
  0xb7   : > { %1743 = vmatpush2.bf16.msra.mxu0 %v3762_v26  ;;  %2032 = vmatpush2.bf16.msra.mxu1 %v3763_v27  ;;  %v3856_v26 = vld [vmem:[%s4392_s21 + $0x1c4] ss:$16 sps:$4 sm:$0xff]   ;;  %v3858_v27 = vld [vmem:[%s4392_s21 + $0x1cc] ss:$16 sps:$4 sm:$0xff]  }
  0xb8   : > { %1744 = vmatprep.subr.bf16.mxu0 %v4021_v2  ;;  %2033 = vmatprep.subr.bf16.mxu1 %v4021_v2 }
  0xbb   : > { %1745 = vmatpush2.bf16.msra.mxu0 %v3764_v28  ;;  %2034 = vmatpush2.bf16.msra.mxu1 %v3765_v29  ;;  %v3860_v28 = vld [vmem:[%s4392_s21 + $0x1c0] ss:$16 sps:$4 sm:$0xff]   ;;  %v3861_v29 = vld [vmem:[%s4392_s21 + $0x1c8] ss:$16 sps:$4 sm:$0xff]  }
  0xbc   : > { %1746 = vmatprep.subr.bf16.mxu0 %v4021_v2  ;;  %2035 = vmatprep.subr.bf16.mxu1 %v4021_v2 }
  0xbf   : > { %1747 = vmatpush2.bf16.msra.mxu0 %v3766_v30  ;;  %2036 = vmatpush2.bf16.msra.mxu1 %v3767_v31  ;;  %v3862_v30 = vld [vmem:[%s4392_s21 + $0x1e4] ss:$16 sps:$4 sm:$0xff]   ;;  %v3864_v31 = vld [vmem:[%s4392_s21 + $0x1ec] ss:$16 sps:$4 sm:$0xff]  }
  0xc0   : > { %1748 = vmatprep.subr.bf16.mxu0 %v4021_v2  ;;  %2037 = vmatprep.subr.bf16.mxu1 %v4021_v2 }
  0xc3   : > { %1749 = vmatpush2.bf16.msra.mxu0 %v3768_v32  ;;  %2038 = vmatpush2.bf16.msra.mxu1 %v3769_v33  ;;  %v3866_v32 = vld [vmem:[%s4392_s21 + $0x1e0] ss:$16 sps:$4 sm:$0xff]   ;;  %v3867_v33 = vld [vmem:[%s4392_s21 + $0x1e8] ss:$16 sps:$4 sm:$0xff]  }
  0xc4   : > { %1750 = vmatprep.subr.bf16.mxu0 %v4021_v2  ;;  %2039 = vmatprep.subr.bf16.mxu1 %v4021_v2  ;;  %v3820_v2 = vld [vmem:[%s4392_s21 + $0x104] ss:$16 sps:$4 sm:$0xff]  }
  0xc7   : > { %1751 = vmatpush2.bf16.msra.mxu0 %v3770_v34  ;;  %2040 = vmatpush2.bf16.msra.mxu1 %v3771_v35  ;;  %v3868_v34 = vld [vmem:[%s4392_s21 + $0x204] ss:$16 sps:$4 sm:$0xff]   ;;  %v3870_v35 = vld [vmem:[%s4392_s21 + $0x20c] ss:$16 sps:$4 sm:$0xff]  }
  0xca   : > { %1753 = vmatmul.mubr.bf16.vlgmr.msra.gmra.mxu0 %v3772_v36  ;;  %2042 = vmatmul.mubr.bf16.vlgmr.msra.gmra.mxu1 %v3775_v37  ;;  %v3872_v36 = vld [vmem:[%s4392_s21 + $0x200] ss:$16 sps:$4 sm:$0xff]   ;;  %v3873_v37 = vld [vmem:[%s4392_s21 + $0x208] ss:$16 sps:$4 sm:$0xff]  }
  0xcb   : > { %1760 = vmatprep.mubr.bf16.mxu0 %v3778_v38  ;;  %2049 = vmatprep.mubr.bf16.mxu1 %v3780_v39  ;;  %v3874_v38 = vld [vmem:[%s4392_s21 + $0x224] ss:$16 sps:$4 sm:$0xff]   ;;  %v3876_v39 = vld [vmem:[%s4392_s21 + $0x22c] ss:$16 sps:$4 sm:$0xff]  }
  0xd2   : > { %1761 = vmatmul.mubr.bf16.gmra.mxu0 %v3782_v40  ;;  %2050 = vmatmul.mubr.bf16.gmra.mxu1 %v3783_v41  ;;  %v3878_v40 = vld [vmem:[%s4392_s21 + $0x220] ss:$16 sps:$4 sm:$0xff]   ;;  %v3879_v41 = vld [vmem:[%s4392_s21 + $0x228] ss:$16 sps:$4 sm:$0xff]  }
  0xd3   : > { %1768 = vmatprep.mubr.bf16.mxu0 %v3784_v42  ;;  %2057 = vmatprep.mubr.bf16.mxu1 %v3786_v43  ;;  %v3880_v42 = vld [vmem:[%s4392_s21 + $0x244] ss:$16 sps:$4 sm:$0xff]   ;;  %v3882_v43 = vld [vmem:[%s4392_s21 + $0x24c] ss:$16 sps:$4 sm:$0xff]  }
  0xda   : > { %1769 = vmatmul.mubr.bf16.gmra.mxu0 %v3788_v44  ;;  %2058 = vmatmul.mubr.bf16.gmra.mxu1 %v3789_v45  ;;  %v3884_v44 = vld [vmem:[%s4392_s21 + $0x240] ss:$16 sps:$4 sm:$0xff]   ;;  %v3885_v45 = vld [vmem:[%s4392_s21 + $0x248] ss:$16 sps:$4 sm:$0xff]  }
  0xdb   : > { %1776 = vmatprep.mubr.bf16.mxu0 %v3790_v46  ;;  %2065 = vmatprep.mubr.bf16.mxu1 %v3792_v47  ;;  %v3886_v46 = vld [vmem:[%s4392_s21 + $0x264] ss:$16 sps:$4 sm:$0xff]   ;;  %v3888_v47 = vld [vmem:[%s4392_s21 + $0x26c] ss:$16 sps:$4 sm:$0xff]  }
  0xe2   : > { %1777 = vmatmul.mubr.bf16.gmra.mxu0 %v3794_v48  ;;  %2066 = vmatmul.mubr.bf16.gmra.mxu1 %v3795_v49  ;;  %v3890_v48 = vld [vmem:[%s4392_s21 + $0x260] ss:$16 sps:$4 sm:$0xff]   ;;  %v3891_v49 = vld [vmem:[%s4392_s21 + $0x268] ss:$16 sps:$4 sm:$0xff]  }
  0xe3   : > { %1784 = vmatprep.mubr.bf16.mxu0 %v3796_v50  ;;  %2073 = vmatprep.mubr.bf16.mxu1 %v3798_v51  ;;  %v3892_v50 = vld [vmem:[%s4392_s21 + $0x284] ss:$16 sps:$4 sm:$0xff]   ;;  %v3894_v51 = vld [vmem:[%s4392_s21 + $0x28c] ss:$16 sps:$4 sm:$0xff]  }
  0xea   : > { %1785 = vmatmul.mubr.bf16.gmra.mxu0 %v3800_v52  ;;  %2074 = vmatmul.mubr.bf16.gmra.mxu1 %v3801_v53  ;;  %v3896_v52 = vld [vmem:[%s4392_s21 + $0x280] ss:$16 sps:$4 sm:$0xff]   ;;  %v3897_v53 = vld [vmem:[%s4392_s21 + $0x288] ss:$16 sps:$4 sm:$0xff]  }
  0xeb   : > { %1792 = vmatprep.mubr.bf16.mxu0 %v3802_v54  ;;  %2081 = vmatprep.mubr.bf16.mxu1 %v3804_v55  ;;  %v3898_v54 = vld [vmem:[%s4392_s21 + $0x2a4] ss:$16 sps:$4 sm:$0xff]   ;;  %v3900_v55 = vld [vmem:[%s4392_s21 + $0x2ac] ss:$16 sps:$4 sm:$0xff]  }
  0xf2   : > { %1793 = vmatmul.mubr.bf16.gmra.mxu0 %v3806_v56  ;;  %2082 = vmatmul.mubr.bf16.gmra.mxu1 %v3807_v57  ;;  %v3902_v56 = vld [vmem:[%s4392_s21 + $0x2a0] ss:$16 sps:$4 sm:$0xff]   ;;  %v3903_v57 = vld [vmem:[%s4392_s21 + $0x2a8] ss:$16 sps:$4 sm:$0xff]  }
  0xf3   : > { %1800 = vmatprep.mubr.bf16.mxu0 %v3808_v58  ;;  %2089 = vmatprep.mubr.bf16.mxu1 %v3810_v59  ;;  %v3904_v58 = vld [vmem:[%s4392_s21 + $0x2c4] ss:$16 sps:$4 sm:$0xff]   ;;  %v3906_v59 = vld [vmem:[%s4392_s21 + $0x2cc] ss:$16 sps:$4 sm:$0xff]  }
  0xfa   : > { %1801 = vmatmul.mubr.bf16.gmra.mxu0 %v3812_v60  ;;  %2090 = vmatmul.mubr.bf16.gmra.mxu1 %v3813_v61  ;;  %v3908_v60 = vld [vmem:[%s4392_s21 + $0x2c0] ss:$16 sps:$4 sm:$0xff]   ;;  %v3909_v61 = vld [vmem:[%s4392_s21 + $0x2c8] ss:$16 sps:$4 sm:$0xff]  }
  0xfb   : > { %1808 = vmatprep.mubr.bf16.mxu0 %v3814_v62  ;;  %2097 = vmatprep.mubr.bf16.mxu1 %v3816_v63  ;;  %v3910_v62 = vld [vmem:[%s4392_s21 + $0x2e4] ss:$16 sps:$4 sm:$0xff]   ;;  %v3912_v63 = vld [vmem:[%s4392_s21 + $0x2ec] ss:$16 sps:$4 sm:$0xff]  }
 0x102   : > { %1809 = vmatmul.mubr.bf16.gmra.mxu0 %v3818_v0  ;;  %2098 = vmatmul.mubr.bf16.gmra.mxu1 %v3819_v1  ;;  %v3914_v0 = vld [vmem:[%s4392_s21 + $0x2e0] ss:$16 sps:$4 sm:$0xff]   ;;  %v3915_v1 = vld [vmem:[%s4392_s21 + $0x2e8] ss:$16 sps:$4 sm:$0xff]  }
 0x103   : > { %1816 = vmatprep.mubr.bf16.mxu0 %v3820_v2  ;;  %2105 = vmatprep.mubr.bf16.mxu1 %v3822_v3  ;;  %v3916_v2 = vld [vmem:[%s4392_s21 + $0x304] ss:$16 sps:$4 sm:$0xff]   ;;  %v3918_v3 = vld [vmem:[%s4392_s21 + $0x30c] ss:$16 sps:$4 sm:$0xff]  }
 0x10a   : > { %1817 = vmatmul.mubr.bf16.gmra.mxu0 %v3824_v4  ;;  %2106 = vmatmul.mubr.bf16.gmra.mxu1 %v3825_v5  ;;  %v3920_v4 = vld [vmem:[%s4392_s21 + $0x300] ss:$16 sps:$4 sm:$0xff]   ;;  %v3921_v5 = vld [vmem:[%s4392_s21 + $0x308] ss:$16 sps:$4 sm:$0xff]  }
 0x10b   : > { %1824 = vmatprep.mubr.bf16.mxu0 %v3826_v6  ;;  %2113 = vmatprep.mubr.bf16.mxu1 %v3828_v7  ;;  %v3922_v6 = vld [vmem:[%s4392_s21 + $0x324] ss:$16 sps:$4 sm:$0xff]   ;;  %v3924_v7 = vld [vmem:[%s4392_s21 + $0x32c] ss:$16 sps:$4 sm:$0xff]  }
 0x112   : > { %1825 = vmatmul.mubr.bf16.gmra.mxu0 %v3830_v8  ;;  %2114 = vmatmul.mubr.bf16.gmra.mxu1 %v3831_v9  ;;  %v632_v9 = vld [vmem:[#allocation2 + $0xb0] sm:$0xff] }
 0x113   : > { %1832 = vmatprep.mubr.bf16.mxu0 %v3832_v10  ;;  %2121 = vmatprep.mubr.bf16.mxu1 %v3834_v11 }
 0x11a   : > { %1833 = vmatmul.mubr.bf16.gmra.mxu0 %v3836_v12  ;;  %2122 = vmatmul.mubr.bf16.gmra.mxu1 %v3837_v13 }
 0x11b   : > { %1840 = vmatprep.mubr.bf16.mxu0 %v3838_v14  ;;  %2129 = vmatprep.mubr.bf16.mxu1 %v3840_v15 }
 0x122   : > { %1841 = vmatmul.mubr.bf16.gmra.mxu0 %v3842_v16  ;;  %2130 = vmatmul.mubr.bf16.gmra.mxu1 %v3843_v17  ;;  %v3926_v16 = vld [vmem:[%s4392_s21 + $0x320] ss:$16 sps:$4 sm:$0xff]  }
 0x123   : > { %1848 = vmatprep.mubr.bf16.mxu0 %v3844_v18  ;;  %2137 = vmatprep.mubr.bf16.mxu1 %v3846_v19  ;;  %v633_v17 = vld [vmem:[#allocation2 + $0x1b0] sm:$0xff]  ;;  %v3927_v19 = vld [vmem:[%s4392_s21 + $0x328] ss:$16 sps:$4 sm:$0xff]  }
 0x12a   : > { %1849 = vmatmul.mubr.bf16.gmra.mxu0 %v3848_v20  ;;  %2138 = vmatmul.mubr.bf16.gmra.mxu1 %v3849_v21  ;;  %v3928_v20 = vld [vmem:[%s4392_s21 + $0x344] ss:$16 sps:$4 sm:$0xff]  }
 0x12b   : > { %1856 = vmatprep.mubr.bf16.mxu0 %v3850_v22  ;;  %2145 = vmatprep.mubr.bf16.mxu1 %v3852_v23  ;;  %v3930_v23 = vld [vmem:[%s4392_s21 + $0x34c] ss:$16 sps:$4 sm:$0xff]  }
 0x132   : > { %1857 = vmatmul.mubr.bf16.gmra.mxu0 %v3854_v24  ;;  %2146 = vmatmul.mubr.bf16.gmra.mxu1 %v3855_v25 }
 0x133   : > { %1864 = vmatprep.mubr.bf16.mxu0 %v3856_v26  ;;  %2153 = vmatprep.mubr.bf16.mxu1 %v3858_v27  ;;  %v634_v27 = vld [vmem:[#allocation2 + $0xd8] sm:$0xff] }
 0x13a   : > { %1865 = vmatmul.mubr.bf16.gmra.mxu0 %v3860_v28  ;;  %2154 = vmatmul.mubr.bf16.gmra.mxu1 %v3861_v29 }
 0x13b   : > { %1872 = vmatprep.mubr.bf16.mxu0 %v3862_v30  ;;  %2161 = vmatprep.mubr.bf16.mxu1 %v3864_v31 }
 0x142   : > { %1873 = vmatmul.mubr.bf16.gmra.mxu0 %v3866_v32  ;;  %2162 = vmatmul.mubr.bf16.gmra.mxu1 %v3867_v33 }
 0x143   : > { %1880 = vmatprep.mubr.bf16.mxu0 %v3868_v34  ;;  %2169 = vmatprep.mubr.bf16.mxu1 %v3870_v35  ;;  %v3932_v34 = vld [vmem:[%s4392_s21 + $0x340] ss:$16 sps:$4 sm:$0xff]   ;;  %v635_v35 = vld [vmem:[#allocation2 + $0x18] sm:$0xff] }
 0x14a   : > { %1881 = vmatmul.mubr.bf16.gmra.mxu0 %v3872_v36  ;;  %2170 = vmatmul.mubr.bf16.gmra.mxu1 %v3873_v37  ;;  %v3933_v37 = vld [vmem:[%s4392_s21 + $0x348] ss:$16 sps:$4 sm:$0xff]  }
 0x14b   : > { %1888 = vmatprep.mubr.bf16.mxu0 %v3874_v38  ;;  %2177 = vmatprep.mubr.bf16.mxu1 %v3876_v39  ;;  %v3934_v38 = vld [vmem:[%s4392_s21 + $0x364] ss:$16 sps:$4 sm:$0xff]  }
 0x152   : > { %1889 = vmatmul.mubr.bf16.gmra.mxu0 %v3878_v40  ;;  %2178 = vmatmul.mubr.bf16.gmra.mxu1 %v3879_v41  ;;  %v3936_v41 = vld [vmem:[%s4392_s21 + $0x36c] ss:$16 sps:$4 sm:$0xff]  }
 0x153   : > { %1896 = vmatprep.mubr.bf16.mxu0 %v3880_v42  ;;  %2185 = vmatprep.mubr.bf16.mxu1 %v3882_v43 }
 0x15a   : > { %1897 = vmatmul.mubr.bf16.gmra.mxu0 %v3884_v44  ;;  %2186 = vmatmul.mubr.bf16.gmra.mxu1 %v3885_v45  ;;  %v636_v45 = vld [vmem:[#allocation2 + $0x50] sm:$0xff] }
 0x15b   : > { %1904 = vmatprep.mubr.bf16.mxu0 %v3886_v46  ;;  %2193 = vmatprep.mubr.bf16.mxu1 %v3888_v47 }
 0x162   : > { %1905 = vmatmul.mubr.bf16.gmra.mxu0 %v3890_v48  ;;  %2194 = vmatmul.mubr.bf16.gmra.mxu1 %v3891_v49 }
 0x163   : > { %1912 = vmatprep.mubr.bf16.mxu0 %v3892_v50  ;;  %2201 = vmatprep.mubr.bf16.mxu1 %v3894_v51 }
 0x16a   : > { %1913 = vmatmul.mubr.bf16.gmra.mxu0 %v3896_v52  ;;  %2202 = vmatmul.mubr.bf16.gmra.mxu1 %v3897_v53  ;;  %v3938_v52 = vld [vmem:[%s4392_s21 + $0x360] ss:$16 sps:$4 sm:$0xff]   ;;  %v637_v53 = vld [vmem:[#allocation2 + $0x168] sm:$0xff] }
 0x16b   : > { %1920 = vmatprep.mubr.bf16.mxu0 %v3898_v54  ;;  %2209 = vmatprep.mubr.bf16.mxu1 %v3900_v55  ;;  %v3939_v55 = vld [vmem:[%s4392_s21 + $0x368] ss:$16 sps:$4 sm:$0xff]  }
 0x172   : > { %1921 = vmatmul.mubr.bf16.gmra.mxu0 %v3902_v56  ;;  %2210 = vmatmul.mubr.bf16.gmra.mxu1 %v3903_v57  ;;  %v3942_v56 = vld [vmem:[%s4392_s21 + $0x384] ss:$16 sps:$4 sm:$0xff]  }
 0x173   : > { %1928 = vmatprep.mubr.bf16.mxu0 %v3904_v58  ;;  %2217 = vmatprep.mubr.bf16.mxu1 %v3906_v59  ;;  %v3945_v59 = vld [vmem:[%s4392_s21 + $0x38c] ss:$16 sps:$4 sm:$0xff]  }
 0x17a   : > { %1929 = vmatmul.mubr.bf16.gmra.mxu0 %v3908_v60  ;;  %2218 = vmatmul.mubr.bf16.gmra.mxu1 %v3909_v61 }
 0x17b   : > { %1936 = vmatprep.mubr.bf16.mxu0 %v3910_v62  ;;  %2225 = vmatprep.mubr.bf16.mxu1 %v3912_v63  ;;  %v638_v63 = vld [vmem:[#allocation2 + $0x130] sm:$0xff] }
 0x182   : > { %1937 = vmatmul.mubr.bf16.gmra.mxu0 %v3914_v0  ;;  %2226 = vmatmul.mubr.bf16.gmra.mxu1 %v3915_v1 }
 0x183   : > { %1944 = vmatprep.mubr.bf16.mxu0 %v3916_v2  ;;  %2233 = vmatprep.mubr.bf16.mxu1 %v3918_v3 }
 0x18a   : > { %v1754_v8 = vpop.f32.mrf.mxu0  ;;  %1945 = vmatmul.mubr.bf16.gmra.mxu0 %v3920_v4  ;;  %v2043_v10 = vpop.f32.mrf.mxu1  ;;  %2234 = vmatmul.mubr.bf16.gmra.mxu1 %v3921_v5 }
 0x18b   : > { %1952 = vmatprep.mubr.bf16.mxu0 %v3922_v6  ;;  %v2044_v11 = vadd.f32 %v2043_v10, %v1754_v8  ;;  %2241 = vmatprep.mubr.bf16.mxu1 %v3924_v7  ;;  %v3940_v6 = vld [vmem:[%s4392_s21 + $0x380] ss:$16 sps:$4 sm:$0xff]   ;;  %v639_v7 = vld [vmem:[#allocation2 + $0x48] sm:$0xff]  ;;  %v3948_v10 = vld [vmem:[%s4392_s21 + $0x3a4] ss:$16 sps:$4 sm:$0xff]  }
 0x18c   : > { %v1756_v12 = vpop.f32.mrf.mxu0  ;;  %v2045_v13 = vpop.f32.mrf.mxu1 }
 0x18d   : > { %v2298_v14 = vadd.f32 %v2044_v11, %v632_v9  ;;  %v3943_v9 = vld [vmem:[%s4392_s21 + $0x388] ss:$16 sps:$4 sm:$0xff]   ;;  %v3951_v13 = vld [vmem:[%s4392_s21 + $0x3ac] ss:$16 sps:$4 sm:$0xff]  }
 0x18e   : > { %v1757_v15 = vpop.f32.mrf.mxu0  ;;  %v2046_v18 = vpop.f32.mrf.mxu1 }
 0x18f   : > { %2362 = vst [vmem:[#allocation2 + $0xb0] sm:$0xff] %v2298_v14  ;;  %v2047_v21 = vadd.f32 %v2046_v18, %v1757_v15 }
 0x190   : > { %v1759_v22 = vpop.f32.mrf.mxu0  ;;  %v2048_v24 = vpop.f32.mrf.mxu1 }
 0x191   : > { %v2299_v25 = vadd.f32 %v2047_v21, %v633_v17  ;;  %v640_v17 = vld [vmem:[#allocation2 + $0x180] sm:$0xff] }
 0x192   : > { %v1762_v26 = vpop.f32.mrf.mxu0  ;;  %1953 = vmatmul.mubr.bf16.gmra.mxu0 %v3926_v16  ;;  %v2051_v28 = vpop.f32.mrf.mxu1  ;;  %2242 = vmatmul.mubr.bf16.gmra.mxu1 %v3927_v19  ;;  %v3946_v24 = vld [vmem:[%s4392_s21 + $0x3a0] ss:$16 sps:$4 sm:$0xff]  }
 0x193   : > { %1960 = vmatprep.mubr.bf16.mxu0 %v3928_v20  ;;  %2363 = vst [vmem:[#allocation2 + $0x1b0] sm:$0xff] %v2299_v25  ;;  %v2052_v29 = vadd.f32 %v2051_v28, %v1762_v26  ;;  %2249 = vmatprep.mubr.bf16.mxu1 %v3930_v23  ;;  %v641_v25 = vld [vmem:[#allocation2 + $0x110] sm:$0xff] }
 0x194   : > { %v1764_v30 = vpop.f32.mrf.mxu0  ;;  %v2053_v31 = vpop.f32.mrf.mxu1  ;;  %v3954_v28 = vld [vmem:[%s4392_s21 + $0x3c4] ss:$16 sps:$4 sm:$0xff]  }
 0x195   : > { %v2300_v32 = vadd.f32 %v2052_v29, %v634_v27  ;;  %v3949_v27 = vld [vmem:[%s4392_s21 + $0x3a8] ss:$16 sps:$4 sm:$0xff]   ;;  %v3957_v31 = vld [vmem:[%s4392_s21 + $0x3cc] ss:$16 sps:$4 sm:$0xff]  }
 0x196   : > { %v1765_v33 = vpop.f32.mrf.mxu0  ;;  %v2054_v36 = vpop.f32.mrf.mxu1 }
 0x197   : > { %2364 = vst [vmem:[#allocation2 + $0xd8] sm:$0xff] %v2300_v32  ;;  %v2055_v39 = vadd.f32 %v2054_v36, %v1765_v33 }
 0x198   : > { %v1767_v40 = vpop.f32.mrf.mxu0  ;;  %v2056_v42 = vpop.f32.mrf.mxu1 }
 0x199   : > { %v2301_v43 = vadd.f32 %v2055_v39, %v635_v35  ;;  %v642_v35 = vld [vmem:[#allocation2 + $0x118] sm:$0xff]  ;;  %v3952_v42 = vld [vmem:[%s4392_s21 + $0x3c0] ss:$16 sps:$4 sm:$0xff]  }
 0x19a   : > { %v1770_v44 = vpop.f32.mrf.mxu0  ;;  %1961 = vmatmul.mubr.bf16.gmra.mxu0 %v3932_v34  ;;  %v2059_v46 = vpop.f32.mrf.mxu1  ;;  %2250 = vmatmul.mubr.bf16.gmra.mxu1 %v3933_v37 }
 0x19b   : > { %1968 = vmatprep.mubr.bf16.mxu0 %v3934_v38  ;;  %2365 = vst [vmem:[#allocation2 + $0x18] sm:$0xff] %v2301_v43  ;;  %v2060_v47 = vadd.f32 %v2059_v46, %v1770_v44  ;;  %2257 = vmatprep.mubr.bf16.mxu1 %v3936_v41  ;;  %v643_v43 = vld [vmem:[#allocation2 + $0x98] sm:$0xff]  ;;  %v3960_v46 = vld [vmem:[%s4392_s21 + $0x3e4] ss:$16 sps:$4 sm:$0xff]  }
 0x19c   : > { %v1772_v48 = vpop.f32.mrf.mxu0  ;;  %v2061_v49 = vpop.f32.mrf.mxu1 }
 0x19d   : > { %v2302_v50 = vadd.f32 %v2060_v47, %v636_v45  ;;  %v3955_v45 = vld [vmem:[%s4392_s21 + $0x3c8] ss:$16 sps:$4 sm:$0xff]   ;;  %v3963_v49 = vld [vmem:[%s4392_s21 + $0x3ec] ss:$16 sps:$4 sm:$0xff]  }
 0x19e   : > { %v1773_v51 = vpop.f32.mrf.mxu0  ;;  %v2062_v54 = vpop.f32.mrf.mxu1 }
 0x19f   : > { %2366 = vst [vmem:[#allocation2 + $0x50] sm:$0xff] %v2302_v50  ;;  %v2063_v57 = vadd.f32 %v2062_v54, %v1773_v51 }
 0x1a0   : > { %v1775_v58 = vpop.f32.mrf.mxu0  ;;  %v2064_v60 = vpop.f32.mrf.mxu1 }
 0x1a1   : > { %v2303_v61 = vadd.f32 %v2063_v57, %v637_v53  ;;  %v644_v53 = vld [vmem:[#allocation2 + $0x120] sm:$0xff] }
 0x1a2   : > { %v1778_v62 = vpop.f32.mrf.mxu0  ;;  %1969 = vmatmul.mubr.bf16.gmra.mxu0 %v3938_v52  ;;  %v2067_v0 = vpop.f32.mrf.mxu1  ;;  %2258 = vmatmul.mubr.bf16.gmra.mxu1 %v3939_v55  ;;  %v3958_v60 = vld [vmem:[%s4392_s21 + $0x3e0] ss:$16 sps:$4 sm:$0xff]  }
 0x1a3   : > { %1976 = vmatprep.mubr.bf16.mxu0 %v3942_v56  ;;  %2367 = vst [vmem:[#allocation2 + $0x168] sm:$0xff] %v2303_v61  ;;  %v2068_v1 = vadd.f32 %v2067_v0, %v1778_v62  ;;  %2265 = vmatprep.mubr.bf16.mxu1 %v3945_v59  ;;  %v645_v61 = vld [vmem:[#allocation2 + $0x150] sm:$0xff] }
 0x1a4   : > { %v1780_v2 = vpop.f32.mrf.mxu0  ;;  %v2069_v3 = vpop.f32.mrf.mxu1 }
 0x1a5   : > { %v2304_v4 = vadd.f32 %v2068_v1, %v638_v63  ;;  %v3961_v63 = vld [vmem:[%s4392_s21 + $0x3e8] ss:$16 sps:$4 sm:$0xff]  }
 0x1a6   : > { %v1781_v5 = vpop.f32.mrf.mxu0  ;;  %v2070_v8 = vpop.f32.mrf.mxu1 }
 0x1a7   : > { %2368 = vst [vmem:[#allocation2 + $0x130] sm:$0xff] %v2304_v4  ;;  %v2071_v11 = vadd.f32 %v2070_v8, %v1781_v5  ;;  %v646_v5 = vld [vmem:[#allocation2 + $0x108] sm:$0xff] }
 0x1a8   : > { %v1783_v12 = vpop.f32.mrf.mxu0  ;;  %v2072_v14 = vpop.f32.mrf.mxu1 }
 0x1a9   : > { %v2305_v15 = vadd.f32 %v2071_v11, %v639_v7  ;;  %v647_v12 = vld [vmem:[#allocation2 + $0x60] sm:$0xff] }
 0x1aa   : > { %v1786_v16 = vpop.f32.mrf.mxu0  ;;  %1977 = vmatmul.mubr.bf16.gmra.mxu0 %v3940_v6  ;;  %v2075_v18 = vpop.f32.mrf.mxu1  ;;  %2266 = vmatmul.mubr.bf16.gmra.mxu1 %v3943_v9 }
 0x1ab   : > { %1984 = vmatprep.mubr.bf16.mxu0 %v3948_v10  ;;  %2369 = vst [vmem:[#allocation2 + $0x48] sm:$0xff] %v2305_v15  ;;  %v2076_v19 = vadd.f32 %v2075_v18, %v1786_v16  ;;  %2273 = vmatprep.mubr.bf16.mxu1 %v3951_v13 }
 0x1ac   : > { %v1788_v20 = vpop.f32.mrf.mxu0  ;;  %v2077_v21 = vpop.f32.mrf.mxu1 }
 0x1ad   : > { %v2306_v22 = vadd.f32 %v2076_v19, %v640_v17  ;;  %v648_v19 = vld [vmem:[#allocation2 + $0xe0] sm:$0xff] }
 0x1ae   : > { %v1789_v23 = vpop.f32.mrf.mxu0  ;;  %v2078_v26 = vpop.f32.mrf.mxu1 }
 0x1af   : > { %2370 = vst [vmem:[#allocation2 + $0x180] sm:$0xff] %v2306_v22  ;;  %v2079_v29 = vadd.f32 %v2078_v26, %v1789_v23  ;;  %v649_v26 = vld [vmem:[#allocation2 + $0x188] sm:$0xff] }
 0x1b0   : > { %v1791_v30 = vpop.f32.mrf.mxu0  ;;  %v2080_v32 = vpop.f32.mrf.mxu1 }
 0x1b1   : > { %v2307_v33 = vadd.f32 %v2079_v29, %v641_v25 }
 0x1b2   : > { %v1794_v34 = vpop.f32.mrf.mxu0  ;;  %1985 = vmatmul.mubr.bf16.gmra.mxu0 %v3946_v24  ;;  %v2083_v36 = vpop.f32.mrf.mxu1  ;;  %2274 = vmatmul.mubr.bf16.gmra.mxu1 %v3949_v27 }
 0x1b3   : > { %1992 = vmatprep.mubr.bf16.mxu0 %v3954_v28  ;;  %2371 = vst [vmem:[#allocation2 + $0x110] sm:$0xff] %v2307_v33  ;;  %v2084_v37 = vadd.f32 %v2083_v36, %v1794_v34  ;;  %2281 = vmatprep.mubr.bf16.mxu1 %v3957_v31  ;;  %v650_v33 = vld [vmem:[#allocation2 + $0x138] sm:$0xff] }
 0x1b4   : > { %v1796_v38 = vpop.f32.mrf.mxu0  ;;  %v2085_v39 = vpop.f32.mrf.mxu1 }
 0x1b5   : > { %v2308_v40 = vadd.f32 %v2084_v37, %v642_v35 }
 0x1b6   : > { %v1797_v41 = vpop.f32.mrf.mxu0  ;;  %v2086_v44 = vpop.f32.mrf.mxu1 }
 0x1b7   : > { %2372 = vst [vmem:[#allocation2 + $0x118] sm:$0xff] %v2308_v40  ;;  %v2087_v47 = vadd.f32 %v2086_v44, %v1797_v41  ;;  %v651_v40 = vld [vmem:[#allocation2 + $0x140] sm:$0xff] }
 0x1b8   : > { %v1799_v48 = vpop.f32.mrf.mxu0  ;;  %v2088_v50 = vpop.f32.mrf.mxu1 }
 0x1b9   : > { %v2309_v51 = vadd.f32 %v2087_v47, %v643_v43  ;;  %v652_v47 = vld [vmem:[#allocation2 + $0x80] sm:$0xff] }
 0x1ba   : > { %v1802_v52 = vpop.f32.mrf.mxu0  ;;  %1993 = vmatmul.mubr.bf16.gmra.mxu0 %v3952_v42  ;;  %v2091_v54 = vpop.f32.mrf.mxu1  ;;  %2282 = vmatmul.mubr.bf16.gmra.mxu1 %v3955_v45 }
 0x1bb   : > { %2000 = vmatprep.mubr.bf16.mxu0 %v3960_v46  ;;  %2373 = vst [vmem:[#allocation2 + $0x98] sm:$0xff] %v2309_v51  ;;  %v2092_v55 = vadd.f32 %v2091_v54, %v1802_v52  ;;  %2289 = vmatprep.mubr.bf16.mxu1 %v3963_v49  ;;  %v653_v54 = vld [vmem:[#allocation2 + $0x1a8] sm:$0xff] }
 0x1bc   : > { %v1804_v56 = vpop.f32.mrf.mxu0  ;;  %v2093_v57 = vpop.f32.mrf.mxu1 }
 0x1bd   : > { %v2310_v58 = vadd.f32 %v2092_v55, %v644_v53 }
 0x1be   : > { %v1805_v59 = vpop.f32.mrf.mxu0  ;;  %v2094_v62 = vpop.f32.mrf.mxu1 }
 0x1bf   : > { %2374 = vst [vmem:[#allocation2 + $0x120] sm:$0xff] %v2310_v58  ;;  %v2095_v0 = vadd.f32 %v2094_v62, %v1805_v59 }
 0x1c0   : > { %v1807_v1 = vpop.f32.mrf.mxu0  ;;  %v2096_v2 = vpop.f32.mrf.mxu1 }
 0x1c1   : > { %v2311_v3 = vadd.f32 %v2095_v0, %v645_v61  ;;  %v654_v61 = vld [vmem:[#allocation2 + $0x1b8] sm:$0xff] }
 0x1c2   : > { %v1810_v4 = vpop.f32.mrf.mxu0  ;;  %2001 = vmatmul.mubr.bf16.gmra.mxu0 %v3958_v60  ;;  %v2099_v6 = vpop.f32.mrf.mxu1  ;;  %2290 = vmatmul.mubr.bf16.gmra.mxu1 %v3961_v63 }
 0x1c3   : > { %2375 = vst [vmem:[#allocation2 + $0x150] sm:$0xff] %v2311_v3  ;;  %v2100_v7 = vadd.f32 %v2099_v6, %v1810_v4  ;;  %v655_v4 = vld [vmem:[#allocation2 + $0x28] sm:$0xff] }
 0x1c4   : > { %v1812_v8 = vpop.f32.mrf.mxu0  ;;  %v2101_v9 = vpop.f32.mrf.mxu1 }
 0x1c5   : > { %v2312_v10 = vadd.f32 %v2100_v7, %v646_v5 }
 0x1c6   : > { %v1813_v11 = vpop.f32.mrf.mxu0  ;;  %v2102_v13 = vpop.f32.mrf.mxu1 }
 0x1c7   : > { %2376 = vst [vmem:[#allocation2 + $0x108] sm:$0xff] %v2312_v10  ;;  %v2103_v14 = vadd.f32 %v2102_v13, %v1813_v11  ;;  %v656_v11 = vld [vmem:[#allocation2 + $0x1e8] sm:$0xff] }
 0x1c8   : > { %v1815_v15 = vpop.f32.mrf.mxu0  ;;  %v2104_v16 = vpop.f32.mrf.mxu1 }
 0x1c9   : > { %v2313_v17 = vadd.f32 %v2103_v14, %v647_v12 }
 0x1ca   : > { %v1818_v18 = vpop.f32.mrf.mxu0  ;;  %v2107_v20 = vpop.f32.mrf.mxu1 }
 0x1cb   : > { %2377 = vst [vmem:[#allocation2 + $0x60] sm:$0xff] %v2313_v17  ;;  %v2108_v21 = vadd.f32 %v2107_v20, %v1818_v18  ;;  %v657_v18 = vld [vmem:[#allocation2 + $0xf8] sm:$0xff] }
 0x1cc   : > { %v1820_v22 = vpop.f32.mrf.mxu0  ;;  %v2109_v23 = vpop.f32.mrf.mxu1 }
 0x1cd   : > { %v2314_v24 = vadd.f32 %v2108_v21, %v648_v19 }
 0x1ce   : > { %v1821_v25 = vpop.f32.mrf.mxu0  ;;  %v2110_v27 = vpop.f32.mrf.mxu1 }
 0x1cf   : > { %2378 = vst [vmem:[#allocation2 + $0xe0] sm:$0xff] %v2314_v24  ;;  %v2111_v28 = vadd.f32 %v2110_v27, %v1821_v25  ;;  %v658_v25 = vld [vmem:[#allocation2 + $0x160] sm:$0xff] }
 0x1d0   : > { %v1823_v29 = vpop.f32.mrf.mxu0  ;;  %v2112_v30 = vpop.f32.mrf.mxu1 }
 0x1d1   : > { %v2315_v31 = vadd.f32 %v2111_v28, %v649_v26 }
 0x1d2   : > { %v1826_v32 = vpop.f32.mrf.mxu0  ;;  %v2115_v34 = vpop.f32.mrf.mxu1 }
 0x1d3   : > { %2379 = vst [vmem:[#allocation2 + $0x188] sm:$0xff] %v2315_v31  ;;  %v2116_v35 = vadd.f32 %v2115_v34, %v1826_v32  ;;  %v659_v32 = vld [vmem:[#allocation2 + $0x30] sm:$0xff] }
 0x1d4   : > { %v1828_v36 = vpop.f32.mrf.mxu0  ;;  %v2117_v37 = vpop.f32.mrf.mxu1 }
 0x1d5   : > { %v2316_v38 = vadd.f32 %v2116_v35, %v650_v33 }
 0x1d6   : > { %v1829_v39 = vpop.f32.mrf.mxu0  ;;  %v2118_v41 = vpop.f32.mrf.mxu1 }
 0x1d7   : > { %2380 = vst [vmem:[#allocation2 + $0x138] sm:$0xff] %v2316_v38  ;;  %v2119_v42 = vadd.f32 %v2118_v41, %v1829_v39  ;;  %v660_v39 = vld [vmem:[#allocation2 + $0x1e0] sm:$0xff] }
 0x1d8   : > { %v1831_v43 = vpop.f32.mrf.mxu0  ;;  %v2120_v44 = vpop.f32.mrf.mxu1 }
 0x1d9   : > { %v2317_v45 = vadd.f32 %v2119_v42, %v651_v40 }
 0x1da   : > { %v1834_v46 = vpop.f32.mrf.mxu0  ;;  %v2123_v48 = vpop.f32.mrf.mxu1 }
 0x1db   : > { %2381 = vst [vmem:[#allocation2 + $0x140] sm:$0xff] %v2317_v45  ;;  %v2124_v49 = vadd.f32 %v2123_v48, %v1834_v46  ;;  %v661_v46 = vld [vmem:[#allocation2] sm:$0xff] }
 0x1dc   : > { %v1836_v50 = vpop.f32.mrf.mxu0  ;;  %v2125_v51 = vpop.f32.mrf.mxu1 }
 0x1dd   : > { %v2318_v52 = vadd.f32 %v2124_v49, %v652_v47 }
 0x1de   : > { %v1837_v53 = vpop.f32.mrf.mxu0  ;;  %v2126_v55 = vpop.f32.mrf.mxu1 }
 0x1df   : > { %2382 = vst [vmem:[#allocation2 + $0x80] sm:$0xff] %v2318_v52  ;;  %v2127_v56 = vadd.f32 %v2126_v55, %v1837_v53  ;;  %v662_v53 = vld [vmem:[#allocation2 + $0xf0] sm:$0xff] }
 0x1e0   : > { %v1839_v57 = vpop.f32.mrf.mxu0  ;;  %v2128_v58 = vpop.f32.mrf.mxu1 }
 0x1e1   : > { %v2319_v59 = vadd.f32 %v2127_v56, %v653_v54 }
 0x1e2   : > { %v1842_v60 = vpop.f32.mrf.mxu0  ;;  %v2131_v62 = vpop.f32.mrf.mxu1 }
 0x1e3   : > { %2383 = vst [vmem:[#allocation2 + $0x1a8] sm:$0xff] %v2319_v59  ;;  %v2132_v63 = vadd.f32 %v2131_v62, %v1842_v60  ;;  %v663_v60 = vld [vmem:[#allocation2 + $0x8] sm:$0xff] }
 0x1e4   : > { %v1844_v0 = vpop.f32.mrf.mxu0  ;;  %v2133_v1 = vpop.f32.mrf.mxu1 }
 0x1e5   : > { %v2320_v2 = vadd.f32 %v2132_v63, %v654_v61 }
 0x1e6   : > { %v1845_v3 = vpop.f32.mrf.mxu0  ;;  %v2134_v5 = vpop.f32.mrf.mxu1 }
 0x1e7   : > { %2384 = vst [vmem:[#allocation2 + $0x1b8] sm:$0xff] %v2320_v2  ;;  %v2135_v6 = vadd.f32 %v2134_v5, %v1845_v3  ;;  %v664_v3 = vld [vmem:[#allocation2 + $0x148] sm:$0xff] }
 0x1e8   : > { %v1847_v7 = vpop.f32.mrf.mxu0  ;;  %v2136_v8 = vpop.f32.mrf.mxu1 }
 0x1e9   : > { %v2321_v9 = vadd.f32 %v2135_v6, %v655_v4 }
 0x1ea   : > { %v1850_v10 = vpop.f32.mrf.mxu0  ;;  %v2139_v12 = vpop.f32.mrf.mxu1 }
 0x1eb   : > { %2385 = vst [vmem:[#allocation2 + $0x28] sm:$0xff] %v2321_v9  ;;  %v2140_v13 = vadd.f32 %v2139_v12, %v1850_v10  ;;  %v665_v10 = vld [vmem:[#allocation2 + $0x1d0] sm:$0xff] }
 0x1ec   : > { %v1852_v14 = vpop.f32.mrf.mxu0  ;;  %v2141_v15 = vpop.f32.mrf.mxu1 }
 0x1ed   : > { %v2322_v16 = vadd.f32 %v2140_v13, %v656_v11 }
 0x1ee   : > { %v1853_v17 = vpop.f32.mrf.mxu0  ;;  %v2142_v19 = vpop.f32.mrf.mxu1 }
 0x1ef   : > { %2386 = vst [vmem:[#allocation2 + $0x1e8] sm:$0xff] %v2322_v16  ;;  %v2143_v20 = vadd.f32 %v2142_v19, %v1853_v17  ;;  %v666_v17 = vld [vmem:[#allocation2 + $0x100] sm:$0xff] }
 0x1f0   : > { %v1855_v21 = vpop.f32.mrf.mxu0  ;;  %v2144_v22 = vpop.f32.mrf.mxu1 }
 0x1f1   : > { %v2323_v23 = vadd.f32 %v2143_v20, %v657_v18 }
 0x1f2   : > { %v1858_v24 = vpop.f32.mrf.mxu0  ;;  %v2147_v26 = vpop.f32.mrf.mxu1 }
 0x1f3   : > { %2387 = vst [vmem:[#allocation2 + $0xf8] sm:$0xff] %v2323_v23  ;;  %v2148_v27 = vadd.f32 %v2147_v26, %v1858_v24  ;;  %v667_v24 = vld [vmem:[#allocation2 + $0xc8] sm:$0xff] }
 0x1f4   : > { %v1860_v28 = vpop.f32.mrf.mxu0  ;;  %v2149_v29 = vpop.f32.mrf.mxu1 }
 0x1f5   : > { %v2324_v30 = vadd.f32 %v2148_v27, %v658_v25 }
 0x1f6   : > { %v1861_v31 = vpop.f32.mrf.mxu0  ;;  %v2150_v33 = vpop.f32.mrf.mxu1 }
 0x1f7   : > { %2388 = vst [vmem:[#allocation2 + $0x160] sm:$0xff] %v2324_v30  ;;  %v2151_v34 = vadd.f32 %v2150_v33, %v1861_v31  ;;  %v668_v31 = vld [vmem:[#allocation2 + $0x40] sm:$0xff] }
 0x1f8   : > { %v1863_v35 = vpop.f32.mrf.mxu0  ;;  %v2152_v36 = vpop.f32.mrf.mxu1 }
 0x1f9   : > { %v2325_v37 = vadd.f32 %v2151_v34, %v659_v32 }
 0x1fa   : > { %v1866_v38 = vpop.f32.mrf.mxu0  ;;  %v2155_v40 = vpop.f32.mrf.mxu1 }
 0x1fb   : > { %2389 = vst [vmem:[#allocation2 + $0x30] sm:$0xff] %v2325_v37  ;;  %v2156_v41 = vadd.f32 %v2155_v40, %v1866_v38  ;;  %v669_v38 = vld [vmem:[#allocation2 + $0x1f8] sm:$0xff] }
 0x1fc   : > { %v1868_v42 = vpop.f32.mrf.mxu0  ;;  %v2157_v43 = vpop.f32.mrf.mxu1 }
 0x1fd   : > { %v2326_v44 = vadd.f32 %v2156_v41, %v660_v39 }
 0x1fe   : > { %v1869_v45 = vpop.f32.mrf.mxu0  ;;  %v2158_v47 = vpop.f32.mrf.mxu1 }
 0x1ff   : > { %2390 = vst [vmem:[#allocation2 + $0x1e0] sm:$0xff] %v2326_v44  ;;  %v2159_v48 = vadd.f32 %v2158_v47, %v1869_v45  ;;  %v670_v45 = vld [vmem:[#allocation2 + $0x20] sm:$0xff] }
 0x200   : > { %v1871_v49 = vpop.f32.mrf.mxu0  ;;  %v2160_v50 = vpop.f32.mrf.mxu1 }
 0x201   : > { %v2327_v51 = vadd.f32 %v2159_v48, %v661_v46 }
 0x202   : > { %v1874_v52 = vpop.f32.mrf.mxu0  ;;  %v2163_v54 = vpop.f32.mrf.mxu1 }
 0x203   : > { %2391 = vst [vmem:[#allocation2] sm:$0xff] %v2327_v51  ;;  %v2164_v55 = vadd.f32 %v2163_v54, %v1874_v52  ;;  %v671_v52 = vld [vmem:[#allocation2 + $0x128] sm:$0xff] }
 0x204   : > { %v1876_v56 = vpop.f32.mrf.mxu0  ;;  %v2165_v57 = vpop.f32.mrf.mxu1 }
 0x205   : > { %v2328_v58 = vadd.f32 %v2164_v55, %v662_v53 }
 0x206   : > { %v1877_v59 = vpop.f32.mrf.mxu0  ;;  %v2166_v61 = vpop.f32.mrf.mxu1 }
 0x207   : > { %2392 = vst [vmem:[#allocation2 + $0xf0] sm:$0xff] %v2328_v58  ;;  %v2167_v62 = vadd.f32 %v2166_v61, %v1877_v59  ;;  %v672_v59 = vld [vmem:[#allocation2 + $0x1a0] sm:$0xff] }
 0x208   : > { %v1879_v63 = vpop.f32.mrf.mxu0  ;;  %v2168_v0 = vpop.f32.mrf.mxu1 }
 0x209   : > { %v2329_v1 = vadd.f32 %v2167_v62, %v663_v60 }
 0x20a   : > { %v1882_v2 = vpop.f32.mrf.mxu0  ;;  %v2171_v4 = vpop.f32.mrf.mxu1 }
 0x20b   : > { %2393 = vst [vmem:[#allocation2 + $0x8] sm:$0xff] %v2329_v1  ;;  %v2172_v5 = vadd.f32 %v2171_v4, %v1882_v2  ;;  %v673_v2 = vld [vmem:[#allocation2 + $0x1f0] sm:$0xff] }
 0x20c   : > { %v1884_v6 = vpop.f32.mrf.mxu0  ;;  %v2173_v7 = vpop.f32.mrf.mxu1 }
 0x20d   : > { %v2330_v8 = vadd.f32 %v2172_v5, %v664_v3 }
 0x20e   : > { %v1885_v9 = vpop.f32.mrf.mxu0  ;;  %v2174_v11 = vpop.f32.mrf.mxu1 }
 0x20f   : > { %2394 = vst [vmem:[#allocation2 + $0x148] sm:$0xff] %v2330_v8  ;;  %v2175_v12 = vadd.f32 %v2174_v11, %v1885_v9  ;;  %v674_v9 = vld [vmem:[#allocation2 + $0xe8] sm:$0xff] }
 0x210   : > { %v1887_v13 = vpop.f32.mrf.mxu0  ;;  %v2176_v14 = vpop.f32.mrf.mxu1 }
 0x211   : > { %v2331_v15 = vadd.f32 %v2175_v12, %v665_v10 }
 0x212   : > { %v1890_v16 = vpop.f32.mrf.mxu0  ;;  %v2179_v18 = vpop.f32.mrf.mxu1 }
 0x213   : > { %2395 = vst [vmem:[#allocation2 + $0x1d0] sm:$0xff] %v2331_v15  ;;  %v2180_v19 = vadd.f32 %v2179_v18, %v1890_v16  ;;  %v675_v16 = vld [vmem:[#allocation2 + $0x78] sm:$0xff] }
 0x214   : > { %v1892_v20 = vpop.f32.mrf.mxu0  ;;  %v2181_v21 = vpop.f32.mrf.mxu1 }
 0x215   : > { %v2332_v22 = vadd.f32 %v2180_v19, %v666_v17 }
 0x216   : > { %v1893_v23 = vpop.f32.mrf.mxu0  ;;  %v2182_v25 = vpop.f32.mrf.mxu1 }
 0x217   : > { %2396 = vst [vmem:[#allocation2 + $0x100] sm:$0xff] %v2332_v22  ;;  %v2183_v26 = vadd.f32 %v2182_v25, %v1893_v23  ;;  %v676_v23 = vld [vmem:[#allocation2 + $0x70] sm:$0xff] }
 0x218   : > { %v1895_v27 = vpop.f32.mrf.mxu0  ;;  %v2184_v28 = vpop.f32.mrf.mxu1 }
 0x219   : > { %v2333_v29 = vadd.f32 %v2183_v26, %v667_v24 }
 0x21a   : > { %v1898_v30 = vpop.f32.mrf.mxu0  ;;  %v2187_v32 = vpop.f32.mrf.mxu1 }
 0x21b   : > { %2397 = vst [vmem:[#allocation2 + $0xc8] sm:$0xff] %v2333_v29  ;;  %v2188_v33 = vadd.f32 %v2187_v32, %v1898_v30  ;;  %v677_v30 = vld [vmem:[#allocation2 + $0x90] sm:$0xff] }
 0x21c   : > { %v1900_v34 = vpop.f32.mrf.mxu0  ;;  %v2189_v35 = vpop.f32.mrf.mxu1 }
 0x21d   : > { %v2334_v36 = vadd.f32 %v2188_v33, %v668_v31 }
 0x21e   : > { %v1901_v37 = vpop.f32.mrf.mxu0  ;;  %v2190_v39 = vpop.f32.mrf.mxu1 }
 0x21f   : > { %2398 = vst [vmem:[#allocation2 + $0x40] sm:$0xff] %v2334_v36  ;;  %v2191_v40 = vadd.f32 %v2190_v39, %v1901_v37  ;;  %v678_v37 = vld [vmem:[#allocation2 + $0x1d8] sm:$0xff] }
 0x220   : > { %v1903_v41 = vpop.f32.mrf.mxu0  ;;  %v2192_v42 = vpop.f32.mrf.mxu1 }
 0x221   : > { %v2335_v43 = vadd.f32 %v2191_v40, %v669_v38 }
 0x222   : > { %v1906_v44 = vpop.f32.mrf.mxu0  ;;  %v2195_v46 = vpop.f32.mrf.mxu1 }
 0x223   : > { %2399 = vst [vmem:[#allocation2 + $0x1f8] sm:$0xff] %v2335_v43  ;;  %v2196_v47 = vadd.f32 %v2195_v46, %v1906_v44  ;;  %v679_v44 = vld [vmem:[#allocation2 + $0xd0] sm:$0xff] }
 0x224   : > { %v1908_v48 = vpop.f32.mrf.mxu0  ;;  %v2197_v49 = vpop.f32.mrf.mxu1 }
 0x225   : > { %v2336_v50 = vadd.f32 %v2196_v47, %v670_v45 }
 0x226   : > { %v1909_v51 = vpop.f32.mrf.mxu0  ;;  %v2198_v53 = vpop.f32.mrf.mxu1 }
 0x227   : > { %2400 = vst [vmem:[#allocation2 + $0x20] sm:$0xff] %v2336_v50  ;;  %v2199_v54 = vadd.f32 %v2198_v53, %v1909_v51  ;;  %v680_v51 = vld [vmem:[#allocation2 + $0xb8] sm:$0xff] }
 0x228   : > { %v1911_v55 = vpop.f32.mrf.mxu0  ;;  %v2200_v56 = vpop.f32.mrf.mxu1 }
 0x229   : > { %v2337_v57 = vadd.f32 %v2199_v54, %v671_v52 }
 0x22a   : > { %v1914_v58 = vpop.f32.mrf.mxu0  ;;  %v2203_v60 = vpop.f32.mrf.mxu1 }
 0x22b   : > { %2401 = vst [vmem:[#allocation2 + $0x128] sm:$0xff] %v2337_v57  ;;  %v2204_v61 = vadd.f32 %v2203_v60, %v1914_v58  ;;  %v681_v58 = vld [vmem:[#allocation2 + $0x88] sm:$0xff] }
 0x22c   : > { %v1916_v62 = vpop.f32.mrf.mxu0  ;;  %v2205_v63 = vpop.f32.mrf.mxu1 }
 0x22d   : > { %v2338_v0 = vadd.f32 %v2204_v61, %v672_v59 }
 0x22e   : > { %v1917_v1 = vpop.f32.mrf.mxu0  ;;  %v2206_v3 = vpop.f32.mrf.mxu1 }
 0x22f   : > { %2402 = vst [vmem:[#allocation2 + $0x1a0] sm:$0xff] %v2338_v0  ;;  %v2207_v4 = vadd.f32 %v2206_v3, %v1917_v1  ;;  %v682_v1 = vld [vmem:[#allocation2 + $0xa8] sm:$0xff] }
 0x230   : > { %v1919_v5 = vpop.f32.mrf.mxu0  ;;  %v2208_v6 = vpop.f32.mrf.mxu1 }
 0x231   : > { %v2339_v7 = vadd.f32 %v2207_v4, %v673_v2 }
 0x232   : > { %v1922_v8 = vpop.f32.mrf.mxu0  ;;  %v2211_v10 = vpop.f32.mrf.mxu1 }
 0x233   : > { %2403 = vst [vmem:[#allocation2 + $0x1f0] sm:$0xff] %v2339_v7  ;;  %v2212_v11 = vadd.f32 %v2211_v10, %v1922_v8  ;;  %v683_v8 = vld [vmem:[#allocation2 + $0x1c8] sm:$0xff] }
 0x234   : > { %v1924_v12 = vpop.f32.mrf.mxu0  ;;  %v2213_v13 = vpop.f32.mrf.mxu1 }
 0x235   : > { %v2340_v14 = vadd.f32 %v2212_v11, %v674_v9 }
 0x236   : > { %v1925_v15 = vpop.f32.mrf.mxu0  ;;  %v2214_v17 = vpop.f32.mrf.mxu1 }
 0x237   : > { %2404 = vst [vmem:[#allocation2 + $0xe8] sm:$0xff] %v2340_v14  ;;  %v2215_v18 = vadd.f32 %v2214_v17, %v1925_v15  ;;  %v684_v15 = vld [vmem:[#allocation2 + $0x170] sm:$0xff] }
 0x238   : > { %v1927_v19 = vpop.f32.mrf.mxu0  ;;  %v2216_v20 = vpop.f32.mrf.mxu1 }
 0x239   : > { %v2341_v21 = vadd.f32 %v2215_v18, %v675_v16 }
 0x23a   : > { %v1930_v22 = vpop.f32.mrf.mxu0  ;;  %v2219_v24 = vpop.f32.mrf.mxu1 }
 0x23b   : > { %2405 = vst [vmem:[#allocation2 + $0x78] sm:$0xff] %v2341_v21  ;;  %v2220_v25 = vadd.f32 %v2219_v24, %v1930_v22  ;;  %v685_v22 = vld [vmem:[#allocation2 + $0x178] sm:$0xff] }
 0x23c   : > { %v1932_v26 = vpop.f32.mrf.mxu0  ;;  %v2221_v27 = vpop.f32.mrf.mxu1 }
 0x23d   : > { %v2342_v28 = vadd.f32 %v2220_v25, %v676_v23 }
 0x23e   : > { %v1933_v29 = vpop.f32.mrf.mxu0  ;;  %v2222_v31 = vpop.f32.mrf.mxu1 }
 0x23f   : > { %2406 = vst [vmem:[#allocation2 + $0x70] sm:$0xff] %v2342_v28  ;;  %v2223_v32 = vadd.f32 %v2222_v31, %v1933_v29  ;;  %v686_v29 = vld [vmem:[#allocation2 + $0x68] sm:$0xff] }
 0x240   : > { %v1935_v33 = vpop.f32.mrf.mxu0  ;;  %v2224_v34 = vpop.f32.mrf.mxu1 }
 0x241   : > { %v2343_v35 = vadd.f32 %v2223_v32, %v677_v30 }
 0x242   : > { %v1938_v36 = vpop.f32.mrf.mxu0  ;;  %v2227_v38 = vpop.f32.mrf.mxu1 }
 0x243   : > { %2407 = vst [vmem:[#allocation2 + $0x90] sm:$0xff] %v2343_v35  ;;  %v2228_v39 = vadd.f32 %v2227_v38, %v1938_v36  ;;  %v687_v36 = vld [vmem:[#allocation2 + $0x190] sm:$0xff] }
 0x244   : > { %v1940_v40 = vpop.f32.mrf.mxu0  ;;  %v2229_v41 = vpop.f32.mrf.mxu1 }
 0x245   : > { %v2344_v42 = vadd.f32 %v2228_v39, %v678_v37 }
 0x246   : > { %v1941_v43 = vpop.f32.mrf.mxu0  ;;  %v2230_v45 = vpop.f32.mrf.mxu1 }
 0x247   : > { %2408 = vst [vmem:[#allocation2 + $0x1d8] sm:$0xff] %v2344_v42  ;;  %v2231_v46 = vadd.f32 %v2230_v45, %v1941_v43  ;;  %v688_v43 = vld [vmem:[#allocation2 + $0x198] sm:$0xff] }
 0x248   : > { %v1943_v47 = vpop.f32.mrf.mxu0  ;;  %v2232_v48 = vpop.f32.mrf.mxu1 }
 0x249   : > { %v2345_v49 = vadd.f32 %v2231_v46, %v679_v44 }
 0x24a   : > { %v1946_v50 = vpop.f32.mrf.mxu0  ;;  %v2235_v52 = vpop.f32.mrf.mxu1 }
 0x24b   : > { %2409 = vst [vmem:[#allocation2 + $0xd0] sm:$0xff] %v2345_v49  ;;  %v2236_v53 = vadd.f32 %v2235_v52, %v1946_v50  ;;  %v689_v50 = vld [vmem:[#allocation2 + $0x38] sm:$0xff] }
 0x24c   : > { %v1948_v54 = vpop.f32.mrf.mxu0  ;;  %v2237_v55 = vpop.f32.mrf.mxu1 }
 0x24d   : > { %v2346_v56 = vadd.f32 %v2236_v53, %v680_v51 }
 0x24e   : > { %v1949_v57 = vpop.f32.mrf.mxu0  ;;  %v2238_v59 = vpop.f32.mrf.mxu1 }
 0x24f   : > { %2410 = vst [vmem:[#allocation2 + $0xb8] sm:$0xff] %v2346_v56  ;;  %v2239_v60 = vadd.f32 %v2238_v59, %v1949_v57  ;;  %v690_v57 = vld [vmem:[#allocation2 + $0xc0] sm:$0xff] }
 0x250   : > { %v1951_v61 = vpop.f32.mrf.mxu0  ;;  %v2240_v62 = vpop.f32.mrf.mxu1 }
 0x251   : > { %v2347_v63 = vadd.f32 %v2239_v60, %v681_v58 }
 0x252   : > { %v1954_v0 = vpop.f32.mrf.mxu0  ;;  %v2243_v2 = vpop.f32.mrf.mxu1 }
 0x253   : > { %2411 = vst [vmem:[#allocation2 + $0x88] sm:$0xff] %v2347_v63  ;;  %v2244_v3 = vadd.f32 %v2243_v2, %v1954_v0  ;;  %v691_v0 = vld [vmem:[#allocation2 + $0x1c0] sm:$0xff] }
 0x254   : > { %v1956_v4 = vpop.f32.mrf.mxu0  ;;  %v2245_v5 = vpop.f32.mrf.mxu1 }
 0x255   : > { %v2348_v6 = vadd.f32 %v2244_v3, %v682_v1 }
 0x256   : > { %v1957_v7 = vpop.f32.mrf.mxu0  ;;  %v2246_v9 = vpop.f32.mrf.mxu1 }
 0x257   : > { %2412 = vst [vmem:[#allocation2 + $0xa8] sm:$0xff] %v2348_v6  ;;  %v2247_v10 = vadd.f32 %v2246_v9, %v1957_v7  ;;  %v692_v7 = vld [vmem:[#allocation2 + $0x158] sm:$0xff] }
 0x258   : > { %v1959_v11 = vpop.f32.mrf.mxu0  ;;  %v2248_v12 = vpop.f32.mrf.mxu1 }
 0x259   : > { %v2349_v13 = vadd.f32 %v2247_v10, %v683_v8 }
 0x25a   : > { %v1962_v14 = vpop.f32.mrf.mxu0  ;;  %v2251_v16 = vpop.f32.mrf.mxu1 }
 0x25b   : > { %2413 = vst [vmem:[#allocation2 + $0x1c8] sm:$0xff] %v2349_v13  ;;  %v2252_v17 = vadd.f32 %v2251_v16, %v1962_v14  ;;  %v693_v14 = vld [vmem:[#allocation2 + $0x10] sm:$0xff] }
 0x25c   : > { %v1964_v18 = vpop.f32.mrf.mxu0  ;;  %v2253_v19 = vpop.f32.mrf.mxu1 }
 0x25d   : > { %v2350_v20 = vadd.f32 %v2252_v17, %v684_v15 }
 0x25e   : > { %v1965_v21 = vpop.f32.mrf.mxu0  ;;  %v2254_v23 = vpop.f32.mrf.mxu1 }
 0x25f   : > { %2414 = vst [vmem:[#allocation2 + $0x170] sm:$0xff] %v2350_v20  ;;  %v2255_v24 = vadd.f32 %v2254_v23, %v1965_v21  ;;  %v694_v21 = vld [vmem:[#allocation2 + $0x58] sm:$0xff] }
 0x260   : > { %v1967_v25 = vpop.f32.mrf.mxu0  ;;  %v2256_v26 = vpop.f32.mrf.mxu1 }
 0x261   : > { %v2351_v27 = vadd.f32 %v2255_v24, %v685_v22 }
 0x262   : > { %v1970_v28 = vpop.f32.mrf.mxu0  ;;  %v2259_v30 = vpop.f32.mrf.mxu1 }
 0x263   : > { %2415 = vst [vmem:[#allocation2 + $0x178] sm:$0xff] %v2351_v27  ;;  %v2260_v31 = vadd.f32 %v2259_v30, %v1970_v28  ;;  %v695_v28 = vld [vmem:[#allocation2 + $0xa0] sm:$0xff] }
 0x264   : > { %v1972_v32 = vpop.f32.mrf.mxu0  ;;  %v2261_v33 = vpop.f32.mrf.mxu1 }
 0x265   : > { %v2352_v34 = vadd.f32 %v2260_v31, %v686_v29 }
 0x266   : > { %v1973_v35 = vpop.f32.mrf.mxu0  ;;  %v2262_v37 = vpop.f32.mrf.mxu1 }
 0x267   : > { %2416 = vst [vmem:[#allocation2 + $0x68] sm:$0xff] %v2352_v34  ;;  %v2263_v38 = vadd.f32 %v2262_v37, %v1973_v35 }
 0x268   : > { %v1975_v39 = vpop.f32.mrf.mxu0  ;;  %v2264_v40 = vpop.f32.mrf.mxu1 }
 0x269   : > { %v2353_v41 = vadd.f32 %v2263_v38, %v687_v36 }
 0x26a   : > { %v1978_v42 = vpop.f32.mrf.mxu0  ;;  %v2267_v44 = vpop.f32.mrf.mxu1 }
 0x26b   : > { %2417 = vst [vmem:[#allocation2 + $0x190] sm:$0xff] %v2353_v41  ;;  %v2268_v45 = vadd.f32 %v2267_v44, %v1978_v42 }
 0x26c   : > { %v1980_v46 = vpop.f32.mrf.mxu0  ;;  %v2269_v47 = vpop.f32.mrf.mxu1 }
 0x26d   : > { %v2354_v48 = vadd.f32 %v2268_v45, %v688_v43 }
 0x26e   : > { %v1981_v49 = vpop.f32.mrf.mxu0  ;;  %v2270_v51 = vpop.f32.mrf.mxu1 }
 0x26f   : > { %2418 = vst [vmem:[#allocation2 + $0x198] sm:$0xff] %v2354_v48  ;;  %v2271_v52 = vadd.f32 %v2270_v51, %v1981_v49 }
 0x270   : > { %v1983_v53 = vpop.f32.mrf.mxu0  ;;  %v2272_v54 = vpop.f32.mrf.mxu1 }
 0x271   : > { %v2355_v55 = vadd.f32 %v2271_v52, %v689_v50 }
 0x272   : > { %v1986_v56 = vpop.f32.mrf.mxu0  ;;  %v2275_v58 = vpop.f32.mrf.mxu1 }
 0x273   : > { %2419 = vst [vmem:[#allocation2 + $0x38] sm:$0xff] %v2355_v55  ;;  %v2276_v59 = vadd.f32 %v2275_v58, %v1986_v56 }
 0x274   : > { %v1988_v60 = vpop.f32.mrf.mxu0  ;;  %v2277_v61 = vpop.f32.mrf.mxu1 }
 0x275   : > { %v2356_v62 = vadd.f32 %v2276_v59, %v690_v57 }
 0x276   : > { %v1989_v63 = vpop.f32.mrf.mxu0  ;;  %v2278_v1 = vpop.f32.mrf.mxu1 }
 0x277   : > { %2420 = vst [vmem:[#allocation2 + $0xc0] sm:$0xff] %v2356_v62  ;;  %v2279_v2 = vadd.f32 %v2278_v1, %v1989_v63 }
 0x278   : > { %v1991_v3 = vpop.f32.mrf.mxu0  ;;  %v2280_v4 = vpop.f32.mrf.mxu1 }
 0x279   : > { %v2357_v5 = vadd.f32 %v2279_v2, %v691_v0 }
 0x27a   : > { %v1994_v6 = vpop.f32.mrf.mxu0  ;;  %v2283_v8 = vpop.f32.mrf.mxu1 }
 0x27b   : > { %2421 = vst [vmem:[#allocation2 + $0x1c0] sm:$0xff] %v2357_v5  ;;  %v2284_v9 = vadd.f32 %v2283_v8, %v1994_v6 }
 0x27c   : > { %v1996_v10 = vpop.f32.mrf.mxu0  ;;  %v2285_v11 = vpop.f32.mrf.mxu1 }
 0x27d   : > { %v2358_v12 = vadd.f32 %v2284_v9, %v692_v7 }
 0x27e   : > { %v1997_v13 = vpop.f32.mrf.mxu0  ;;  %v2286_v15 = vpop.f32.mrf.mxu1 }
 0x27f   : > { %2422 = vst [vmem:[#allocation2 + $0x158] sm:$0xff] %v2358_v12  ;;  %v2287_v16 = vadd.f32 %v2286_v15, %v1997_v13 }
 0x280   : > { %v1999_v17 = vpop.f32.mrf.mxu0  ;;  %v2288_v18 = vpop.f32.mrf.mxu1 }
 0x281   : > { %v2359_v19 = vadd.f32 %v2287_v16, %v693_v14 }
 0x282   : > { %v2002_v20 = vpop.f32.mrf.mxu0  ;;  %v2291_v22 = vpop.f32.mrf.mxu1 }
 0x283   : > { %2423 = vst [vmem:[#allocation2 + $0x10] sm:$0xff] %v2359_v19  ;;  %v2292_v23 = vadd.f32 %v2291_v22, %v2002_v20 }
 0x284   : > { %v2004_v24 = vpop.f32.mrf.mxu0  ;;  %v2293_v25 = vpop.f32.mrf.mxu1 }
 0x285   : > { %v2360_v26 = vadd.f32 %v2292_v23, %v694_v21 }
 0x286   : > { %v2005_v27 = vpop.f32.mrf.mxu0  ;;  %v2294_v29 = vpop.f32.mrf.mxu1 }
 0x287   : > { %2424 = vst [vmem:[#allocation2 + $0x58] sm:$0xff] %v2360_v26  ;;  %v2295_v30 = vadd.f32 %v2294_v29, %v2005_v27  ;;  %2429 = sbr.rel (%p3437_p13) target bundleno = 948 (0x3b4), region = 71 }
 0x288   : > { %v2007_v31 = vpop.f32.mrf.mxu0  ;;  %v2296_v32 = vpop.f32.mrf.mxu1 }
 0x289   : > { %v2361_v33 = vadd.f32 %v2295_v30, %v695_v28 }
 0x28b   : > { %2425 = vst [vmem:[#allocation2 + $0xa0] sm:$0xff] %v2361_v33 }
 0x28c   : > { %v2509_v34 = vld [vmem:[%s4921_s3 + $0x78] sm:$0xff]  ;;  %v2508_v35 = vld [vmem:[%s4921_s3 + $0x70] sm:$0xff]  ;;  %v2507_v36 = vld [vmem:[%s4921_s3 + $0x68] sm:$0xff] }
 0x28d   : > { %3522 = vmatprep.subr.mxu0 %v2509_v34  ;;  %3650 = vmatprep.subr.mxu1 %v2509_v34  ;;  %v2506_v37 = vld [vmem:[%s4921_s3 + $0x60] sm:$0xff]  ;;  %v2505_v38 = vld [vmem:[%s4921_s3 + $0x58] sm:$0xff]  ;;  %v2504_v39 = vld [vmem:[%s4921_s3 + $0x50] sm:$0xff] }
 0x28e   : > { %3523 = vmatpush3.msra.mxu0 %v2509_v34  ;;  %3666 = vmatpush3.msra.mxu1 %v2509_v34  ;;  %v2503_v40 = vld [vmem:[%s4921_s3 + $0x48] sm:$0xff]  ;;  %v2502_v41 = vld [vmem:[%s4921_s3 + $0x40] sm:$0xff]  ;;  %v2501_v42 = vld [vmem:[%s4921_s3 + $0x38] sm:$0xff] }
 0x28f   : > { %3524 = vmatprep.subr.mxu0 %v2508_v35  ;;  %3651 = vmatprep.subr.mxu1 %v2508_v35  ;;  %v2500_v43 = vld [vmem:[%s4921_s3 + $0x30] sm:$0xff]  ;;  %v2499_v44 = vld [vmem:[%s4921_s3 + $0x28] sm:$0xff]  ;;  %v2498_v45 = vld [vmem:[%s4921_s3 + $0x20] sm:$0xff] }
 0x290   : > { %3525 = vmatpush3.msra.mxu0 %v2508_v35  ;;  %3667 = vmatpush3.msra.mxu1 %v2508_v35  ;;  %v2497_v46 = vld [vmem:[%s4921_s3 + $0x18] sm:$0xff]  ;;  %v2496_v47 = vld [vmem:[%s4921_s3 + $0x10] sm:$0xff]  ;;  %v2495_v48 = vld [vmem:[%s4921_s3 + $0x8] sm:$0xff] }
 0x291   : > { %3526 = vmatprep.subr.mxu0 %v2507_v36  ;;  %3652 = vmatprep.subr.mxu1 %v2507_v36  ;;  %v2494_v49 = vld [vmem:[%s4921_s3] sm:$0xff]  ;;  %v2430_v50 = vld [vmem:[#allocation2 + $0xb0] sm:$0xff]  ;;  %v2462_v51 = vld [vmem:[#allocation2 + $0x148] sm:$0xff] }
 0x292   : > { %3527 = vmatpush3.msra.mxu0 %v2507_v36  ;;  %3668 = vmatpush3.msra.mxu1 %v2507_v36  ;;  %v2431_v52 = vld [vmem:[#allocation2 + $0x1b0] sm:$0xff]  ;;  %v2432_v54 = vld [vmem:[#allocation2 + $0xd8] sm:$0xff]  ;;  %v2464_v55 = vld [vmem:[#allocation2 + $0x100] sm:$0xff] }
 0x293   : > { %3528 = vmatprep.subr.mxu0 %v2506_v37  ;;  %3653 = vmatprep.subr.mxu1 %v2506_v37  ;;  %v2463_v53 = vld [vmem:[#allocation2 + $0x1d0] sm:$0xff]  ;;  %v2433_v56 = vld [vmem:[#allocation2 + $0x18] sm:$0xff]  ;;  %v2465_v57 = vld [vmem:[#allocation2 + $0xc8] sm:$0xff] }
 0x294   : > { %3529 = vmatpush3.msra.mxu0 %v2506_v37  ;;  %3669 = vmatpush3.msra.mxu1 %v2506_v37  ;;  %v2434_v58 = vld [vmem:[#allocation2 + $0x50] sm:$0xff]  ;;  %v2466_v59 = vld [vmem:[#allocation2 + $0x40] sm:$0xff]  ;;  %v2435_v60 = vld [vmem:[#allocation2 + $0x168] sm:$0xff] }
 0x295   : > { %3530 = vmatprep.subr.mxu0 %v2505_v38  ;;  %3654 = vmatprep.subr.mxu1 %v2505_v38  ;;  %v2467_v61 = vld [vmem:[#allocation2 + $0x1f8] sm:$0xff]  ;;  %v2436_v62 = vld [vmem:[#allocation2 + $0x130] sm:$0xff]  ;;  %v2468_v63 = vld [vmem:[#allocation2 + $0x20] sm:$0xff] }
 0x296   : > { %3531 = vmatpush3.msra.mxu0 %v2505_v38  ;;  %3670 = vmatpush3.msra.mxu1 %v2505_v38  ;;  %v2437_v0 = vld [vmem:[#allocation2 + $0x48] sm:$0xff]  ;;  %v2438_v2 = vld [vmem:[#allocation2 + $0x180] sm:$0xff]  ;;  %v2439_v4 = vld [vmem:[#allocation2 + $0x110] sm:$0xff] }
 0x297   : > { %3532 = vmatprep.subr.mxu0 %v2504_v39  ;;  %3655 = vmatprep.subr.mxu1 %v2504_v39  ;;  %v2469_v1 = vld [vmem:[#allocation2 + $0x128] sm:$0xff]  ;;  %v2470_v3 = vld [vmem:[#allocation2 + $0x1a0] sm:$0xff]  ;;  %v2471_v5 = vld [vmem:[#allocation2 + $0x1f0] sm:$0xff] }
 0x298   : > { %3533 = vmatpush3.msra.mxu0 %v2504_v39  ;;  %3671 = vmatpush3.msra.mxu1 %v2504_v39  ;;  %v2440_v6 = vld [vmem:[#allocation2 + $0x118] sm:$0xff]  ;;  %v2472_v7 = vld [vmem:[#allocation2 + $0xe8] sm:$0xff]  ;;  %v2442_v10 = vld [vmem:[#allocation2 + $0x120] sm:$0xff] }
 0x299   : > { %3534 = vmatprep.subr.mxu0 %v2503_v40  ;;  %3656 = vmatprep.subr.mxu1 %v2503_v40  ;;  %v2441_v8 = vld [vmem:[#allocation2 + $0x98] sm:$0xff]  ;;  %v2474_v11 = vld [vmem:[#allocation2 + $0x70] sm:$0xff]  ;;  %v2444_v14 = vld [vmem:[#allocation2 + $0x108] sm:$0xff] }
 0x29a   : > { %3535 = vmatpush3.msra.mxu0 %v2503_v40  ;;  %3672 = vmatpush3.msra.mxu1 %v2503_v40  ;;  %v2473_v9 = vld [vmem:[#allocation2 + $0x78] sm:$0xff]  ;;  %v2443_v12 = vld [vmem:[#allocation2 + $0x150] sm:$0xff]  ;;  %v2445_v16 = vld [vmem:[#allocation2 + $0x60] sm:$0xff] }
 0x29b   : > { %3536 = vmatprep.subr.mxu0 %v2502_v41  ;;  %3657 = vmatprep.subr.mxu1 %v2502_v41  ;;  %v2475_v13 = vld [vmem:[#allocation2 + $0x90] sm:$0xff]  ;;  %v2476_v15 = vld [vmem:[#allocation2 + $0x1d8] sm:$0xff]  ;;  %v2446_v18 = vld [vmem:[#allocation2 + $0xe0] sm:$0xff] }
 0x29c   : > { %3537 = vmatpush3.msra.mxu0 %v2502_v41  ;;  %3673 = vmatpush3.msra.mxu1 %v2502_v41  ;;  %v2477_v17 = vld [vmem:[#allocation2 + $0xd0] sm:$0xff]  ;;  %v2478_v19 = vld [vmem:[#allocation2 + $0xb8] sm:$0xff]  ;;  %v2447_v20 = vld [vmem:[#allocation2 + $0x188] sm:$0xff] }
 0x29d   : > { %3538 = vmatprep.subr.mxu0 %v2501_v42  ;;  %3658 = vmatprep.subr.mxu1 %v2501_v42  ;;  %v2479_v21 = vld [vmem:[#allocation2 + $0x88] sm:$0xff]  ;;  %v2448_v22 = vld [vmem:[#allocation2 + $0x138] sm:$0xff]  ;;  %v2449_v24 = vld [vmem:[#allocation2 + $0x140] sm:$0xff] }
 0x29e   : > { %3539 = vmatpush3.msra.mxu0 %v2501_v42  ;;  %3674 = vmatpush3.msra.mxu1 %v2501_v42  ;;  %v2480_v23 = vld [vmem:[#allocation2 + $0xa8] sm:$0xff]  ;;  %v2450_v26 = vld [vmem:[#allocation2 + $0x80] sm:$0xff]  ;;  %v2482_v27 = vld [vmem:[#allocation2 + $0x170] sm:$0xff] }
 0x29f   : > { %3540 = vmatprep.subr.mxu0 %v2500_v43  ;;  %3659 = vmatprep.subr.mxu1 %v2500_v43  ;;  %v2481_v25 = vld [vmem:[#allocation2 + $0x1c8] sm:$0xff]  ;;  %v2483_v29 = vld [vmem:[#allocation2 + $0x178] sm:$0xff]  ;;  %v2485_v33 = vld [vmem:[#allocation2 + $0x190] sm:$0xff] }
 0x2a0   : > { %3541 = vmatpush3.msra.mxu0 %v2500_v43  ;;  %3675 = vmatpush3.msra.mxu1 %v2500_v43  ;;  %v2451_v28 = vld [vmem:[#allocation2 + $0x1a8] sm:$0xff]  ;;  %v2452_v30 = vld [vmem:[#allocation2 + $0x1b8] sm:$0xff]  ;;  %v2456_v38 = vld [vmem:[#allocation2 + $0x160] sm:$0xff] }
 0x2a1   : > { %3542 = vmatprep.subr.mxu0 %v2499_v44  ;;  %3660 = vmatprep.subr.mxu1 %v2499_v44  ;;  %v2484_v31 = vld [vmem:[#allocation2 + $0x68] sm:$0xff]  ;;  %v2486_v35 = vld [vmem:[#allocation2 + $0x198] sm:$0xff]  ;;  %v2488_v39 = vld [vmem:[#allocation2 + $0xc0] sm:$0xff] }
 0x2a2   : > { %3543 = vmatpush3.msra.mxu0 %v2499_v44  ;;  %3676 = vmatpush3.msra.mxu1 %v2499_v44  ;;  %v2453_v32 = vld [vmem:[#allocation2 + $0x28] sm:$0xff]  ;;  %v2455_v36 = vld [vmem:[#allocation2 + $0xf8] sm:$0xff]  ;;  %v2457_v40 = vld [vmem:[#allocation2 + $0x30] sm:$0xff] }
 0x2a3   : > { %3544 = vmatprep.subr.mxu0 %v2498_v45  ;;  %3661 = vmatprep.subr.mxu1 %v2498_v45  ;;  %v2454_v34 = vld [vmem:[#allocation2 + $0x1e8] sm:$0xff]  ;;  %v2487_v37 = vld [vmem:[#allocation2 + $0x38] sm:$0xff]  ;;  %v2489_v41 = vld [vmem:[#allocation2 + $0x1c0] sm:$0xff] }
 0x2a4   : > { %3545 = vmatpush3.msra.mxu0 %v2498_v45  ;;  %3677 = vmatpush3.msra.mxu1 %v2498_v45  ;;  %v2458_v42 = vld [vmem:[#allocation2 + $0x1e0] sm:$0xff]  ;;  %v2490_v43 = vld [vmem:[#allocation2 + $0x158] sm:$0xff]  ;;  %v2491_v45 = vld [vmem:[#allocation2 + $0x10] sm:$0xff] }
 0x2a5   : > { %3546 = vmatprep.subr.mxu0 %v2497_v46  ;;  %3662 = vmatprep.subr.mxu1 %v2497_v46  ;;  %v2459_v44 = vld [vmem:[#allocation2] sm:$0xff] }
 0x2a6   : > { %3547 = vmatpush3.msra.mxu0 %v2497_v46  ;;  %3678 = vmatpush3.msra.mxu1 %v2497_v46  ;;  %v2460_v46 = vld [vmem:[#allocation2 + $0xf0] sm:$0xff] }
 0x2a7   : > { %3548 = vmatprep.subr.mxu0 %v2496_v47  ;;  %3663 = vmatprep.subr.mxu1 %v2496_v47 }
 0x2a8   : > { %3549 = vmatpush3.msra.mxu0 %v2496_v47  ;;  %3679 = vmatpush3.msra.mxu1 %v2496_v47  ;;  %v2492_v47 = vld [vmem:[#allocation2 + $0x58] sm:$0xff] }
 0x2a9   : > { %3550 = vmatprep.subr.mxu0 %v2495_v48  ;;  %3664 = vmatprep.subr.mxu1 %v2495_v48 }
 0x2aa   : > { %3551 = vmatpush3.msra.mxu0 %v2495_v48  ;;  %3680 = vmatpush3.msra.mxu1 %v2495_v48  ;;  %v2461_v48 = vld [vmem:[#allocation2 + $0x8] sm:$0xff] }
 0x2ab   : > { %3552 = vmatprep.subr.mxu0 %v2494_v49  ;;  %3665 = vmatprep.subr.mxu1 %v2494_v49 }
 0x2ac   : > { %3553 = vmatpush3.msra.mxu0 %v2494_v49  ;;  %3681 = vmatpush3.msra.mxu1 %v2494_v49  ;;  %v2493_v49 = vld [vmem:[#allocation2 + $0xa0] sm:$0xff] }
 0x2ad   : > { %3554 = vmatprep.mubr.f32.mxu0 %v2430_v50  ;;  %3602 = vmatprep.mubr.f32.mxu1 %v2462_v51  ;;  %v4703_v50 = vld [vmem:[%s4922_s4] ss:$0 sm:$0xff] }
 0x2ae   : > { %3555 = vmatmul.mubr.f32.vlgmr.msra.gmra.mxu0 %v2431_v52  ;;  %3603 = vmatmul.mubr.f32.vlgmr.msra.gmra.mxu1 %v2463_v53 }
 0x2af   : > { %3557 = vmatprep.mubr.f32.mxu0 %v2432_v54  ;;  %3605 = vmatprep.mubr.f32.mxu1 %v2464_v55  ;;  %v2967_v55 = vld [vmem:[%s4385_s13 + $0x8] sm:$0xff] }
 0x2b2   : > { %3558 = vmatmul.mubr.f32.gmra.mxu0 %v2433_v56  ;;  %3606 = vmatmul.mubr.f32.gmra.mxu1 %v2465_v57  ;;  %v2999_v56 = vld [vmem:[%s4385_s13 + $0x108] sm:$0xff] }
 0x2b3   : > { %3560 = vmatprep.mubr.f32.mxu0 %v2434_v58  ;;  %3608 = vmatprep.mubr.f32.mxu1 %v2466_v59 }
 0x2b6   : > { %3561 = vmatmul.mubr.f32.gmra.mxu0 %v2435_v60  ;;  %3609 = vmatmul.mubr.f32.gmra.mxu1 %v2467_v61 }
 0x2b7   : > { %3563 = vmatprep.mubr.f32.mxu0 %v2436_v62  ;;  %3611 = vmatprep.mubr.f32.mxu1 %v2468_v63  ;;  %v2966_v63 = vld [vmem:[%s4385_s13] sm:$0xff] }
 0x2ba   : > { %3564 = vmatmul.mubr.f32.gmra.mxu0 %v2437_v0  ;;  %3612 = vmatmul.mubr.f32.gmra.mxu1 %v2469_v1  ;;  %v2998_v0 = vld [vmem:[%s4385_s13 + $0x100] sm:$0xff] }
 0x2bb   : > { %3566 = vmatprep.mubr.f32.mxu0 %v2438_v2  ;;  %3614 = vmatprep.mubr.f32.mxu1 %v2470_v3 }
 0x2be   : > { %3567 = vmatmul.mubr.f32.gmra.mxu0 %v2439_v4  ;;  %3615 = vmatmul.mubr.f32.gmra.mxu1 %v2471_v5 }
 0x2bf   : > { %3569 = vmatprep.mubr.f32.mxu0 %v2440_v6  ;;  %3617 = vmatprep.mubr.f32.mxu1 %v2472_v7 }
 0x2c2   : > { %3570 = vmatmul.mubr.f32.gmra.mxu0 %v2441_v8  ;;  %3618 = vmatmul.mubr.f32.gmra.mxu1 %v2473_v9 }
 0x2c3   : > { %3572 = vmatprep.mubr.f32.mxu0 %v2442_v10  ;;  %3620 = vmatprep.mubr.f32.mxu1 %v2474_v11 }
 0x2c6   : > { %3573 = vmatmul.mubr.f32.gmra.mxu0 %v2443_v12  ;;  %3621 = vmatmul.mubr.f32.gmra.mxu1 %v2475_v13  ;;  %v2969_v13 = vld [vmem:[%s4385_s13 + $0x18] sm:$0xff] }
 0x2c7   : > { %3575 = vmatprep.mubr.f32.mxu0 %v2444_v14  ;;  %3623 = vmatprep.mubr.f32.mxu1 %v2476_v15  ;;  %v3001_v14 = vld [vmem:[%s4385_s13 + $0x118] sm:$0xff] }
 0x2ca   : > { %3576 = vmatmul.mubr.f32.gmra.mxu0 %v2445_v16  ;;  %3624 = vmatmul.mubr.f32.gmra.mxu1 %v2477_v17 }
 0x2cb   : > { %3578 = vmatprep.mubr.f32.mxu0 %v2446_v18  ;;  %3626 = vmatprep.mubr.f32.mxu1 %v2478_v19  ;;  %v2968_v19 = vld [vmem:[%s4385_s13 + $0x10] sm:$0xff] }
 0x2ce   : > { %3579 = vmatmul.mubr.f32.gmra.mxu0 %v2447_v20  ;;  %3627 = vmatmul.mubr.f32.gmra.mxu1 %v2479_v21  ;;  %v3000_v20 = vld [vmem:[%s4385_s13 + $0x110] sm:$0xff] }
 0x2cf   : > { %3581 = vmatprep.mubr.f32.mxu0 %v2448_v22  ;;  %3629 = vmatprep.mubr.f32.mxu1 %v2480_v23 }
 0x2d2   : > { %3582 = vmatmul.mubr.f32.gmra.mxu0 %v2449_v24  ;;  %3630 = vmatmul.mubr.f32.gmra.mxu1 %v2481_v25 }
 0x2d3   : > { %3584 = vmatprep.mubr.f32.mxu0 %v2450_v26  ;;  %3632 = vmatprep.mubr.f32.mxu1 %v2482_v27 }
 0x2d6   : > { %3585 = vmatmul.mubr.f32.gmra.mxu0 %v2451_v28  ;;  %3633 = vmatmul.mubr.f32.gmra.mxu1 %v2483_v29  ;;  %v2971_v29 = vld [vmem:[%s4385_s13 + $0x28] sm:$0xff] }
 0x2d7   : > { %3587 = vmatprep.mubr.f32.mxu0 %v2452_v30  ;;  %3635 = vmatprep.mubr.f32.mxu1 %v2484_v31  ;;  %v3003_v30 = vld [vmem:[%s4385_s13 + $0x128] sm:$0xff] }
 0x2da   : > { %3588 = vmatmul.mubr.f32.gmra.mxu0 %v2453_v32  ;;  %3636 = vmatmul.mubr.f32.gmra.mxu1 %v2485_v33 }
 0x2db   : > { %3590 = vmatprep.mubr.f32.mxu0 %v2454_v34  ;;  %3638 = vmatprep.mubr.f32.mxu1 %v2486_v35 }
 0x2de   : > { %3591 = vmatmul.mubr.f32.gmra.mxu0 %v2455_v36  ;;  %3639 = vmatmul.mubr.f32.gmra.mxu1 %v2487_v37 }
 0x2df   : > { %3593 = vmatprep.mubr.f32.mxu0 %v2456_v38  ;;  %3641 = vmatprep.mubr.f32.mxu1 %v2488_v39 }
 0x2e2   : > { %3594 = vmatmul.mubr.f32.gmra.mxu0 %v2457_v40  ;;  %3642 = vmatmul.mubr.f32.gmra.mxu1 %v2489_v41 }
 0x2e3   : > { %3596 = vmatprep.mubr.f32.mxu0 %v2458_v42  ;;  %3644 = vmatprep.mubr.f32.mxu1 %v2490_v43  ;;  %v2970_v43 = vld [vmem:[%s4385_s13 + $0x20] sm:$0xff] }
 0x2e6   : > { %3597 = vmatmul.mubr.f32.gmra.mxu0 %v2459_v44  ;;  %3645 = vmatmul.mubr.f32.gmra.mxu1 %v2491_v45  ;;  %v3002_v44 = vld [vmem:[%s4385_s13 + $0x120] sm:$0xff] }
 0x2e7   : > { %3599 = vmatprep.mubr.f32.mxu0 %v2460_v46  ;;  %3647 = vmatprep.mubr.f32.mxu1 %v2492_v47 }
 0x2ea   : > { %3600 = vmatmul.mubr.f32.gmra.mxu0 %v2461_v48  ;;  %3648 = vmatmul.mubr.f32.gmra.mxu1 %v2493_v49  ;;  %v2973_v49 = vld [vmem:[%s4385_s13 + $0x38] sm:$0xff] }
 0x36e   : > { %v3556_v51 = vpop.f32.mrf.mxu0  ;;  %v3604_v52 = vpop.f32.mrf.mxu1 }
 0x36f   : > { %v2589_v53 = vadd.f32 %v3556_v51, %v4703_v50  ;;  %v2749_v54 = vadd.f32 %v3604_v52, %v4703_v50  ;;  %v3005_v51 = vld [vmem:[%s4385_s13 + $0x138] sm:$0xff] }
 0x370   : > { %v2583_v57 = vpop.f32.mrf.mxu0  ;;  %v2743_v58 = vpop.f32.mrf.mxu1 }
 0x371   : > { %v2903_v59 = vmax.f32 %v2589_v53, 0.0  ;;  %v2935_v60 = vmax.f32 %v2749_v54, 0.0  ;;  %v2584_v61 = vadd.f32 %v4703_v50, %v2583_v57  ;;  %v2744_v62 = vadd.f32 %v4703_v50, %v2743_v58 }
 0x372   : > { %v3559_v1 = vpop.f32.mrf.mxu0  ;;  %v3607_v2 = vpop.f32.mrf.mxu1 }
 0x373   : > { %v3031_v3 = vadd.f32 %v2967_v55, %v2903_v59  ;;  %v3063_v4 = vadd.f32 %v2999_v56, %v2935_v60  ;;  %v2902_v5 = vmax.f32 %v2584_v61, 0.0  ;;  %v2934_v6 = vmax.f32 %v2744_v62, 0.0  ;;  %v2972_v60 = vld [vmem:[%s4385_s13 + $0x30] sm:$0xff] }
 0x374   : > { %v2599_v7 = vadd.f32 %v3559_v1, %v4703_v50  ;;  %v2759_v8 = vadd.f32 %v3607_v2, %v4703_v50  ;;  %v2593_v9 = vpop.f32.mrf.mxu0  ;;  %v2753_v10 = vpop.f32.mrf.mxu1  ;;  %v3004_v61 = vld [vmem:[%s4385_s13 + $0x130] sm:$0xff] }
 0x375   : > { %3095 = vst [vmem:[%s4390_s15 + $0x8] sm:$0xff] %v3031_v3  ;;  %3127 = vst [vmem:[%s4390_s15 + $0x108] sm:$0xff] %v3063_v4  ;;  %v3030_v11 = vadd.f32 %v2966_v63, %v2902_v5  ;;  %v3062_v12 = vadd.f32 %v2998_v0, %v2934_v6  ;;  %v2594_v15 = vadd.f32 %v4703_v50, %v2593_v9 }
 0x376   : > { %v2754_v16 = vadd.f32 %v4703_v50, %v2753_v10  ;;  %v2905_v17 = vmax.f32 %v2599_v7, 0.0  ;;  %v2937_v18 = vmax.f32 %v2759_v8, 0.0  ;;  %v3562_v21 = vpop.f32.mrf.mxu0  ;;  %v3610_v22 = vpop.f32.mrf.mxu1  ;;  %v2975_v10 = vld [vmem:[%s4385_s13 + $0x48] sm:$0xff] }
 0x377   : > { %3094 = vst [vmem:[%s4390_s15] sm:$0xff] %v3030_v11  ;;  %3126 = vst [vmem:[%s4390_s15 + $0x100] sm:$0xff] %v3062_v12  ;;  %v2904_v23 = vmax.f32 %v2594_v15, 0.0  ;;  %v2609_v25 = vadd.f32 %v3562_v21, %v4703_v50  ;;  %v2769_v26 = vadd.f32 %v3610_v22, %v4703_v50  ;;  %v3007_v11 = vld [vmem:[%s4385_s13 + $0x148] sm:$0xff] }
 0x378   : > { %v2936_v24 = vmax.f32 %v2754_v16, 0.0  ;;  %v3033_v27 = vadd.f32 %v2969_v13, %v2905_v17  ;;  %v3065_v28 = vadd.f32 %v3001_v14, %v2937_v18  ;;  %v2603_v31 = vpop.f32.mrf.mxu0  ;;  %v2763_v32 = vpop.f32.mrf.mxu1  ;;  %v2974_v16 = vld [vmem:[%s4385_s13 + $0x40] sm:$0xff] }
 0x379   : > { %v3032_v33 = vadd.f32 %v2968_v19, %v2904_v23  ;;  %v2907_v35 = vmax.f32 %v2609_v25, 0.0  ;;  %v2939_v36 = vmax.f32 %v2769_v26, 0.0  ;;  %v2604_v37 = vadd.f32 %v4703_v50, %v2603_v31  ;;  %v3006_v17 = vld [vmem:[%s4385_s13 + $0x140] sm:$0xff]  ;;  %v2977_v26 = vld [vmem:[%s4385_s13 + $0x58] sm:$0xff] }
 0x37a   : > { %v3064_v34 = vadd.f32 %v3000_v20, %v2936_v24  ;;  %3097 = vst [vmem:[%s4390_s15 + $0x18] sm:$0xff] %v3033_v27  ;;  %3129 = vst [vmem:[%s4390_s15 + $0x118] sm:$0xff] %v3065_v28  ;;  %v2764_v38 = vadd.f32 %v4703_v50, %v2763_v32  ;;  %v3565_v39 = vpop.f32.mrf.mxu0  ;;  %v3613_v40 = vpop.f32.mrf.mxu1  ;;  %v3009_v27 = vld [vmem:[%s4385_s13 + $0x158] sm:$0xff] }
 0x37b   : > { %3096 = vst [vmem:[%s4390_s15 + $0x10] sm:$0xff] %v3032_v33  ;;  %v3035_v41 = vadd.f32 %v2971_v29, %v2907_v35  ;;  %v3067_v42 = vadd.f32 %v3003_v30, %v2939_v36  ;;  %v2619_v45 = vadd.f32 %v3565_v39, %v4703_v50  ;;  %v2779_v46 = vadd.f32 %v3613_v40, %v4703_v50  ;;  %v2976_v40 = vld [vmem:[%s4385_s13 + $0x50] sm:$0xff] }
 0x37c   : > { %3128 = vst [vmem:[%s4390_s15 + $0x110] sm:$0xff] %v3064_v34  ;;  %v2906_v47 = vmax.f32 %v2604_v37, 0.0  ;;  %v2938_v48 = vmax.f32 %v2764_v38, 0.0  ;;  %v2613_v52 = vpop.f32.mrf.mxu0  ;;  %v2773_v53 = vpop.f32.mrf.mxu1 }
 0x37d   : > { %3099 = vst [vmem:[%s4390_s15 + $0x28] sm:$0xff] %v3035_v41  ;;  %3131 = vst [vmem:[%s4390_s15 + $0x128] sm:$0xff] %v3067_v42  ;;  %v2909_v54 = vmax.f32 %v2619_v45, 0.0  ;;  %v2941_v55 = vmax.f32 %v2779_v46, 0.0  ;;  %v2614_v56 = vadd.f32 %v4703_v50, %v2613_v52  ;;  %v2774_v57 = vadd.f32 %v4703_v50, %v2773_v53  ;;  %v3008_v41 = vld [vmem:[%s4385_s13 + $0x150] sm:$0xff]  ;;  %v2979_v46 = vld [vmem:[%s4385_s13 + $0x68] sm:$0xff] }
 0x37e   : > { %v3034_v58 = vadd.f32 %v2970_v43, %v2906_v47  ;;  %v3066_v59 = vadd.f32 %v3002_v44, %v2938_v48  ;;  %v3568_v62 = vpop.f32.mrf.mxu0  ;;  %v3616_v63 = vpop.f32.mrf.mxu1  ;;  %v3011_v47 = vld [vmem:[%s4385_s13 + $0x168] sm:$0xff] }
 0x37f   : > { %v3037_v0 = vadd.f32 %v2973_v49, %v2909_v54  ;;  %v3069_v1 = vadd.f32 %v3005_v51, %v2941_v55  ;;  %v2908_v2 = vmax.f32 %v2614_v56, 0.0  ;;  %v2940_v3 = vmax.f32 %v2774_v57, 0.0  ;;  %v2978_v57 = vld [vmem:[%s4385_s13 + $0x60] sm:$0xff] }
 0x380   : > { %3098 = vst [vmem:[%s4390_s15 + $0x20] sm:$0xff] %v3034_v58  ;;  %3130 = vst [vmem:[%s4390_s15 + $0x120] sm:$0xff] %v3066_v59  ;;  %v2629_v4 = vadd.f32 %v3568_v62, %v4703_v50  ;;  %v2789_v5 = vadd.f32 %v3616_v63, %v4703_v50  ;;  %v2623_v6 = vpop.f32.mrf.mxu0  ;;  %v2783_v7 = vpop.f32.mrf.mxu1  ;;  %v3010_v58 = vld [vmem:[%s4385_s13 + $0x160] sm:$0xff] }
 0x381   : > { %3101 = vst [vmem:[%s4390_s15 + $0x38] sm:$0xff] %v3037_v0  ;;  %3133 = vst [vmem:[%s4390_s15 + $0x138] sm:$0xff] %v3069_v1  ;;  %v3036_v8 = vadd.f32 %v2972_v60, %v2908_v2  ;;  %v3068_v9 = vadd.f32 %v3004_v61, %v2940_v3  ;;  %v2624_v12 = vadd.f32 %v4703_v50, %v2623_v6 }
 0x382   : > { %v2784_v13 = vadd.f32 %v4703_v50, %v2783_v7  ;;  %v2911_v14 = vmax.f32 %v2629_v4, 0.0  ;;  %v2943_v15 = vmax.f32 %v2789_v5, 0.0  ;;  %v3571_v18 = vpop.f32.mrf.mxu0  ;;  %v3619_v19 = vpop.f32.mrf.mxu1  ;;  %v2981_v7 = vld [vmem:[%s4385_s13 + $0x78] sm:$0xff] }
 0x383   : > { %3100 = vst [vmem:[%s4390_s15 + $0x30] sm:$0xff] %v3036_v8  ;;  %3132 = vst [vmem:[%s4390_s15 + $0x130] sm:$0xff] %v3068_v9  ;;  %v2910_v20 = vmax.f32 %v2624_v12, 0.0  ;;  %v2639_v22 = vadd.f32 %v3571_v18, %v4703_v50  ;;  %v2799_v23 = vadd.f32 %v3619_v19, %v4703_v50  ;;  %v3013_v8 = vld [vmem:[%s4385_s13 + $0x178] sm:$0xff] }
 0x384   : > { %v2942_v21 = vmax.f32 %v2784_v13, 0.0  ;;  %v3039_v24 = vadd.f32 %v2975_v10, %v2911_v14  ;;  %v3071_v25 = vadd.f32 %v3007_v11, %v2943_v15  ;;  %v2633_v28 = vpop.f32.mrf.mxu0  ;;  %v2793_v29 = vpop.f32.mrf.mxu1  ;;  %v2980_v13 = vld [vmem:[%s4385_s13 + $0x70] sm:$0xff] }
 0x385   : > { %v3038_v30 = vadd.f32 %v2974_v16, %v2910_v20  ;;  %v2913_v32 = vmax.f32 %v2639_v22, 0.0  ;;  %v2945_v33 = vmax.f32 %v2799_v23, 0.0  ;;  %v2634_v34 = vadd.f32 %v4703_v50, %v2633_v28  ;;  %v3012_v14 = vld [vmem:[%s4385_s13 + $0x170] sm:$0xff]  ;;  %v2983_v23 = vld [vmem:[%s4385_s13 + $0x88] sm:$0xff] }
 0x386   : > { %v3070_v31 = vadd.f32 %v3006_v17, %v2942_v21  ;;  %3103 = vst [vmem:[%s4390_s15 + $0x48] sm:$0xff] %v3039_v24  ;;  %3135 = vst [vmem:[%s4390_s15 + $0x148] sm:$0xff] %v3071_v25  ;;  %v2794_v35 = vadd.f32 %v4703_v50, %v2793_v29  ;;  %v3574_v36 = vpop.f32.mrf.mxu0  ;;  %v3622_v37 = vpop.f32.mrf.mxu1  ;;  %v3015_v24 = vld [vmem:[%s4385_s13 + $0x188] sm:$0xff] }
 0x387   : > { %3102 = vst [vmem:[%s4390_s15 + $0x40] sm:$0xff] %v3038_v30  ;;  %v3041_v38 = vadd.f32 %v2977_v26, %v2913_v32  ;;  %v3073_v39 = vadd.f32 %v3009_v27, %v2945_v33  ;;  %v2649_v42 = vadd.f32 %v3574_v36, %v4703_v50  ;;  %v2809_v43 = vadd.f32 %v3622_v37, %v4703_v50  ;;  %v2982_v37 = vld [vmem:[%s4385_s13 + $0x80] sm:$0xff] }
 0x388   : > { %3134 = vst [vmem:[%s4390_s15 + $0x140] sm:$0xff] %v3070_v31  ;;  %v2912_v44 = vmax.f32 %v2634_v34, 0.0  ;;  %v2944_v45 = vmax.f32 %v2794_v35, 0.0  ;;  %v2643_v48 = vpop.f32.mrf.mxu0  ;;  %v2803_v49 = vpop.f32.mrf.mxu1 }
 0x389   : > { %3105 = vst [vmem:[%s4390_s15 + $0x58] sm:$0xff] %v3041_v38  ;;  %3137 = vst [vmem:[%s4390_s15 + $0x158] sm:$0xff] %v3073_v39  ;;  %v2915_v51 = vmax.f32 %v2649_v42, 0.0  ;;  %v2947_v52 = vmax.f32 %v2809_v43, 0.0  ;;  %v2644_v53 = vadd.f32 %v4703_v50, %v2643_v48  ;;  %v2804_v54 = vadd.f32 %v4703_v50, %v2803_v49  ;;  %v3014_v38 = vld [vmem:[%s4385_s13 + $0x180] sm:$0xff]  ;;  %v2985_v43 = vld [vmem:[%s4385_s13 + $0x98] sm:$0xff] }
 0x38a   : > { %v3040_v55 = vadd.f32 %v2976_v40, %v2912_v44  ;;  %v3072_v56 = vadd.f32 %v3008_v41, %v2944_v45  ;;  %v3577_v59 = vpop.f32.mrf.mxu0  ;;  %v3625_v60 = vpop.f32.mrf.mxu1  ;;  %v3017_v44 = vld [vmem:[%s4385_s13 + $0x198] sm:$0xff] }
 0x38b   : > { %v3043_v61 = vadd.f32 %v2979_v46, %v2915_v51  ;;  %v3075_v62 = vadd.f32 %v3011_v47, %v2947_v52  ;;  %v2914_v63 = vmax.f32 %v2644_v53, 0.0  ;;  %v2946_v0 = vmax.f32 %v2804_v54, 0.0  ;;  %v2984_v54 = vld [vmem:[%s4385_s13 + $0x90] sm:$0xff] }
 0x38c   : > { %3104 = vst [vmem:[%s4390_s15 + $0x50] sm:$0xff] %v3040_v55  ;;  %3136 = vst [vmem:[%s4390_s15 + $0x150] sm:$0xff] %v3072_v56  ;;  %v2659_v1 = vadd.f32 %v3577_v59, %v4703_v50  ;;  %v2819_v2 = vadd.f32 %v3625_v60, %v4703_v50  ;;  %v2653_v3 = vpop.f32.mrf.mxu0  ;;  %v2813_v4 = vpop.f32.mrf.mxu1  ;;  %v3016_v55 = vld [vmem:[%s4385_s13 + $0x190] sm:$0xff] }
 0x38d   : > { %3107 = vst [vmem:[%s4390_s15 + $0x68] sm:$0xff] %v3043_v61  ;;  %3139 = vst [vmem:[%s4390_s15 + $0x168] sm:$0xff] %v3075_v62  ;;  %v3042_v5 = vadd.f32 %v2978_v57, %v2914_v63  ;;  %v3074_v6 = vadd.f32 %v3010_v58, %v2946_v0  ;;  %v2654_v9 = vadd.f32 %v4703_v50, %v2653_v3 }
 0x38e   : > { %v2814_v10 = vadd.f32 %v4703_v50, %v2813_v4  ;;  %v2917_v11 = vmax.f32 %v2659_v1, 0.0  ;;  %v2949_v12 = vmax.f32 %v2819_v2, 0.0  ;;  %v3580_v15 = vpop.f32.mrf.mxu0  ;;  %v3628_v16 = vpop.f32.mrf.mxu1  ;;  %v2987_v4 = vld [vmem:[%s4385_s13 + $0xa8] sm:$0xff] }
 0x38f   : > { %3106 = vst [vmem:[%s4390_s15 + $0x60] sm:$0xff] %v3042_v5  ;;  %3138 = vst [vmem:[%s4390_s15 + $0x160] sm:$0xff] %v3074_v6  ;;  %v2916_v17 = vmax.f32 %v2654_v9, 0.0  ;;  %v2669_v19 = vadd.f32 %v3580_v15, %v4703_v50  ;;  %v2829_v20 = vadd.f32 %v3628_v16, %v4703_v50  ;;  %v3019_v5 = vld [vmem:[%s4385_s13 + $0x1a8] sm:$0xff] }
 0x390   : > { %v2948_v18 = vmax.f32 %v2814_v10, 0.0  ;;  %v3045_v21 = vadd.f32 %v2981_v7, %v2917_v11  ;;  %v3077_v22 = vadd.f32 %v3013_v8, %v2949_v12  ;;  %v2663_v25 = vpop.f32.mrf.mxu0  ;;  %v2823_v26 = vpop.f32.mrf.mxu1  ;;  %v2986_v10 = vld [vmem:[%s4385_s13 + $0xa0] sm:$0xff] }
 0x391   : > { %v3044_v27 = vadd.f32 %v2980_v13, %v2916_v17  ;;  %v2919_v29 = vmax.f32 %v2669_v19, 0.0  ;;  %v2951_v30 = vmax.f32 %v2829_v20, 0.0  ;;  %v2664_v31 = vadd.f32 %v4703_v50, %v2663_v25  ;;  %v3018_v11 = vld [vmem:[%s4385_s13 + $0x1a0] sm:$0xff]  ;;  %v2989_v20 = vld [vmem:[%s4385_s13 + $0xb8] sm:$0xff] }
 0x392   : > { %v3076_v28 = vadd.f32 %v3012_v14, %v2948_v18  ;;  %3109 = vst [vmem:[%s4390_s15 + $0x78] sm:$0xff] %v3045_v21  ;;  %3141 = vst [vmem:[%s4390_s15 + $0x178] sm:$0xff] %v3077_v22  ;;  %v2824_v32 = vadd.f32 %v4703_v50, %v2823_v26  ;;  %v3583_v33 = vpop.f32.mrf.mxu0  ;;  %v3631_v34 = vpop.f32.mrf.mxu1  ;;  %v3021_v21 = vld [vmem:[%s4385_s13 + $0x1b8] sm:$0xff] }
 0x393   : > { %3108 = vst [vmem:[%s4390_s15 + $0x70] sm:$0xff] %v3044_v27  ;;  %v3047_v35 = vadd.f32 %v2983_v23, %v2919_v29  ;;  %v3079_v36 = vadd.f32 %v3015_v24, %v2951_v30  ;;  %v2679_v39 = vadd.f32 %v3583_v33, %v4703_v50  ;;  %v2839_v40 = vadd.f32 %v3631_v34, %v4703_v50  ;;  %v2988_v34 = vld [vmem:[%s4385_s13 + $0xb0] sm:$0xff] }
 0x394   : > { %3140 = vst [vmem:[%s4390_s15 + $0x170] sm:$0xff] %v3076_v28  ;;  %v2918_v41 = vmax.f32 %v2664_v31, 0.0  ;;  %v2950_v42 = vmax.f32 %v2824_v32, 0.0  ;;  %v2673_v45 = vpop.f32.mrf.mxu0  ;;  %v2833_v46 = vpop.f32.mrf.mxu1 }
 0x395   : > { %3111 = vst [vmem:[%s4390_s15 + $0x88] sm:$0xff] %v3047_v35  ;;  %3143 = vst [vmem:[%s4390_s15 + $0x188] sm:$0xff] %v3079_v36  ;;  %v2921_v47 = vmax.f32 %v2679_v39, 0.0  ;;  %v2953_v48 = vmax.f32 %v2839_v40, 0.0  ;;  %v2674_v49 = vadd.f32 %v4703_v50, %v2673_v45  ;;  %v2834_v51 = vadd.f32 %v4703_v50, %v2833_v46  ;;  %v3020_v35 = vld [vmem:[%s4385_s13 + $0x1b0] sm:$0xff]  ;;  %v2991_v40 = vld [vmem:[%s4385_s13 + $0xc8] sm:$0xff] }
 0x396   : > { %v3046_v52 = vadd.f32 %v2982_v37, %v2918_v41  ;;  %v3078_v53 = vadd.f32 %v3014_v38, %v2950_v42  ;;  %v3586_v56 = vpop.f32.mrf.mxu0  ;;  %v3634_v57 = vpop.f32.mrf.mxu1  ;;  %v3023_v41 = vld [vmem:[%s4385_s13 + $0x1c8] sm:$0xff] }
 0x397   : > { %v3049_v58 = vadd.f32 %v2985_v43, %v2921_v47  ;;  %v3081_v59 = vadd.f32 %v3017_v44, %v2953_v48  ;;  %v2920_v60 = vmax.f32 %v2674_v49, 0.0  ;;  %v2952_v61 = vmax.f32 %v2834_v51, 0.0  ;;  %v2990_v51 = vld [vmem:[%s4385_s13 + $0xc0] sm:$0xff] }
 0x398   : > { %3110 = vst [vmem:[%s4390_s15 + $0x80] sm:$0xff] %v3046_v52  ;;  %3142 = vst [vmem:[%s4390_s15 + $0x180] sm:$0xff] %v3078_v53  ;;  %v2689_v62 = vadd.f32 %v3586_v56, %v4703_v50  ;;  %v2849_v63 = vadd.f32 %v3634_v57, %v4703_v50  ;;  %v2683_v0 = vpop.f32.mrf.mxu0  ;;  %v2843_v1 = vpop.f32.mrf.mxu1  ;;  %v3022_v52 = vld [vmem:[%s4385_s13 + $0x1c0] sm:$0xff] }
 0x399   : > { %3113 = vst [vmem:[%s4390_s15 + $0x98] sm:$0xff] %v3049_v58  ;;  %3145 = vst [vmem:[%s4390_s15 + $0x198] sm:$0xff] %v3081_v59  ;;  %v3048_v2 = vadd.f32 %v2984_v54, %v2920_v60  ;;  %v3080_v3 = vadd.f32 %v3016_v55, %v2952_v61  ;;  %v2684_v6 = vadd.f32 %v4703_v50, %v2683_v0 }
 0x39a   : > { %v2844_v7 = vadd.f32 %v4703_v50, %v2843_v1  ;;  %v2923_v8 = vmax.f32 %v2689_v62, 0.0  ;;  %v2955_v9 = vmax.f32 %v2849_v63, 0.0  ;;  %v3589_v12 = vpop.f32.mrf.mxu0  ;;  %v3637_v13 = vpop.f32.mrf.mxu1  ;;  %v2993_v1 = vld [vmem:[%s4385_s13 + $0xd8] sm:$0xff] }
 0x39b   : > { %3112 = vst [vmem:[%s4390_s15 + $0x90] sm:$0xff] %v3048_v2  ;;  %3144 = vst [vmem:[%s4390_s15 + $0x190] sm:$0xff] %v3080_v3  ;;  %v2922_v14 = vmax.f32 %v2684_v6, 0.0  ;;  %v2699_v16 = vadd.f32 %v3589_v12, %v4703_v50  ;;  %v2859_v17 = vadd.f32 %v3637_v13, %v4703_v50  ;;  %v3025_v2 = vld [vmem:[%s4385_s13 + $0x1d8] sm:$0xff] }
 0x39c   : > { %v2954_v15 = vmax.f32 %v2844_v7, 0.0  ;;  %v3051_v18 = vadd.f32 %v2987_v4, %v2923_v8  ;;  %v3083_v19 = vadd.f32 %v3019_v5, %v2955_v9  ;;  %v2693_v22 = vpop.f32.mrf.mxu0  ;;  %v2853_v23 = vpop.f32.mrf.mxu1  ;;  %v2992_v7 = vld [vmem:[%s4385_s13 + $0xd0] sm:$0xff] }
 0x39d   : > { %v3050_v24 = vadd.f32 %v2986_v10, %v2922_v14  ;;  %v2925_v26 = vmax.f32 %v2699_v16, 0.0  ;;  %v2957_v27 = vmax.f32 %v2859_v17, 0.0  ;;  %v2694_v28 = vadd.f32 %v4703_v50, %v2693_v22  ;;  %v3024_v8 = vld [vmem:[%s4385_s13 + $0x1d0] sm:$0xff]  ;;  %v2995_v17 = vld [vmem:[%s4385_s13 + $0xe8] sm:$0xff] }
 0x39e   : > { %v3082_v25 = vadd.f32 %v3018_v11, %v2954_v15  ;;  %3115 = vst [vmem:[%s4390_s15 + $0xa8] sm:$0xff] %v3051_v18  ;;  %3147 = vst [vmem:[%s4390_s15 + $0x1a8] sm:$0xff] %v3083_v19  ;;  %v2854_v29 = vadd.f32 %v4703_v50, %v2853_v23  ;;  %v3592_v30 = vpop.f32.mrf.mxu0  ;;  %v3640_v31 = vpop.f32.mrf.mxu1  ;;  %v3027_v18 = vld [vmem:[%s4385_s13 + $0x1e8] sm:$0xff] }
 0x39f   : > { %3114 = vst [vmem:[%s4390_s15 + $0xa0] sm:$0xff] %v3050_v24  ;;  %v3053_v32 = vadd.f32 %v2989_v20, %v2925_v26  ;;  %v3085_v33 = vadd.f32 %v3021_v21, %v2957_v27  ;;  %v2709_v36 = vadd.f32 %v3592_v30, %v4703_v50  ;;  %v2869_v37 = vadd.f32 %v3640_v31, %v4703_v50  ;;  %v2994_v31 = vld [vmem:[%s4385_s13 + $0xe0] sm:$0xff] }
 0x3a0   : > { %3146 = vst [vmem:[%s4390_s15 + $0x1a0] sm:$0xff] %v3082_v25  ;;  %v2924_v38 = vmax.f32 %v2694_v28, 0.0  ;;  %v2956_v39 = vmax.f32 %v2854_v29, 0.0  ;;  %v2703_v42 = vpop.f32.mrf.mxu0  ;;  %v2863_v43 = vpop.f32.mrf.mxu1 }
 0x3a1   : > { %3117 = vst [vmem:[%s4390_s15 + $0xb8] sm:$0xff] %v3053_v32  ;;  %3149 = vst [vmem:[%s4390_s15 + $0x1b8] sm:$0xff] %v3085_v33  ;;  %v2927_v44 = vmax.f32 %v2709_v36, 0.0  ;;  %v2959_v45 = vmax.f32 %v2869_v37, 0.0  ;;  %v2704_v46 = vadd.f32 %v4703_v50, %v2703_v42  ;;  %v2864_v47 = vadd.f32 %v4703_v50, %v2863_v43  ;;  %v3026_v32 = vld [vmem:[%s4385_s13 + $0x1e0] sm:$0xff]  ;;  %v2997_v37 = vld [vmem:[%s4385_s13 + $0xf8] sm:$0xff] }
 0x3a2   : > { %v3052_v48 = vadd.f32 %v2988_v34, %v2924_v38  ;;  %v3084_v49 = vadd.f32 %v3020_v35, %v2956_v39  ;;  %v3595_v53 = vpop.f32.mrf.mxu0  ;;  %v3643_v54 = vpop.f32.mrf.mxu1  ;;  %v3029_v38 = vld [vmem:[%s4385_s13 + $0x1f8] sm:$0xff] }
 0x3a3   : > { %v3055_v55 = vadd.f32 %v2991_v40, %v2927_v44  ;;  %v3087_v56 = vadd.f32 %v3023_v41, %v2959_v45  ;;  %v2926_v57 = vmax.f32 %v2704_v46, 0.0  ;;  %v2958_v58 = vmax.f32 %v2864_v47, 0.0  ;;  %v2996_v47 = vld [vmem:[%s4385_s13 + $0xf0] sm:$0xff] }
 0x3a4   : > { %3116 = vst [vmem:[%s4390_s15 + $0xb0] sm:$0xff] %v3052_v48  ;;  %3148 = vst [vmem:[%s4390_s15 + $0x1b0] sm:$0xff] %v3084_v49  ;;  %v2719_v59 = vadd.f32 %v3595_v53, %v4703_v50  ;;  %v2879_v60 = vadd.f32 %v3643_v54, %v4703_v50  ;;  %v2713_v61 = vpop.f32.mrf.mxu0  ;;  %v2873_v62 = vpop.f32.mrf.mxu1  ;;  %v3028_v48 = vld [vmem:[%s4385_s13 + $0x1f0] sm:$0xff] }
 0x3a5   : > { %3119 = vst [vmem:[%s4390_s15 + $0xc8] sm:$0xff] %v3055_v55  ;;  %3151 = vst [vmem:[%s4390_s15 + $0x1c8] sm:$0xff] %v3087_v56  ;;  %v3054_v63 = vadd.f32 %v2990_v51, %v2926_v57  ;;  %v3086_v0 = vadd.f32 %v3022_v52, %v2958_v58  ;;  %v2714_v3 = vadd.f32 %v4703_v50, %v2713_v61 }
 0x3a6   : > { %v2874_v4 = vadd.f32 %v4703_v50, %v2873_v62  ;;  %v2929_v5 = vmax.f32 %v2719_v59, 0.0  ;;  %v2961_v6 = vmax.f32 %v2879_v60, 0.0  ;;  %v3598_v9 = vpop.f32.mrf.mxu0  ;;  %v3646_v10 = vpop.f32.mrf.mxu1 }
 0x3a7   : > { %3118 = vst [vmem:[%s4390_s15 + $0xc0] sm:$0xff] %v3054_v63  ;;  %3150 = vst [vmem:[%s4390_s15 + $0x1c0] sm:$0xff] %v3086_v0  ;;  %v2928_v11 = vmax.f32 %v2714_v3, 0.0  ;;  %v2729_v13 = vadd.f32 %v3598_v9, %v4703_v50  ;;  %v2889_v14 = vadd.f32 %v3646_v10, %v4703_v50 }
 0x3a8   : > { %v2960_v12 = vmax.f32 %v2874_v4, 0.0  ;;  %v3057_v15 = vadd.f32 %v2993_v1, %v2929_v5  ;;  %v3089_v16 = vadd.f32 %v3025_v2, %v2961_v6  ;;  %v2723_v19 = vpop.f32.mrf.mxu0  ;;  %v2883_v20 = vpop.f32.mrf.mxu1 }
 0x3a9   : > { %v3056_v21 = vadd.f32 %v2992_v7, %v2928_v11  ;;  %v2931_v23 = vmax.f32 %v2729_v13, 0.0  ;;  %v2963_v24 = vmax.f32 %v2889_v14, 0.0  ;;  %v2724_v25 = vadd.f32 %v4703_v50, %v2723_v19 }
 0x3aa   : > { %v3088_v22 = vadd.f32 %v3024_v8, %v2960_v12  ;;  %3121 = vst [vmem:[%s4390_s15 + $0xd8] sm:$0xff] %v3057_v15  ;;  %3153 = vst [vmem:[%s4390_s15 + $0x1d8] sm:$0xff] %v3089_v16  ;;  %v2884_v26 = vadd.f32 %v4703_v50, %v2883_v20  ;;  %v3601_v27 = vpop.f32.mrf.mxu0  ;;  %v3649_v28 = vpop.f32.mrf.mxu1 }
 0x3ab   : > { %3120 = vst [vmem:[%s4390_s15 + $0xd0] sm:$0xff] %v3056_v21  ;;  %v3059_v29 = vadd.f32 %v2995_v17, %v2931_v23  ;;  %v3091_v30 = vadd.f32 %v3027_v18, %v2963_v24  ;;  %v2739_v33 = vadd.f32 %v3601_v27, %v4703_v50  ;;  %v2899_v34 = vadd.f32 %v3649_v28, %v4703_v50 }
 0x3ac   : > { %3152 = vst [vmem:[%s4390_s15 + $0x1d0] sm:$0xff] %v3088_v22  ;;  %v2930_v35 = vmax.f32 %v2724_v25, 0.0  ;;  %v2962_v36 = vmax.f32 %v2884_v26, 0.0  ;;  %v2733_v39 = vpop.f32.mrf.mxu0  ;;  %v2893_v40 = vpop.f32.mrf.mxu1 }
 0x3ad   : > { %3123 = vst [vmem:[%s4390_s15 + $0xe8] sm:$0xff] %v3059_v29  ;;  %3155 = vst [vmem:[%s4390_s15 + $0x1e8] sm:$0xff] %v3091_v30  ;;  %v2933_v41 = vmax.f32 %v2739_v33, 0.0  ;;  %v2965_v42 = vmax.f32 %v2899_v34, 0.0  ;;  %v2734_v43 = vadd.f32 %v4703_v50, %v2733_v39  ;;  %v2894_v44 = vadd.f32 %v4703_v50, %v2893_v40 }
 0x3ae   : > { %v3058_v45 = vadd.f32 %v2994_v31, %v2930_v35  ;;  %v3090_v46 = vadd.f32 %v3026_v32, %v2962_v36 }
 0x3af   : > { %v3061_v49 = vadd.f32 %v2997_v37, %v2933_v41  ;;  %v3093_v51 = vadd.f32 %v3029_v38, %v2965_v42  ;;  %v2932_v52 = vmax.f32 %v2734_v43, 0.0  ;;  %v2964_v53 = vmax.f32 %v2894_v44, 0.0 }
 0x3b0   : > { %3122 = vst [vmem:[%s4390_s15 + $0xe0] sm:$0xff] %v3058_v45  ;;  %3154 = vst [vmem:[%s4390_s15 + $0x1e0] sm:$0xff] %v3090_v46 }
 0x3b1   : > { %3125 = vst [vmem:[%s4390_s15 + $0xf8] sm:$0xff] %v3061_v49  ;;  %3157 = vst [vmem:[%s4390_s15 + $0x1f8] sm:$0xff] %v3093_v51  ;;  %v3060_v54 = vadd.f32 %v2996_v47, %v2932_v52  ;;  %v3092_v55 = vadd.f32 %v3028_v48, %v2964_v53 }
 0x3b3   : > { %3124 = vst [vmem:[%s4390_s15 + $0xf0] sm:$0xff] %v3060_v54  ;;  %3156 = vst [vmem:[%s4390_s15 + $0x1f0] sm:$0xff] %v3092_v55 }
 0x3b4 PF: > { %s15_s24 = sadd.s32 1, %s4018_s24   ;;  %s4924_s18 = smov %s3998_s19 }
 0x3b5   : > { %p12_p0 = scmp.ge.s32.totalorder %s15_s24, 6   ;;  %s4925_s19 = smov %s4103_s6 }
 0x3b6   : > { %s4926_s20 = smov %s4010_s22  ;;  %s4927_s21 = smov %s4014_s23 }
 0x3b7   : > { %s4928_s22 = smov %s4931_s25  ;;  %s4929_s23 = smov %s4935_s26 }
 0x3b8   :  { %14 = sbr.rel (!%p12_p0) target bundleno = 4 (0x4), region = 112 }

// kernel: group_additive_coupling_forward.2
= control target key start
LH: loop header
LB: loop body
LE: loop exit
PB: predicated region body
PF: predicated region fallthrough
CT: control target
= control target key end

     0   :  { %s5676_s0 = inlined_call_operand.vmem [shape: bf16[1024,1024], index: 0, kind: input, shape index: {}]   ;;  %s5677_s1 = inlined_call_operand.vmem [shape: bf16[1024,128], index: 1, kind: input, shape index: {}]   ;;  %s5678_s2 = inlined_call_operand.vmem [shape: f32[1024,128], index: 2, kind: input, shape index: {}]   ;;  %s5679_s3 = inlined_call_operand.vmem [shape: f32[128,128], index: 3, kind: input, shape index: {}]   ;;  %s5680_s4 = inlined_call_operand.vmem [shape: f32[1,128], index: 4, kind: input, shape index: {}]   ;;  %s5681_s5 = inlined_call_operand.vmem [shape: f32[1024,128], index: 5, kind: output, shape index: {0}]   ;;  %s5682_s6 = inlined_call_operand.vmem [shape: bf16[1024,128], index: 6, kind: output, shape index: {1}]  }
   0x1   :  { %5683 = sst [smem:[#allocation4_spill]] %s5676_s0 }
   0x2   :  { %s4773_s21 = smov 0   ;;  %s4775_s22 = smov 0  }
   0x3   :  { %s4777_s23 = smov 0   ;;  %s4779_s24 = smov 0  }
   0x4   :  { %s4781_s25 = smov 0   ;;  %s4783_s26 = smov 0  }
   0x5   :  { %s4785_s27 = smov 0  }
   0x6 LB: > { %s26_s28 = sadd.s32 1, %s4726_s25  ;;  %s29_s29 = sadd.s32 1, %s4730_s26  ;;  %s4734_s27 = sphi %s4785_s27, %s17_s27   ;;  %s4730_s26 = sphi %s4783_s26, %s5690_s26   ;;  %s4726_s25 = sphi %s4781_s25, %s5689_s25   ;;  %s4722_s24 = sphi %s4779_s24, %s5688_s24   ;;  %s4718_s23 = sphi %s4777_s23, %s5687_s23   ;;  %s4714_s22 = sphi %s4775_s22, %s5686_s22   ;;  %s4710_s21 = sphi %s4773_s21, %s5685_s21  }
   0x7   : > { %p27_p0 = scmp.ge.s32.totalorder %s26_s28, 2  ;;  %p45_p1 = scmp.ne.s32.totalorder %s4714_s22, %s4710_s21 }
   0x8   : > { %p46_p2 = scmp.eq.s32.totalorder %s4734_s27, 0  ;;  %s38_s9 = sadd.s32 1, %s4714_s22 }
   0x9   : > { %s5692_s28 = smov (%p27_p0, %s26_s28), 0  ;;  %s5694_s29 = smov (!%p27_p0, %s29_s29), %s4730_s26 }
   0xa   : > { %p47_p3 = por %p46_p2, %p45_p1  ;;  %p31_p4 = scmp.ge.s32.totalorder %s5694_s29, 2 }
   0xb   : > { %s34_s30 = ssub.s32 %s4726_s25, %s5692_s28  ;;  %p3657_p6 = scmp.ge.s32.totalorder %s4734_s27, 4 }
   0xc   : > { %s5696_s29 = smov (%p31_p4, %s5694_s29), 0 }
   0xd   : > { %s33_s7 = ssub.s32 %s4730_s26, %s5696_s29  ;;  %223 = sbr.rel (%p3657_p6) target bundleno = 92 (0x5c), region = 24 }
   0xe   : > { %s35_s8 = sor.u32 %s34_s30, %s33_s7 }
   0xf   : > { %p36_p5 = scmp.eq.s32.totalorder %s35_s8, 0 }
  0x11   : > { %s4824_s10 = scalar_select %p36_p5, %s4714_s22, %s38_s9  }
  0x12   : > { %226 = sbr.rel (!%p47_p3) target bundleno = 92 (0x5c), region = 28  ;;  %s228_s11 = sand.u32 (%p47_p3), 1, %s4714_s22  }
  0x13   : > { %s3660_s12 = sshll.u32 (%p47_p3), %s4726_s25, 2  ;;  %s3658_s13 = sshll.u32 (%p47_p3), %s228_s11, 10 }
  0x14   : > { %s3902_s14 = sshll.u32 (%p47_p3), %s4730_s26, 9  ;;  %s5684_s0 = sld [smem:[#allocation4_spill]] (%p47_p3) }
  0x15   : > { %s234_s15 = sadd.s32 (%p47_p3), %s3902_s14, %s3660_s12  ;;  %s4838_s20 = scalar_lea.vmem (%p47_p3), [#allocation3], %s3658_s13 }
  0x16   : > { %s3662_s16 = sshll.u32 (%p47_p3), %s234_s15, 2 }
  0x1a   : > { %s4833_s19 = scalar_lea.vmem %s5684_s0, %s3662_s16 }
  0x1b   : > { %v249_v0 = vld [vmem:[%s4833_s19] sm:$0xff]  ;;  %v251_v1 = vld [vmem:[%s4833_s19 + $0x8] sm:$0xff] }
  0x1c   : > { %v253_v2 = vld [vmem:[%s4833_s19 + $0x20] sm:$0xff]  ;;  %250 = vst [vmem:[%s4838_s20] sm:$0xff] %v249_v0  ;;  %252 = vst [vmem:[%s4838_s20 + $0x8] sm:$0xff] %v251_v1  ;;  %v255_v3 = vld [vmem:[%s4833_s19 + $0x28] sm:$0xff] }
  0x1d   : > { %254 = vst [vmem:[%s4838_s20 + $0x10] sm:$0xff] %v253_v2  ;;  %v257_v4 = vld [vmem:[%s4833_s19 + $0x40] sm:$0xff]  ;;  %v259_v5 = vld [vmem:[%s4833_s19 + $0x48] sm:$0xff]  ;;  %256 = vst [vmem:[%s4838_s20 + $0x18] sm:$0xff] %v255_v3 }
  0x1e   : > { %258 = vst [vmem:[%s4838_s20 + $0x20] sm:$0xff] %v257_v4  ;;  %260 = vst [vmem:[%s4838_s20 + $0x28] sm:$0xff] %v259_v5  ;;  %v261_v6 = vld [vmem:[%s4833_s19 + $0x60] sm:$0xff]  ;;  %v263_v7 = vld [vmem:[%s4833_s19 + $0x68] sm:$0xff] }
  0x1f   : > { %v265_v8 = vld [vmem:[%s4833_s19 + $0x80] sm:$0xff]  ;;  %262 = vst [vmem:[%s4838_s20 + $0x30] sm:$0xff] %v261_v6  ;;  %264 = vst [vmem:[%s4838_s20 + $0x38] sm:$0xff] %v263_v7  ;;  %v267_v9 = vld [vmem:[%s4833_s19 + $0x88] sm:$0xff] }
  0x20   : > { %266 = vst [vmem:[%s4838_s20 + $0x40] sm:$0xff] %v265_v8  ;;  %v269_v10 = vld [vmem:[%s4833_s19 + $0xa0] sm:$0xff]  ;;  %v271_v11 = vld [vmem:[%s4833_s19 + $0xa8] sm:$0xff]  ;;  %268 = vst [vmem:[%s4838_s20 + $0x48] sm:$0xff] %v267_v9 }
  0x21   : > { %270 = vst [vmem:[%s4838_s20 + $0x50] sm:$0xff] %v269_v10  ;;  %272 = vst [vmem:[%s4838_s20 + $0x58] sm:$0xff] %v271_v11  ;;  %v273_v12 = vld [vmem:[%s4833_s19 + $0xc0] sm:$0xff]  ;;  %v275_v13 = vld [vmem:[%s4833_s19 + $0xc8] sm:$0xff] }
  0x22   : > { %v277_v14 = vld [vmem:[%s4833_s19 + $0xe0] sm:$0xff]  ;;  %274 = vst [vmem:[%s4838_s20 + $0x60] sm:$0xff] %v273_v12  ;;  %276 = vst [vmem:[%s4838_s20 + $0x68] sm:$0xff] %v275_v13  ;;  %v279_v15 = vld [vmem:[%s4833_s19 + $0xe8] sm:$0xff] }
  0x23   : > { %278 = vst [vmem:[%s4838_s20 + $0x70] sm:$0xff] %v277_v14  ;;  %v281_v16 = vld [vmem:[%s4833_s19 + $0x100] sm:$0xff]  ;;  %v283_v17 = vld [vmem:[%s4833_s19 + $0x108] sm:$0xff]  ;;  %280 = vst [vmem:[%s4838_s20 + $0x78] sm:$0xff] %v279_v15 }
  0x24   : > { %282 = vst [vmem:[%s4838_s20 + $0x80] sm:$0xff] %v281_v16  ;;  %284 = vst [vmem:[%s4838_s20 + $0x88] sm:$0xff] %v283_v17  ;;  %v285_v18 = vld [vmem:[%s4833_s19 + $0x120] sm:$0xff]  ;;  %v287_v19 = vld [vmem:[%s4833_s19 + $0x128] sm:$0xff] }
  0x25   : > { %v289_v20 = vld [vmem:[%s4833_s19 + $0x140] sm:$0xff]  ;;  %286 = vst [vmem:[%s4838_s20 + $0x90] sm:$0xff] %v285_v18  ;;  %288 = vst [vmem:[%s4838_s20 + $0x98] sm:$0xff] %v287_v19  ;;  %v291_v21 = vld [vmem:[%s4833_s19 + $0x148] sm:$0xff] }
  0x26   : > { %290 = vst [vmem:[%s4838_s20 + $0xa0] sm:$0xff] %v289_v20  ;;  %v293_v22 = vld [vmem:[%s4833_s19 + $0x160] sm:$0xff]  ;;  %v295_v23 = vld [vmem:[%s4833_s19 + $0x168] sm:$0xff]  ;;  %292 = vst [vmem:[%s4838_s20 + $0xa8] sm:$0xff] %v291_v21 }
  0x27   : > { %294 = vst [vmem:[%s4838_s20 + $0xb0] sm:$0xff] %v293_v22  ;;  %296 = vst [vmem:[%s4838_s20 + $0xb8] sm:$0xff] %v295_v23  ;;  %v297_v24 = vld [vmem:[%s4833_s19 + $0x180] sm:$0xff]  ;;  %v299_v25 = vld [vmem:[%s4833_s19 + $0x188] sm:$0xff] }
  0x28   : > { %v301_v26 = vld [vmem:[%s4833_s19 + $0x1a0] sm:$0xff]  ;;  %298 = vst [vmem:[%s4838_s20 + $0xc0] sm:$0xff] %v297_v24  ;;  %300 = vst [vmem:[%s4838_s20 + $0xc8] sm:$0xff] %v299_v25  ;;  %v303_v27 = vld [vmem:[%s4833_s19 + $0x1a8] sm:$0xff] }
  0x29   : > { %302 = vst [vmem:[%s4838_s20 + $0xd0] sm:$0xff] %v301_v26  ;;  %v305_v28 = vld [vmem:[%s4833_s19 + $0x1c0] sm:$0xff]  ;;  %v307_v29 = vld [vmem:[%s4833_s19 + $0x1c8] sm:$0xff]  ;;  %304 = vst [vmem:[%s4838_s20 + $0xd8] sm:$0xff] %v303_v27 }
  0x2a   : > { %306 = vst [vmem:[%s4838_s20 + $0xe0] sm:$0xff] %v305_v28  ;;  %308 = vst [vmem:[%s4838_s20 + $0xe8] sm:$0xff] %v307_v29  ;;  %v309_v30 = vld [vmem:[%s4833_s19 + $0x1e0] sm:$0xff]  ;;  %v311_v31 = vld [vmem:[%s4833_s19 + $0x1e8] sm:$0xff] }
  0x2b   : > { %v313_v32 = vld [vmem:[%s4833_s19 + $0x200] sm:$0xff]  ;;  %310 = vst [vmem:[%s4838_s20 + $0xf0] sm:$0xff] %v309_v30  ;;  %312 = vst [vmem:[%s4838_s20 + $0xf8] sm:$0xff] %v311_v31  ;;  %v315_v33 = vld [vmem:[%s4833_s19 + $0x208] sm:$0xff] }
  0x2c   : > { %314 = vst [vmem:[%s4838_s20 + $0x100] sm:$0xff] %v313_v32  ;;  %v317_v34 = vld [vmem:[%s4833_s19 + $0x220] sm:$0xff]  ;;  %v319_v35 = vld [vmem:[%s4833_s19 + $0x228] sm:$0xff]  ;;  %316 = vst [vmem:[%s4838_s20 + $0x108] sm:$0xff] %v315_v33 }
  0x2d   : > { %318 = vst [vmem:[%s4838_s20 + $0x110] sm:$0xff] %v317_v34  ;;  %320 = vst [vmem:[%s4838_s20 + $0x118] sm:$0xff] %v319_v35  ;;  %v321_v36 = vld [vmem:[%s4833_s19 + $0x240] sm:$0xff]  ;;  %v323_v37 = vld [vmem:[%s4833_s19 + $0x248] sm:$0xff] }
  0x2e   : > { %v325_v38 = vld [vmem:[%s4833_s19 + $0x260] sm:$0xff]  ;;  %322 = vst [vmem:[%s4838_s20 + $0x120] sm:$0xff] %v321_v36  ;;  %324 = vst [vmem:[%s4838_s20 + $0x128] sm:$0xff] %v323_v37  ;;  %v327_v39 = vld [vmem:[%s4833_s19 + $0x268] sm:$0xff] }
  0x2f   : > { %326 = vst [vmem:[%s4838_s20 + $0x130] sm:$0xff] %v325_v38  ;;  %v329_v40 = vld [vmem:[%s4833_s19 + $0x280] sm:$0xff]  ;;  %v331_v41 = vld [vmem:[%s4833_s19 + $0x288] sm:$0xff]  ;;  %328 = vst [vmem:[%s4838_s20 + $0x138] sm:$0xff] %v327_v39 }
  0x30   : > { %330 = vst [vmem:[%s4838_s20 + $0x140] sm:$0xff] %v329_v40  ;;  %332 = vst [vmem:[%s4838_s20 + $0x148] sm:$0xff] %v331_v41  ;;  %v333_v42 = vld [vmem:[%s4833_s19 + $0x2a0] sm:$0xff]  ;;  %v335_v43 = vld [vmem:[%s4833_s19 + $0x2a8] sm:$0xff] }
  0x31   : > { %v337_v44 = vld [vmem:[%s4833_s19 + $0x2c0] sm:$0xff]  ;;  %334 = vst [vmem:[%s4838_s20 + $0x150] sm:$0xff] %v333_v42  ;;  %336 = vst [vmem:[%s4838_s20 + $0x158] sm:$0xff] %v335_v43  ;;  %v339_v45 = vld [vmem:[%s4833_s19 + $0x2c8] sm:$0xff] }
  0x32   : > { %338 = vst [vmem:[%s4838_s20 + $0x160] sm:$0xff] %v337_v44  ;;  %v341_v46 = vld [vmem:[%s4833_s19 + $0x2e0] sm:$0xff]  ;;  %v343_v47 = vld [vmem:[%s4833_s19 + $0x2e8] sm:$0xff]  ;;  %340 = vst [vmem:[%s4838_s20 + $0x168] sm:$0xff] %v339_v45 }
  0x33   : > { %342 = vst [vmem:[%s4838_s20 + $0x170] sm:$0xff] %v341_v46  ;;  %344 = vst [vmem:[%s4838_s20 + $0x178] sm:$0xff] %v343_v47  ;;  %v345_v48 = vld [vmem:[%s4833_s19 + $0x300] sm:$0xff]  ;;  %v347_v49 = vld [vmem:[%s4833_s19 + $0x308] sm:$0xff] }
  0x34   : > { %v349_v50 = vld [vmem:[%s4833_s19 + $0x320] sm:$0xff]  ;;  %346 = vst [vmem:[%s4838_s20 + $0x180] sm:$0xff] %v345_v48  ;;  %348 = vst [vmem:[%s4838_s20 + $0x188] sm:$0xff] %v347_v49  ;;  %v351_v51 = vld [vmem:[%s4833_s19 + $0x328] sm:$0xff] }
  0x35   : > { %350 = vst [vmem:[%s4838_s20 + $0x190] sm:$0xff] %v349_v50  ;;  %v353_v52 = vld [vmem:[%s4833_s19 + $0x340] sm:$0xff]  ;;  %v355_v53 = vld [vmem:[%s4833_s19 + $0x348] sm:$0xff]  ;;  %352 = vst [vmem:[%s4838_s20 + $0x198] sm:$0xff] %v351_v51 }
  0x36   : > { %354 = vst [vmem:[%s4838_s20 + $0x1a0] sm:$0xff] %v353_v52  ;;  %356 = vst [vmem:[%s4838_s20 + $0x1a8] sm:$0xff] %v355_v53  ;;  %v357_v54 = vld [vmem:[%s4833_s19 + $0x360] sm:$0xff]  ;;  %v359_v55 = vld [vmem:[%s4833_s19 + $0x368] sm:$0xff] }
  0x37   : > { %v361_v56 = vld [vmem:[%s4833_s19 + $0x380] sm:$0xff]  ;;  %358 = vst [vmem:[%s4838_s20 + $0x1b0] sm:$0xff] %v357_v54  ;;  %360 = vst [vmem:[%s4838_s20 + $0x1b8] sm:$0xff] %v359_v55  ;;  %v363_v57 = vld [vmem:[%s4833_s19 + $0x388] sm:$0xff] }
  0x38   : > { %362 = vst [vmem:[%s4838_s20 + $0x1c0] sm:$0xff] %v361_v56  ;;  %v365_v58 = vld [vmem:[%s4833_s19 + $0x3a0] sm:$0xff]  ;;  %v367_v59 = vld [vmem:[%s4833_s19 + $0x3a8] sm:$0xff]  ;;  %364 = vst [vmem:[%s4838_s20 + $0x1c8] sm:$0xff] %v363_v57 }
  0x39   : > { %366 = vst [vmem:[%s4838_s20 + $0x1d0] sm:$0xff] %v365_v58  ;;  %368 = vst [vmem:[%s4838_s20 + $0x1d8] sm:$0xff] %v367_v59  ;;  %v369_v60 = vld [vmem:[%s4833_s19 + $0x3c0] sm:$0xff]  ;;  %v371_v61 = vld [vmem:[%s4833_s19 + $0x3c8] sm:$0xff] }
  0x3a   : > { %v373_v62 = vld [vmem:[%s4833_s19 + $0x3e0] sm:$0xff]  ;;  %370 = vst [vmem:[%s4838_s20 + $0x1e0] sm:$0xff] %v369_v60  ;;  %372 = vst [vmem:[%s4838_s20 + $0x1e8] sm:$0xff] %v371_v61  ;;  %v375_v63 = vld [vmem:[%s4833_s19 + $0x3e8] sm:$0xff] }
  0x3b   : > { %374 = vst [vmem:[%s4838_s20 + $0x1f0] sm:$0xff] %v373_v62  ;;  %v377_v0 = vld [vmem:[%s4833_s19 + $0x400] sm:$0xff]  ;;  %v379_v1 = vld [vmem:[%s4833_s19 + $0x408] sm:$0xff]  ;;  %376 = vst [vmem:[%s4838_s20 + $0x1f8] sm:$0xff] %v375_v63 }
  0x3c   : > { %378 = vst [vmem:[%s4838_s20 + $0x200] sm:$0xff] %v377_v0  ;;  %380 = vst [vmem:[%s4838_s20 + $0x208] sm:$0xff] %v379_v1  ;;  %v381_v2 = vld [vmem:[%s4833_s19 + $0x420] sm:$0xff]  ;;  %v383_v3 = vld [vmem:[%s4833_s19 + $0x428] sm:$0xff] }
  0x3d   : > { %v385_v4 = vld [vmem:[%s4833_s19 + $0x440] sm:$0xff]  ;;  %382 = vst [vmem:[%s4838_s20 + $0x210] sm:$0xff] %v381_v2  ;;  %384 = vst [vmem:[%s4838_s20 + $0x218] sm:$0xff] %v383_v3  ;;  %v387_v5 = vld [vmem:[%s4833_s19 + $0x448] sm:$0xff] }
  0x3e   : > { %386 = vst [vmem:[%s4838_s20 + $0x220] sm:$0xff] %v385_v4  ;;  %v389_v6 = vld [vmem:[%s4833_s19 + $0x460] sm:$0xff]  ;;  %v391_v7 = vld [vmem:[%s4833_s19 + $0x468] sm:$0xff]  ;;  %388 = vst [vmem:[%s4838_s20 + $0x228] sm:$0xff] %v387_v5 }
  0x3f   : > { %390 = vst [vmem:[%s4838_s20 + $0x230] sm:$0xff] %v389_v6  ;;  %392 = vst [vmem:[%s4838_s20 + $0x238] sm:$0xff] %v391_v7  ;;  %v393_v8 = vld [vmem:[%s4833_s19 + $0x480] sm:$0xff]  ;;  %v395_v9 = vld [vmem:[%s4833_s19 + $0x488] sm:$0xff] }
  0x40   : > { %v397_v10 = vld [vmem:[%s4833_s19 + $0x4a0] sm:$0xff]  ;;  %394 = vst [vmem:[%s4838_s20 + $0x240] sm:$0xff] %v393_v8  ;;  %396 = vst [vmem:[%s4838_s20 + $0x248] sm:$0xff] %v395_v9  ;;  %v399_v11 = vld [vmem:[%s4833_s19 + $0x4a8] sm:$0xff] }
  0x41   : > { %398 = vst [vmem:[%s4838_s20 + $0x250] sm:$0xff] %v397_v10  ;;  %v401_v12 = vld [vmem:[%s4833_s19 + $0x4c0] sm:$0xff]  ;;  %v403_v13 = vld [vmem:[%s4833_s19 + $0x4c8] sm:$0xff]  ;;  %400 = vst [vmem:[%s4838_s20 + $0x258] sm:$0xff] %v399_v11 }
  0x42   : > { %402 = vst [vmem:[%s4838_s20 + $0x260] sm:$0xff] %v401_v12  ;;  %404 = vst [vmem:[%s4838_s20 + $0x268] sm:$0xff] %v403_v13  ;;  %v405_v14 = vld [vmem:[%s4833_s19 + $0x4e0] sm:$0xff]  ;;  %v407_v15 = vld [vmem:[%s4833_s19 + $0x4e8] sm:$0xff] }
  0x43   : > { %v409_v16 = vld [vmem:[%s4833_s19 + $0x500] sm:$0xff]  ;;  %406 = vst [vmem:[%s4838_s20 + $0x270] sm:$0xff] %v405_v14  ;;  %408 = vst [vmem:[%s4838_s20 + $0x278] sm:$0xff] %v407_v15  ;;  %v411_v17 = vld [vmem:[%s4833_s19 + $0x508] sm:$0xff] }
  0x44   : > { %410 = vst [vmem:[%s4838_s20 + $0x280] sm:$0xff] %v409_v16  ;;  %v413_v18 = vld [vmem:[%s4833_s19 + $0x520] sm:$0xff]  ;;  %v415_v19 = vld [vmem:[%s4833_s19 + $0x528] sm:$0xff]  ;;  %412 = vst [vmem:[%s4838_s20 + $0x288] sm:$0xff] %v411_v17 }
  0x45   : > { %414 = vst [vmem:[%s4838_s20 + $0x290] sm:$0xff] %v413_v18  ;;  %416 = vst [vmem:[%s4838_s20 + $0x298] sm:$0xff] %v415_v19  ;;  %v417_v20 = vld [vmem:[%s4833_s19 + $0x540] sm:$0xff]  ;;  %v419_v21 = vld [vmem:[%s4833_s19 + $0x548] sm:$0xff] }
  0x46   : > { %v421_v22 = vld [vmem:[%s4833_s19 + $0x560] sm:$0xff]  ;;  %418 = vst [vmem:[%s4838_s20 + $0x2a0] sm:$0xff] %v417_v20  ;;  %420 = vst [vmem:[%s4838_s20 + $0x2a8] sm:$0xff] %v419_v21  ;;  %v423_v23 = vld [vmem:[%s4833_s19 + $0x568] sm:$0xff] }
  0x47   : > { %422 = vst [vmem:[%s4838_s20 + $0x2b0] sm:$0xff] %v421_v22  ;;  %v425_v24 = vld [vmem:[%s4833_s19 + $0x580] sm:$0xff]  ;;  %v427_v25 = vld [vmem:[%s4833_s19 + $0x588] sm:$0xff]  ;;  %424 = vst [vmem:[%s4838_s20 + $0x2b8] sm:$0xff] %v423_v23 }
  0x48   : > { %426 = vst [vmem:[%s4838_s20 + $0x2c0] sm:$0xff] %v425_v24  ;;  %428 = vst [vmem:[%s4838_s20 + $0x2c8] sm:$0xff] %v427_v25  ;;  %v429_v26 = vld [vmem:[%s4833_s19 + $0x5a0] sm:$0xff]  ;;  %v431_v27 = vld [vmem:[%s4833_s19 + $0x5a8] sm:$0xff] }
  0x49   : > { %v433_v28 = vld [vmem:[%s4833_s19 + $0x5c0] sm:$0xff]  ;;  %430 = vst [vmem:[%s4838_s20 + $0x2d0] sm:$0xff] %v429_v26  ;;  %432 = vst [vmem:[%s4838_s20 + $0x2d8] sm:$0xff] %v431_v27  ;;  %v435_v29 = vld [vmem:[%s4833_s19 + $0x5c8] sm:$0xff] }
  0x4a   : > { %434 = vst [vmem:[%s4838_s20 + $0x2e0] sm:$0xff] %v433_v28  ;;  %v437_v30 = vld [vmem:[%s4833_s19 + $0x5e0] sm:$0xff]  ;;  %v439_v31 = vld [vmem:[%s4833_s19 + $0x5e8] sm:$0xff]  ;;  %436 = vst [vmem:[%s4838_s20 + $0x2e8] sm:$0xff] %v435_v29 }
  0x4b   : > { %438 = vst [vmem:[%s4838_s20 + $0x2f0] sm:$0xff] %v437_v30  ;;  %440 = vst [vmem:[%s4838_s20 + $0x2f8] sm:$0xff] %v439_v31  ;;  %v441_v32 = vld [vmem:[%s4833_s19 + $0x600] sm:$0xff]  ;;  %v443_v33 = vld [vmem:[%s4833_s19 + $0x608] sm:$0xff] }
  0x4c   : > { %v445_v34 = vld [vmem:[%s4833_s19 + $0x620] sm:$0xff]  ;;  %442 = vst [vmem:[%s4838_s20 + $0x300] sm:$0xff] %v441_v32  ;;  %444 = vst [vmem:[%s4838_s20 + $0x308] sm:$0xff] %v443_v33  ;;  %v447_v35 = vld [vmem:[%s4833_s19 + $0x628] sm:$0xff] }
  0x4d   : > { %446 = vst [vmem:[%s4838_s20 + $0x310] sm:$0xff] %v445_v34  ;;  %v449_v36 = vld [vmem:[%s4833_s19 + $0x640] sm:$0xff]  ;;  %v451_v37 = vld [vmem:[%s4833_s19 + $0x648] sm:$0xff]  ;;  %448 = vst [vmem:[%s4838_s20 + $0x318] sm:$0xff] %v447_v35 }
  0x4e   : > { %450 = vst [vmem:[%s4838_s20 + $0x320] sm:$0xff] %v449_v36  ;;  %452 = vst [vmem:[%s4838_s20 + $0x328] sm:$0xff] %v451_v37  ;;  %v453_v38 = vld [vmem:[%s4833_s19 + $0x660] sm:$0xff]  ;;  %v455_v39 = vld [vmem:[%s4833_s19 + $0x668] sm:$0xff] }
  0x4f   : > { %v457_v40 = vld [vmem:[%s4833_s19 + $0x680] sm:$0xff]  ;;  %454 = vst [vmem:[%s4838_s20 + $0x330] sm:$0xff] %v453_v38  ;;  %456 = vst [vmem:[%s4838_s20 + $0x338] sm:$0xff] %v455_v39  ;;  %v459_v41 = vld [vmem:[%s4833_s19 + $0x688] sm:$0xff] }
  0x50   : > { %458 = vst [vmem:[%s4838_s20 + $0x340] sm:$0xff] %v457_v40  ;;  %v461_v42 = vld [vmem:[%s4833_s19 + $0x6a0] sm:$0xff]  ;;  %v463_v43 = vld [vmem:[%s4833_s19 + $0x6a8] sm:$0xff]  ;;  %460 = vst [vmem:[%s4838_s20 + $0x348] sm:$0xff] %v459_v41 }
  0x51   : > { %462 = vst [vmem:[%s4838_s20 + $0x350] sm:$0xff] %v461_v42  ;;  %464 = vst [vmem:[%s4838_s20 + $0x358] sm:$0xff] %v463_v43  ;;  %v465_v44 = vld [vmem:[%s4833_s19 + $0x6c0] sm:$0xff]  ;;  %v467_v45 = vld [vmem:[%s4833_s19 + $0x6c8] sm:$0xff] }
  0x52   : > { %v469_v46 = vld [vmem:[%s4833_s19 + $0x6e0] sm:$0xff]  ;;  %466 = vst [vmem:[%s4838_s20 + $0x360] sm:$0xff] %v465_v44  ;;  %468 = vst [vmem:[%s4838_s20 + $0x368] sm:$0xff] %v467_v45  ;;  %v471_v47 = vld [vmem:[%s4833_s19 + $0x6e8] sm:$0xff] }
  0x53   : > { %470 = vst [vmem:[%s4838_s20 + $0x370] sm:$0xff] %v469_v46  ;;  %v473_v48 = vld [vmem:[%s4833_s19 + $0x700] sm:$0xff]  ;;  %v475_v49 = vld [vmem:[%s4833_s19 + $0x708] sm:$0xff]  ;;  %472 = vst [vmem:[%s4838_s20 + $0x378] sm:$0xff] %v471_v47 }
  0x54   : > { %474 = vst [vmem:[%s4838_s20 + $0x380] sm:$0xff] %v473_v48  ;;  %476 = vst [vmem:[%s4838_s20 + $0x388] sm:$0xff] %v475_v49  ;;  %v477_v50 = vld [vmem:[%s4833_s19 + $0x720] sm:$0xff]  ;;  %v479_v51 = vld [vmem:[%s4833_s19 + $0x728] sm:$0xff] }
  0x55   : > { %v481_v52 = vld [vmem:[%s4833_s19 + $0x740] sm:$0xff]  ;;  %478 = vst [vmem:[%s4838_s20 + $0x390] sm:$0xff] %v477_v50  ;;  %480 = vst [vmem:[%s4838_s20 + $0x398] sm:$0xff] %v479_v51  ;;  %v483_v53 = vld [vmem:[%s4833_s19 + $0x748] sm:$0xff] }
  0x56   : > { %482 = vst [vmem:[%s4838_s20 + $0x3a0] sm:$0xff] %v481_v52  ;;  %v485_v54 = vld [vmem:[%s4833_s19 + $0x760] sm:$0xff]  ;;  %v487_v55 = vld [vmem:[%s4833_s19 + $0x768] sm:$0xff]  ;;  %484 = vst [vmem:[%s4838_s20 + $0x3a8] sm:$0xff] %v483_v53 }
  0x57   : > { %486 = vst [vmem:[%s4838_s20 + $0x3b0] sm:$0xff] %v485_v54  ;;  %488 = vst [vmem:[%s4838_s20 + $0x3b8] sm:$0xff] %v487_v55  ;;  %v489_v56 = vld [vmem:[%s4833_s19 + $0x780] sm:$0xff]  ;;  %v491_v57 = vld [vmem:[%s4833_s19 + $0x788] sm:$0xff] }
  0x58   : > { %v493_v58 = vld [vmem:[%s4833_s19 + $0x7a0] sm:$0xff]  ;;  %490 = vst [vmem:[%s4838_s20 + $0x3c0] sm:$0xff] %v489_v56  ;;  %492 = vst [vmem:[%s4838_s20 + $0x3c8] sm:$0xff] %v491_v57  ;;  %v495_v59 = vld [vmem:[%s4833_s19 + $0x7a8] sm:$0xff] }
  0x59   : > { %494 = vst [vmem:[%s4838_s20 + $0x3d0] sm:$0xff] %v493_v58  ;;  %v497_v60 = vld [vmem:[%s4833_s19 + $0x7c0] sm:$0xff]  ;;  %v499_v61 = vld [vmem:[%s4833_s19 + $0x7c8] sm:$0xff]  ;;  %496 = vst [vmem:[%s4838_s20 + $0x3d8] sm:$0xff] %v495_v59 }
  0x5a   : > { %498 = vst [vmem:[%s4838_s20 + $0x3e0] sm:$0xff] %v497_v60  ;;  %500 = vst [vmem:[%s4838_s20 + $0x3e8] sm:$0xff] %v499_v61  ;;  %v501_v62 = vld [vmem:[%s4833_s19 + $0x7e0] sm:$0xff]  ;;  %v503_v63 = vld [vmem:[%s4833_s19 + $0x7e8] sm:$0xff] }
  0x5b   : > { %502 = vst [vmem:[%s4838_s20 + $0x3f0] sm:$0xff] %v501_v62  ;;  %504 = vst [vmem:[%s4838_s20 + $0x3f8] sm:$0xff] %v503_v63 }
  0x5c PF: > { %p3663_p7 = scmp.ge.s32.totalorder %s4734_s27, 1  ;;  %p527_p8 = scmp.lt.s32.totalorder %s4734_s27, 5 }
  0x5e   : > { %p528_p9 = pnand %p3663_p7, %p527_p8 }
  0x5f   : > { %s534_s30 = sand.u32 (!%p528_p9), 1, %s4710_s21   ;;  %s3665_s7 = sshll.u32 (!%p528_p9), %s4718_s23, 6 }
  0x60   : > { %531 = sbr.rel (%p528_p9) target bundleno = 957 (0x3bd), region = 59  ;;  %s3664_s8 = sshll.u32 (!%p528_p9), %s534_s30, 10 }
  0x61   : > { %p581_p10 = scmp.lt.s32.totalorder (!%p528_p9), %s3665_s7, 127  ;;  %s3667_s9 = sshll.u32 (!%p528_p9), %s4722_s24, 6 }
  0x62   : > { %p587_p11 = scmp.lt.s32.totalorder (!%p528_p9), %s3667_s9, 127  ;;  %p3673_p12 = scmp.ne.s32.totalorder (!%p528_p9), %s4718_s23, 0 }
  0x65   : > { %s5698_s7 = smov (!%p581_p10, %s3665_s7), 127  ;;  %s5700_s9 = smov (!%p587_p11, %s3667_s9), 127 }
  0x66   : > { %s3666_s11 = sshll.u32 %s5698_s7, 2  ;;  %s3668_s15 = sshll.u32 %s5700_s9, 3 }
  0x67   : > { %s5101_s14 = scalar_lea.vmem %s5677_s1, %s3666_s11  ;;  %s3672_s16 = sshll.u32 %s5700_s9, 2 }
  0x68   : > { %s5106_s19 = scalar_lea.vmem %s5678_s2, %s3668_s15  ;;  %s5111_s24 = scalar_lea.vmem %s5681_s5, %s3668_s15 }
  0x69   : > { %s5116_s0 = scalar_lea.vmem %s5682_s6, %s3672_s16  ;;  %s5118_s11 = scalar_lea.vmem [#allocation3], %s3664_s8 }
  0x6a   : > { %608 = sbr.rel (%p3673_p12) target bundleno = 144 (0x90), region = 67 }
  0x6f   : > { %v4736_v0 = vmov 0.0  }
  0x70   : > { %609 = vst [vmem:[#allocation2 + $0xb0] sm:$0xff] %v4736_v0  ;;  %610 = vst [vmem:[#allocation2 + $0x1b0] sm:$0xff] %v4736_v0 }
  0x71   : > { %611 = vst [vmem:[#allocation2 + $0xd8] sm:$0xff] %v4736_v0  ;;  %612 = vst [vmem:[#allocation2 + $0x18] sm:$0xff] %v4736_v0 }
  0x72   : > { %613 = vst [vmem:[#allocation2 + $0x50] sm:$0xff] %v4736_v0  ;;  %614 = vst [vmem:[#allocation2 + $0x168] sm:$0xff] %v4736_v0 }
  0x73   : > { %615 = vst [vmem:[#allocation2 + $0x130] sm:$0xff] %v4736_v0  ;;  %616 = vst [vmem:[#allocation2 + $0x48] sm:$0xff] %v4736_v0 }
  0x74   : > { %617 = vst [vmem:[#allocation2 + $0x180] sm:$0xff] %v4736_v0  ;;  %618 = vst [vmem:[#allocation2 + $0x110] sm:$0xff] %v4736_v0 }
  0x75   : > { %619 = vst [vmem:[#allocation2 + $0x118] sm:$0xff] %v4736_v0  ;;  %620 = vst [vmem:[#allocation2 + $0x98] sm:$0xff] %v4736_v0 }
  0x76   : > { %621 = vst [vmem:[#allocation2 + $0x120] sm:$0xff] %v4736_v0  ;;  %622 = vst [vmem:[#allocation2 + $0x150] sm:$0xff] %v4736_v0 }
  0x77   : > { %623 = vst [vmem:[#allocation2 + $0x108] sm:$0xff] %v4736_v0  ;;  %624 = vst [vmem:[#allocation2 + $0x60] sm:$0xff] %v4736_v0 }
  0x78   : > { %625 = vst [vmem:[#allocation2 + $0xe0] sm:$0xff] %v4736_v0  ;;  %626 = vst [vmem:[#allocation2 + $0x188] sm:$0xff] %v4736_v0 }
  0x79   : > { %627 = vst [vmem:[#allocation2 + $0x138] sm:$0xff] %v4736_v0  ;;  %628 = vst [vmem:[#allocation2 + $0x140] sm:$0xff] %v4736_v0 }
  0x7a   : > { %629 = vst [vmem:[#allocation2 + $0x80] sm:$0xff] %v4736_v0  ;;  %630 = vst [vmem:[#allocation2 + $0x1a8] sm:$0xff] %v4736_v0 }
  0x7b   : > { %631 = vst [vmem:[#allocation2 + $0x1b8] sm:$0xff] %v4736_v0  ;;  %632 = vst [vmem:[#allocation2 + $0x28] sm:$0xff] %v4736_v0 }
  0x7c   : > { %633 = vst [vmem:[#allocation2 + $0x1e8] sm:$0xff] %v4736_v0  ;;  %634 = vst [vmem:[#allocation2 + $0xf8] sm:$0xff] %v4736_v0 }
  0x7d   : > { %635 = vst [vmem:[#allocation2 + $0x160] sm:$0xff] %v4736_v0  ;;  %636 = vst [vmem:[#allocation2 + $0x30] sm:$0xff] %v4736_v0 }
  0x7e   : > { %637 = vst [vmem:[#allocation2 + $0x1e0] sm:$0xff] %v4736_v0  ;;  %638 = vst [vmem:[#allocation2] sm:$0xff] %v4736_v0 }
  0x7f   : > { %639 = vst [vmem:[#allocation2 + $0xf0] sm:$0xff] %v4736_v0  ;;  %640 = vst [vmem:[#allocation2 + $0x8] sm:$0xff] %v4736_v0 }
  0x80   : > { %641 = vst [vmem:[#allocation2 + $0x148] sm:$0xff] %v4736_v0  ;;  %642 = vst [vmem:[#allocation2 + $0x1d0] sm:$0xff] %v4736_v0 }
  0x81   : > { %643 = vst [vmem:[#allocation2 + $0x100] sm:$0xff] %v4736_v0  ;;  %644 = vst [vmem:[#allocation2 + $0xc8] sm:$0xff] %v4736_v0 }
  0x82   : > { %645 = vst [vmem:[#allocation2 + $0x40] sm:$0xff] %v4736_v0  ;;  %646 = vst [vmem:[#allocation2 + $0x1f8] sm:$0xff] %v4736_v0 }
  0x83   : > { %647 = vst [vmem:[#allocation2 + $0x20] sm:$0xff] %v4736_v0  ;;  %648 = vst [vmem:[#allocation2 + $0x128] sm:$0xff] %v4736_v0 }
  0x84   : > { %649 = vst [vmem:[#allocation2 + $0x1a0] sm:$0xff] %v4736_v0  ;;  %650 = vst [vmem:[#allocation2 + $0x1f0] sm:$0xff] %v4736_v0 }
  0x85   : > { %651 = vst [vmem:[#allocation2 + $0xe8] sm:$0xff] %v4736_v0  ;;  %652 = vst [vmem:[#allocation2 + $0x78] sm:$0xff] %v4736_v0 }
  0x86   : > { %653 = vst [vmem:[#allocation2 + $0x70] sm:$0xff] %v4736_v0  ;;  %654 = vst [vmem:[#allocation2 + $0x90] sm:$0xff] %v4736_v0 }
  0x87   : > { %655 = vst [vmem:[#allocation2 + $0x1d8] sm:$0xff] %v4736_v0  ;;  %656 = vst [vmem:[#allocation2 + $0xd0] sm:$0xff] %v4736_v0 }
  0x88   : > { %657 = vst [vmem:[#allocation2 + $0xb8] sm:$0xff] %v4736_v0  ;;  %658 = vst [vmem:[#allocation2 + $0x88] sm:$0xff] %v4736_v0 }
  0x89   : > { %659 = vst [vmem:[#allocation2 + $0xa8] sm:$0xff] %v4736_v0  ;;  %660 = vst [vmem:[#allocation2 + $0x1c8] sm:$0xff] %v4736_v0 }
  0x8a   : > { %661 = vst [vmem:[#allocation2 + $0x170] sm:$0xff] %v4736_v0  ;;  %662 = vst [vmem:[#allocation2 + $0x178] sm:$0xff] %v4736_v0 }
  0x8b   : > { %663 = vst [vmem:[#allocation2 + $0x68] sm:$0xff] %v4736_v0  ;;  %664 = vst [vmem:[#allocation2 + $0x190] sm:$0xff] %v4736_v0 }
  0x8c   : > { %665 = vst [vmem:[#allocation2 + $0x198] sm:$0xff] %v4736_v0  ;;  %666 = vst [vmem:[#allocation2 + $0x38] sm:$0xff] %v4736_v0 }
  0x8d   : > { %667 = vst [vmem:[#allocation2 + $0xc0] sm:$0xff] %v4736_v0  ;;  %668 = vst [vmem:[#allocation2 + $0x1c0] sm:$0xff] %v4736_v0 }
  0x8e   : > { %669 = vst [vmem:[#allocation2 + $0x158] sm:$0xff] %v4736_v0  ;;  %670 = vst [vmem:[#allocation2 + $0x10] sm:$0xff] %v4736_v0 }
  0x8f   : > { %671 = vst [vmem:[#allocation2 + $0x58] sm:$0xff] %v4736_v0  ;;  %672 = vst [vmem:[#allocation2 + $0xa0] sm:$0xff] %v4736_v0 }
  0x90 PF: > { %v4456_v1 = vld [vmem:[%s5101_s14 + $0x38] sm:$0xff]   ;;  %v4737_v2 = vmov 0   ;;  %v4458_v4 = vld [vmem:[%s5101_s14 + $0x30] sm:$0xff]   ;;  %v4460_v6 = vld [vmem:[%s5101_s14 + $0x28] sm:$0xff]   ;;  %p3834_p13 = scmp.ne.s32.totalorder %s4718_s23, 1 }
  0x91   : > { %1761 = vmatprep.subr.bf16.mxu0 %v4737_v2  ;;  %2050 = vmatprep.subr.bf16.mxu1 %v4737_v2  ;;  %v4457_v3 = vld [vmem:[%s5101_s14 + $0xb8] sm:$0xff]   ;;  %v4459_v5 = vld [vmem:[%s5101_s14 + $0xb0] sm:$0xff]   ;;  %v4461_v7 = vld [vmem:[%s5101_s14 + $0xa8] sm:$0xff]  }
  0x92   : > { %1762 = vmatpush1.bf16.msra.mxu0 %v4456_v1  ;;  %2051 = vmatpush1.bf16.msra.mxu1 %v4457_v3  ;;  %v4462_v8 = vld [vmem:[%s5101_s14 + $0x20] sm:$0xff]   ;;  %v4464_v10 = vld [vmem:[%s5101_s14 + $0x18] sm:$0xff]   ;;  %v4466_v12 = vld [vmem:[%s5101_s14 + $0x10] sm:$0xff]  }
  0x93   : > { %1763 = vmatprep.subr.bf16.mxu0 %v4737_v2  ;;  %2052 = vmatprep.subr.bf16.mxu1 %v4737_v2  ;;  %v4463_v9 = vld [vmem:[%s5101_s14 + $0xa0] sm:$0xff]   ;;  %v4465_v11 = vld [vmem:[%s5101_s14 + $0x98] sm:$0xff]   ;;  %v4467_v13 = vld [vmem:[%s5101_s14 + $0x90] sm:$0xff]  }
  0x94   : > { %v4468_v14 = vld [vmem:[%s5101_s14 + $0x8] sm:$0xff]   ;;  %v4470_v16 = vld [vmem:[%s5101_s14] sm:$0xff]   ;;  %v4472_v18 = vld [vmem:[%s5101_s14 + $0x78] sm:$0xff]  }
  0x95   : > { %v4469_v15 = vld [vmem:[%s5101_s14 + $0x88] sm:$0xff]   ;;  %v4471_v17 = vld [vmem:[%s5101_s14 + $0x80] sm:$0xff]   ;;  %v4473_v19 = vld [vmem:[%s5101_s14 + $0xf8] sm:$0xff]  }
  0x96   : > { %1764 = vmatpush1.bf16.msra.mxu0 %v4458_v4  ;;  %2053 = vmatpush1.bf16.msra.mxu1 %v4459_v5  ;;  %v4490_v20 = vld [vmem:[%s5118_s11 + $0x4] ss:$16 sps:$4 sm:$0xff]   ;;  %v4493_v22 = vld [vmem:[%s5118_s11 + $0xc] ss:$16 sps:$4 sm:$0xff]   ;;  %v4488_v36 = vld [vmem:[%s5118_s11] ss:$16 sps:$4 sm:$0xff]  }
  0x97   : > { %1765 = vmatprep.subr.bf16.mxu0 %v4737_v2  ;;  %2054 = vmatprep.subr.bf16.mxu1 %v4737_v2  ;;  %v4474_v21 = vld [vmem:[%s5101_s14 + $0x70] sm:$0xff]   ;;  %v4476_v24 = vld [vmem:[%s5101_s14 + $0x68] sm:$0xff]   ;;  %v4478_v26 = vld [vmem:[%s5101_s14 + $0x60] sm:$0xff]  }
  0x98   : > { %v4475_v23 = vld [vmem:[%s5101_s14 + $0xf0] sm:$0xff]   ;;  %1793 = vmatprep.mubr.bf16.mxu0 %v4490_v20  ;;  %2082 = vmatprep.mubr.bf16.mxu1 %v4493_v22  ;;  %v4477_v25 = vld [vmem:[%s5101_s14 + $0xe8] sm:$0xff]   ;;  %v4479_v27 = vld [vmem:[%s5101_s14 + $0xe0] sm:$0xff]  }
  0x99   : > { %v4480_v28 = vld [vmem:[%s5101_s14 + $0x58] sm:$0xff]   ;;  %v4482_v30 = vld [vmem:[%s5101_s14 + $0x50] sm:$0xff]   ;;  %v4484_v32 = vld [vmem:[%s5101_s14 + $0x48] sm:$0xff]  }
  0x9a   : > { %1766 = vmatpush1.bf16.msra.mxu0 %v4460_v6  ;;  %2055 = vmatpush1.bf16.msra.mxu1 %v4461_v7  ;;  %v4481_v29 = vld [vmem:[%s5101_s14 + $0xd8] sm:$0xff]   ;;  %v4483_v31 = vld [vmem:[%s5101_s14 + $0xd0] sm:$0xff]   ;;  %v4485_v33 = vld [vmem:[%s5101_s14 + $0xc8] sm:$0xff]  }
  0x9b   : > { %1767 = vmatprep.subr.bf16.mxu0 %v4737_v2  ;;  %2056 = vmatprep.subr.bf16.mxu1 %v4737_v2  ;;  %v4486_v34 = vld [vmem:[%s5101_s14 + $0x40] sm:$0xff]   ;;  %v4491_v37 = vld [vmem:[%s5118_s11 + $0x8] ss:$16 sps:$4 sm:$0xff]   ;;  %v4496_v39 = vld [vmem:[%s5118_s11 + $0x2c] ss:$16 sps:$4 sm:$0xff]  }
  0x9c   : > { %v4487_v35 = vld [vmem:[%s5101_s14 + $0xc0] sm:$0xff]   ;;  %v4499_v41 = vld [vmem:[%s5118_s11 + $0x28] ss:$16 sps:$4 sm:$0xff]   ;;  %v4502_v43 = vld [vmem:[%s5118_s11 + $0x4c] ss:$16 sps:$4 sm:$0xff]  }
  0x9d   : > { %v4494_v38 = vld [vmem:[%s5118_s11 + $0x24] ss:$16 sps:$4 sm:$0xff]   ;;  %v4498_v40 = vld [vmem:[%s5118_s11 + $0x20] ss:$16 sps:$4 sm:$0xff]   ;;  %v4505_v45 = vld [vmem:[%s5118_s11 + $0x48] ss:$16 sps:$4 sm:$0xff]  }
  0x9e   : > { %1768 = vmatpush1.bf16.msra.mxu0 %v4462_v8  ;;  %2057 = vmatpush1.bf16.msra.mxu1 %v4463_v9  ;;  %v4500_v42 = vld [vmem:[%s5118_s11 + $0x44] ss:$16 sps:$4 sm:$0xff]   ;;  %v4504_v44 = vld [vmem:[%s5118_s11 + $0x40] ss:$16 sps:$4 sm:$0xff]   ;;  %v4508_v47 = vld [vmem:[%s5118_s11 + $0x6c] ss:$16 sps:$4 sm:$0xff]  }
  0x9f   : > { %1769 = vmatprep.subr.bf16.mxu0 %v4737_v2  ;;  %2058 = vmatprep.subr.bf16.mxu1 %v4737_v2  ;;  %v4506_v46 = vld [vmem:[%s5118_s11 + $0x64] ss:$16 sps:$4 sm:$0xff]   ;;  %v4510_v48 = vld [vmem:[%s5118_s11 + $0x60] ss:$16 sps:$4 sm:$0xff]   ;;  %v4511_v49 = vld [vmem:[%s5118_s11 + $0x68] ss:$16 sps:$4 sm:$0xff]  }
  0xa0   : > { %v4512_v50 = vld [vmem:[%s5118_s11 + $0x84] ss:$16 sps:$4 sm:$0xff]   ;;  %v4514_v51 = vld [vmem:[%s5118_s11 + $0x8c] ss:$16 sps:$4 sm:$0xff]   ;;  %v4516_v52 = vld [vmem:[%s5118_s11 + $0x80] ss:$16 sps:$4 sm:$0xff]  }
  0xa1   : > { %v4517_v53 = vld [vmem:[%s5118_s11 + $0x88] ss:$16 sps:$4 sm:$0xff]   ;;  %v4518_v54 = vld [vmem:[%s5118_s11 + $0xa4] ss:$16 sps:$4 sm:$0xff]   ;;  %v4520_v55 = vld [vmem:[%s5118_s11 + $0xac] ss:$16 sps:$4 sm:$0xff]  }
  0xa2   : > { %1770 = vmatpush1.bf16.msra.mxu0 %v4464_v10  ;;  %2059 = vmatpush1.bf16.msra.mxu1 %v4465_v11  ;;  %v4522_v56 = vld [vmem:[%s5118_s11 + $0xa0] ss:$16 sps:$4 sm:$0xff]   ;;  %v4523_v57 = vld [vmem:[%s5118_s11 + $0xa8] ss:$16 sps:$4 sm:$0xff]   ;;  %v4524_v58 = vld [vmem:[%s5118_s11 + $0xc4] ss:$16 sps:$4 sm:$0xff]  }
  0xa3   : > { %1771 = vmatprep.subr.bf16.mxu0 %v4737_v2  ;;  %2060 = vmatprep.subr.bf16.mxu1 %v4737_v2  ;;  %v4526_v59 = vld [vmem:[%s5118_s11 + $0xcc] ss:$16 sps:$4 sm:$0xff]   ;;  %v4528_v60 = vld [vmem:[%s5118_s11 + $0xc0] ss:$16 sps:$4 sm:$0xff]   ;;  %v4529_v61 = vld [vmem:[%s5118_s11 + $0xc8] ss:$16 sps:$4 sm:$0xff]  }
  0xa4   : > { %v4530_v62 = vld [vmem:[%s5118_s11 + $0xe4] ss:$16 sps:$4 sm:$0xff]   ;;  %v4532_v63 = vld [vmem:[%s5118_s11 + $0xec] ss:$16 sps:$4 sm:$0xff]   ;;  %v4534_v0 = vld [vmem:[%s5118_s11 + $0xe0] ss:$16 sps:$4 sm:$0xff]  }
  0xa5   : > { %v4535_v1 = vld [vmem:[%s5118_s11 + $0xe8] ss:$16 sps:$4 sm:$0xff]   ;;  %v4538_v3 = vld [vmem:[%s5118_s11 + $0x10c] ss:$16 sps:$4 sm:$0xff]   ;;  %v4540_v4 = vld [vmem:[%s5118_s11 + $0x100] ss:$16 sps:$4 sm:$0xff]  }
  0xa6   : > { %1772 = vmatpush1.bf16.msra.mxu0 %v4466_v12  ;;  %2061 = vmatpush1.bf16.msra.mxu1 %v4467_v13  ;;  %v4541_v5 = vld [vmem:[%s5118_s11 + $0x108] ss:$16 sps:$4 sm:$0xff]   ;;  %v4542_v6 = vld [vmem:[%s5118_s11 + $0x124] ss:$16 sps:$4 sm:$0xff]   ;;  %v4544_v7 = vld [vmem:[%s5118_s11 + $0x12c] ss:$16 sps:$4 sm:$0xff]  }
  0xa7   : > { %1773 = vmatprep.subr.bf16.mxu0 %v4737_v2  ;;  %2062 = vmatprep.subr.bf16.mxu1 %v4737_v2  ;;  %v4546_v8 = vld [vmem:[%s5118_s11 + $0x120] ss:$16 sps:$4 sm:$0xff]   ;;  %v4547_v9 = vld [vmem:[%s5118_s11 + $0x128] ss:$16 sps:$4 sm:$0xff]   ;;  %v4548_v10 = vld [vmem:[%s5118_s11 + $0x144] ss:$16 sps:$4 sm:$0xff]  }
  0xa8   : > { %v4550_v11 = vld [vmem:[%s5118_s11 + $0x14c] ss:$16 sps:$4 sm:$0xff]   ;;  %v4552_v12 = vld [vmem:[%s5118_s11 + $0x140] ss:$16 sps:$4 sm:$0xff]   ;;  %v4553_v13 = vld [vmem:[%s5118_s11 + $0x148] ss:$16 sps:$4 sm:$0xff]  }
  0xa9   : > { %v4564_v20 = vld [vmem:[%s5118_s11 + $0x180] ss:$16 sps:$4 sm:$0xff]   ;;  %v4566_v22 = vld [vmem:[%s5118_s11 + $0x1a4] ss:$16 sps:$4 sm:$0xff]  }
  0xaa   : > { %1774 = vmatpush1.bf16.msra.mxu0 %v4468_v14  ;;  %2063 = vmatpush1.bf16.msra.mxu1 %v4469_v15  ;;  %v4554_v14 = vld [vmem:[%s5118_s11 + $0x164] ss:$16 sps:$4 sm:$0xff]   ;;  %v4556_v15 = vld [vmem:[%s5118_s11 + $0x16c] ss:$16 sps:$4 sm:$0xff]  }
  0xab   : > { %1775 = vmatprep.subr.bf16.mxu0 %v4737_v2  ;;  %2064 = vmatprep.subr.bf16.mxu1 %v4737_v2 }
  0xae   : > { %1776 = vmatpush1.bf16.msra.mxu0 %v4470_v16  ;;  %2065 = vmatpush1.bf16.msra.mxu1 %v4471_v17  ;;  %v4558_v16 = vld [vmem:[%s5118_s11 + $0x160] ss:$16 sps:$4 sm:$0xff]   ;;  %v4559_v17 = vld [vmem:[%s5118_s11 + $0x168] ss:$16 sps:$4 sm:$0xff]  }
  0xaf   : > { %1777 = vmatprep.subr.bf16.mxu0 %v4737_v2  ;;  %2066 = vmatprep.subr.bf16.mxu1 %v4737_v2 }
  0xb2   : > { %1778 = vmatpush2.bf16.msra.mxu0 %v4472_v18  ;;  %2067 = vmatpush2.bf16.msra.mxu1 %v4473_v19  ;;  %v4560_v18 = vld [vmem:[%s5118_s11 + $0x184] ss:$16 sps:$4 sm:$0xff]   ;;  %v4562_v19 = vld [vmem:[%s5118_s11 + $0x18c] ss:$16 sps:$4 sm:$0xff]  }
  0xb3   : > { %1779 = vmatprep.subr.bf16.mxu0 %v4737_v2  ;;  %2068 = vmatprep.subr.bf16.mxu1 %v4737_v2 }
  0xb6   : > { %1780 = vmatpush2.bf16.msra.mxu0 %v4474_v21  ;;  %2069 = vmatpush2.bf16.msra.mxu1 %v4475_v23  ;;  %v4565_v21 = vld [vmem:[%s5118_s11 + $0x188] ss:$16 sps:$4 sm:$0xff]   ;;  %v4568_v23 = vld [vmem:[%s5118_s11 + $0x1ac] ss:$16 sps:$4 sm:$0xff]  }
  0xb7   : > { %1781 = vmatprep.subr.bf16.mxu0 %v4737_v2  ;;  %2070 = vmatprep.subr.bf16.mxu1 %v4737_v2 }
  0xba   : > { %1782 = vmatpush2.bf16.msra.mxu0 %v4476_v24  ;;  %2071 = vmatpush2.bf16.msra.mxu1 %v4477_v25  ;;  %v4570_v24 = vld [vmem:[%s5118_s11 + $0x1a0] ss:$16 sps:$4 sm:$0xff]   ;;  %v4571_v25 = vld [vmem:[%s5118_s11 + $0x1a8] ss:$16 sps:$4 sm:$0xff]  }
  0xbb   : > { %1783 = vmatprep.subr.bf16.mxu0 %v4737_v2  ;;  %2072 = vmatprep.subr.bf16.mxu1 %v4737_v2 }
  0xbe   : > { %1784 = vmatpush2.bf16.msra.mxu0 %v4478_v26  ;;  %2073 = vmatpush2.bf16.msra.mxu1 %v4479_v27  ;;  %v4572_v26 = vld [vmem:[%s5118_s11 + $0x1c4] ss:$16 sps:$4 sm:$0xff]   ;;  %v4574_v27 = vld [vmem:[%s5118_s11 + $0x1cc] ss:$16 sps:$4 sm:$0xff]  }
  0xbf   : > { %1785 = vmatprep.subr.bf16.mxu0 %v4737_v2  ;;  %2074 = vmatprep.subr.bf16.mxu1 %v4737_v2 }
  0xc2   : > { %1786 = vmatpush2.bf16.msra.mxu0 %v4480_v28  ;;  %2075 = vmatpush2.bf16.msra.mxu1 %v4481_v29  ;;  %v4576_v28 = vld [vmem:[%s5118_s11 + $0x1c0] ss:$16 sps:$4 sm:$0xff]   ;;  %v4577_v29 = vld [vmem:[%s5118_s11 + $0x1c8] ss:$16 sps:$4 sm:$0xff]  }
  0xc3   : > { %1787 = vmatprep.subr.bf16.mxu0 %v4737_v2  ;;  %2076 = vmatprep.subr.bf16.mxu1 %v4737_v2 }
  0xc6   : > { %1788 = vmatpush2.bf16.msra.mxu0 %v4482_v30  ;;  %2077 = vmatpush2.bf16.msra.mxu1 %v4483_v31  ;;  %v4578_v30 = vld [vmem:[%s5118_s11 + $0x1e4] ss:$16 sps:$4 sm:$0xff]   ;;  %v4580_v31 = vld [vmem:[%s5118_s11 + $0x1ec] ss:$16 sps:$4 sm:$0xff]  }
  0xc7   : > { %1789 = vmatprep.subr.bf16.mxu0 %v4737_v2  ;;  %2078 = vmatprep.subr.bf16.mxu1 %v4737_v2 }
  0xca   : > { %1790 = vmatpush2.bf16.msra.mxu0 %v4484_v32  ;;  %2079 = vmatpush2.bf16.msra.mxu1 %v4485_v33  ;;  %v4582_v32 = vld [vmem:[%s5118_s11 + $0x1e0] ss:$16 sps:$4 sm:$0xff]   ;;  %v4583_v33 = vld [vmem:[%s5118_s11 + $0x1e8] ss:$16 sps:$4 sm:$0xff]  }
  0xcb   : > { %1791 = vmatprep.subr.bf16.mxu0 %v4737_v2  ;;  %2080 = vmatprep.subr.bf16.mxu1 %v4737_v2  ;;  %v4536_v2 = vld [vmem:[%s5118_s11 + $0x104] ss:$16 sps:$4 sm:$0xff]  }
  0xce   : > { %1792 = vmatpush2.bf16.msra.mxu0 %v4486_v34  ;;  %2081 = vmatpush2.bf16.msra.mxu1 %v4487_v35  ;;  %v4584_v34 = vld [vmem:[%s5118_s11 + $0x204] ss:$16 sps:$4 sm:$0xff]   ;;  %v4586_v35 = vld [vmem:[%s5118_s11 + $0x20c] ss:$16 sps:$4 sm:$0xff]  }
  0xd1   : > { %1794 = vmatmul.mubr.bf16.vlgmr.msra.gmra.mxu0 %v4488_v36  ;;  %2083 = vmatmul.mubr.bf16.vlgmr.msra.gmra.mxu1 %v4491_v37  ;;  %v4588_v36 = vld [vmem:[%s5118_s11 + $0x200] ss:$16 sps:$4 sm:$0xff]   ;;  %v4589_v37 = vld [vmem:[%s5118_s11 + $0x208] ss:$16 sps:$4 sm:$0xff]  }
  0xd2   : > { %1801 = vmatprep.mubr.bf16.mxu0 %v4494_v38  ;;  %2090 = vmatprep.mubr.bf16.mxu1 %v4496_v39  ;;  %v4590_v38 = vld [vmem:[%s5118_s11 + $0x224] ss:$16 sps:$4 sm:$0xff]   ;;  %v4592_v39 = vld [vmem:[%s5118_s11 + $0x22c] ss:$16 sps:$4 sm:$0xff]  }
  0xd9   : > { %1802 = vmatmul.mubr.bf16.gmra.mxu0 %v4498_v40  ;;  %2091 = vmatmul.mubr.bf16.gmra.mxu1 %v4499_v41  ;;  %v4594_v40 = vld [vmem:[%s5118_s11 + $0x220] ss:$16 sps:$4 sm:$0xff]   ;;  %v4595_v41 = vld [vmem:[%s5118_s11 + $0x228] ss:$16 sps:$4 sm:$0xff]  }
  0xda   : > { %1809 = vmatprep.mubr.bf16.mxu0 %v4500_v42  ;;  %2098 = vmatprep.mubr.bf16.mxu1 %v4502_v43  ;;  %v4596_v42 = vld [vmem:[%s5118_s11 + $0x244] ss:$16 sps:$4 sm:$0xff]   ;;  %v4598_v43 = vld [vmem:[%s5118_s11 + $0x24c] ss:$16 sps:$4 sm:$0xff]  }
  0xe1   : > { %1810 = vmatmul.mubr.bf16.gmra.mxu0 %v4504_v44  ;;  %2099 = vmatmul.mubr.bf16.gmra.mxu1 %v4505_v45  ;;  %v4600_v44 = vld [vmem:[%s5118_s11 + $0x240] ss:$16 sps:$4 sm:$0xff]   ;;  %v4601_v45 = vld [vmem:[%s5118_s11 + $0x248] ss:$16 sps:$4 sm:$0xff]  }
  0xe2   : > { %1817 = vmatprep.mubr.bf16.mxu0 %v4506_v46  ;;  %2106 = vmatprep.mubr.bf16.mxu1 %v4508_v47  ;;  %v4602_v46 = vld [vmem:[%s5118_s11 + $0x264] ss:$16 sps:$4 sm:$0xff]   ;;  %v4604_v47 = vld [vmem:[%s5118_s11 + $0x26c] ss:$16 sps:$4 sm:$0xff]  }
  0xe9   : > { %1818 = vmatmul.mubr.bf16.gmra.mxu0 %v4510_v48  ;;  %2107 = vmatmul.mubr.bf16.gmra.mxu1 %v4511_v49  ;;  %v4606_v48 = vld [vmem:[%s5118_s11 + $0x260] ss:$16 sps:$4 sm:$0xff]   ;;  %v4607_v49 = vld [vmem:[%s5118_s11 + $0x268] ss:$16 sps:$4 sm:$0xff]  }
  0xea   : > { %1825 = vmatprep.mubr.bf16.mxu0 %v4512_v50  ;;  %2114 = vmatprep.mubr.bf16.mxu1 %v4514_v51  ;;  %v4608_v50 = vld [vmem:[%s5118_s11 + $0x284] ss:$16 sps:$4 sm:$0xff]   ;;  %v4610_v51 = vld [vmem:[%s5118_s11 + $0x28c] ss:$16 sps:$4 sm:$0xff]  }
  0xf1   : > { %1826 = vmatmul.mubr.bf16.gmra.mxu0 %v4516_v52  ;;  %2115 = vmatmul.mubr.bf16.gmra.mxu1 %v4517_v53  ;;  %v4612_v52 = vld [vmem:[%s5118_s11 + $0x280] ss:$16 sps:$4 sm:$0xff]   ;;  %v4613_v53 = vld [vmem:[%s5118_s11 + $0x288] ss:$16 sps:$4 sm:$0xff]  }
  0xf2   : > { %1833 = vmatprep.mubr.bf16.mxu0 %v4518_v54  ;;  %2122 = vmatprep.mubr.bf16.mxu1 %v4520_v55  ;;  %v4614_v54 = vld [vmem:[%s5118_s11 + $0x2a4] ss:$16 sps:$4 sm:$0xff]   ;;  %v4616_v55 = vld [vmem:[%s5118_s11 + $0x2ac] ss:$16 sps:$4 sm:$0xff]  }
  0xf9   : > { %1834 = vmatmul.mubr.bf16.gmra.mxu0 %v4522_v56  ;;  %2123 = vmatmul.mubr.bf16.gmra.mxu1 %v4523_v57  ;;  %v4618_v56 = vld [vmem:[%s5118_s11 + $0x2a0] ss:$16 sps:$4 sm:$0xff]   ;;  %v4619_v57 = vld [vmem:[%s5118_s11 + $0x2a8] ss:$16 sps:$4 sm:$0xff]  }
  0xfa   : > { %1841 = vmatprep.mubr.bf16.mxu0 %v4524_v58  ;;  %2130 = vmatprep.mubr.bf16.mxu1 %v4526_v59  ;;  %v4620_v58 = vld [vmem:[%s5118_s11 + $0x2c4] ss:$16 sps:$4 sm:$0xff]   ;;  %v4622_v59 = vld [vmem:[%s5118_s11 + $0x2cc] ss:$16 sps:$4 sm:$0xff]  }
 0x101   : > { %1842 = vmatmul.mubr.bf16.gmra.mxu0 %v4528_v60  ;;  %2131 = vmatmul.mubr.bf16.gmra.mxu1 %v4529_v61  ;;  %v4624_v60 = vld [vmem:[%s5118_s11 + $0x2c0] ss:$16 sps:$4 sm:$0xff]   ;;  %v4625_v61 = vld [vmem:[%s5118_s11 + $0x2c8] ss:$16 sps:$4 sm:$0xff]  }
 0x102   : > { %1849 = vmatprep.mubr.bf16.mxu0 %v4530_v62  ;;  %2138 = vmatprep.mubr.bf16.mxu1 %v4532_v63  ;;  %v4626_v62 = vld [vmem:[%s5118_s11 + $0x2e4] ss:$16 sps:$4 sm:$0xff]   ;;  %v4628_v63 = vld [vmem:[%s5118_s11 + $0x2ec] ss:$16 sps:$4 sm:$0xff]  }
 0x109   : > { %1850 = vmatmul.mubr.bf16.gmra.mxu0 %v4534_v0  ;;  %2139 = vmatmul.mubr.bf16.gmra.mxu1 %v4535_v1  ;;  %v4630_v0 = vld [vmem:[%s5118_s11 + $0x2e0] ss:$16 sps:$4 sm:$0xff]   ;;  %v4631_v1 = vld [vmem:[%s5118_s11 + $0x2e8] ss:$16 sps:$4 sm:$0xff]  }
 0x10a   : > { %1857 = vmatprep.mubr.bf16.mxu0 %v4536_v2  ;;  %2146 = vmatprep.mubr.bf16.mxu1 %v4538_v3  ;;  %v4632_v2 = vld [vmem:[%s5118_s11 + $0x304] ss:$16 sps:$4 sm:$0xff]   ;;  %v4634_v3 = vld [vmem:[%s5118_s11 + $0x30c] ss:$16 sps:$4 sm:$0xff]  }
 0x111   : > { %1858 = vmatmul.mubr.bf16.gmra.mxu0 %v4540_v4  ;;  %2147 = vmatmul.mubr.bf16.gmra.mxu1 %v4541_v5  ;;  %v4636_v4 = vld [vmem:[%s5118_s11 + $0x300] ss:$16 sps:$4 sm:$0xff]   ;;  %v4637_v5 = vld [vmem:[%s5118_s11 + $0x308] ss:$16 sps:$4 sm:$0xff]  }
 0x112   : > { %1865 = vmatprep.mubr.bf16.mxu0 %v4542_v6  ;;  %2154 = vmatprep.mubr.bf16.mxu1 %v4544_v7  ;;  %v4638_v6 = vld [vmem:[%s5118_s11 + $0x324] ss:$16 sps:$4 sm:$0xff]   ;;  %v4640_v7 = vld [vmem:[%s5118_s11 + $0x32c] ss:$16 sps:$4 sm:$0xff]  }
 0x119   : > { %1866 = vmatmul.mubr.bf16.gmra.mxu0 %v4546_v8  ;;  %2155 = vmatmul.mubr.bf16.gmra.mxu1 %v4547_v9  ;;  %v673_v9 = vld [vmem:[#allocation2 + $0xb0] sm:$0xff] }
 0x11a   : > { %1873 = vmatprep.mubr.bf16.mxu0 %v4548_v10  ;;  %2162 = vmatprep.mubr.bf16.mxu1 %v4550_v11 }
 0x121   : > { %1874 = vmatmul.mubr.bf16.gmra.mxu0 %v4552_v12  ;;  %2163 = vmatmul.mubr.bf16.gmra.mxu1 %v4553_v13 }
 0x122   : > { %1881 = vmatprep.mubr.bf16.mxu0 %v4554_v14  ;;  %2170 = vmatprep.mubr.bf16.mxu1 %v4556_v15 }
 0x129   : > { %1882 = vmatmul.mubr.bf16.gmra.mxu0 %v4558_v16  ;;  %2171 = vmatmul.mubr.bf16.gmra.mxu1 %v4559_v17  ;;  %v4642_v16 = vld [vmem:[%s5118_s11 + $0x320] ss:$16 sps:$4 sm:$0xff]  }
 0x12a   : > { %1889 = vmatprep.mubr.bf16.mxu0 %v4560_v18  ;;  %2178 = vmatprep.mubr.bf16.mxu1 %v4562_v19  ;;  %v674_v17 = vld [vmem:[#allocation2 + $0x1b0] sm:$0xff]  ;;  %v4643_v19 = vld [vmem:[%s5118_s11 + $0x328] ss:$16 sps:$4 sm:$0xff]  }
 0x131   : > { %1890 = vmatmul.mubr.bf16.gmra.mxu0 %v4564_v20  ;;  %2179 = vmatmul.mubr.bf16.gmra.mxu1 %v4565_v21  ;;  %v4644_v20 = vld [vmem:[%s5118_s11 + $0x344] ss:$16 sps:$4 sm:$0xff]  }
 0x132   : > { %1897 = vmatprep.mubr.bf16.mxu0 %v4566_v22  ;;  %2186 = vmatprep.mubr.bf16.mxu1 %v4568_v23  ;;  %v4646_v23 = vld [vmem:[%s5118_s11 + $0x34c] ss:$16 sps:$4 sm:$0xff]  }
 0x139   : > { %1898 = vmatmul.mubr.bf16.gmra.mxu0 %v4570_v24  ;;  %2187 = vmatmul.mubr.bf16.gmra.mxu1 %v4571_v25 }
 0x13a   : > { %1905 = vmatprep.mubr.bf16.mxu0 %v4572_v26  ;;  %2194 = vmatprep.mubr.bf16.mxu1 %v4574_v27  ;;  %v675_v27 = vld [vmem:[#allocation2 + $0xd8] sm:$0xff] }
 0x141   : > { %1906 = vmatmul.mubr.bf16.gmra.mxu0 %v4576_v28  ;;  %2195 = vmatmul.mubr.bf16.gmra.mxu1 %v4577_v29 }
 0x142   : > { %1913 = vmatprep.mubr.bf16.mxu0 %v4578_v30  ;;  %2202 = vmatprep.mubr.bf16.mxu1 %v4580_v31 }
 0x149   : > { %1914 = vmatmul.mubr.bf16.gmra.mxu0 %v4582_v32  ;;  %2203 = vmatmul.mubr.bf16.gmra.mxu1 %v4583_v33 }
 0x14a   : > { %1921 = vmatprep.mubr.bf16.mxu0 %v4584_v34  ;;  %2210 = vmatprep.mubr.bf16.mxu1 %v4586_v35  ;;  %v4648_v34 = vld [vmem:[%s5118_s11 + $0x340] ss:$16 sps:$4 sm:$0xff]   ;;  %v676_v35 = vld [vmem:[#allocation2 + $0x18] sm:$0xff] }
 0x151   : > { %1922 = vmatmul.mubr.bf16.gmra.mxu0 %v4588_v36  ;;  %2211 = vmatmul.mubr.bf16.gmra.mxu1 %v4589_v37  ;;  %v4649_v37 = vld [vmem:[%s5118_s11 + $0x348] ss:$16 sps:$4 sm:$0xff]  }
 0x152   : > { %1929 = vmatprep.mubr.bf16.mxu0 %v4590_v38  ;;  %2218 = vmatprep.mubr.bf16.mxu1 %v4592_v39  ;;  %v4650_v38 = vld [vmem:[%s5118_s11 + $0x364] ss:$16 sps:$4 sm:$0xff]  }
 0x159   : > { %1930 = vmatmul.mubr.bf16.gmra.mxu0 %v4594_v40  ;;  %2219 = vmatmul.mubr.bf16.gmra.mxu1 %v4595_v41  ;;  %v4652_v41 = vld [vmem:[%s5118_s11 + $0x36c] ss:$16 sps:$4 sm:$0xff]  }
 0x15a   : > { %1937 = vmatprep.mubr.bf16.mxu0 %v4596_v42  ;;  %2226 = vmatprep.mubr.bf16.mxu1 %v4598_v43 }
 0x161   : > { %1938 = vmatmul.mubr.bf16.gmra.mxu0 %v4600_v44  ;;  %2227 = vmatmul.mubr.bf16.gmra.mxu1 %v4601_v45  ;;  %v677_v45 = vld [vmem:[#allocation2 + $0x50] sm:$0xff] }
 0x162   : > { %1945 = vmatprep.mubr.bf16.mxu0 %v4602_v46  ;;  %2234 = vmatprep.mubr.bf16.mxu1 %v4604_v47 }
 0x169   : > { %1946 = vmatmul.mubr.bf16.gmra.mxu0 %v4606_v48  ;;  %2235 = vmatmul.mubr.bf16.gmra.mxu1 %v4607_v49 }
 0x16a   : > { %1953 = vmatprep.mubr.bf16.mxu0 %v4608_v50  ;;  %2242 = vmatprep.mubr.bf16.mxu1 %v4610_v51 }
 0x171   : > { %1954 = vmatmul.mubr.bf16.gmra.mxu0 %v4612_v52  ;;  %2243 = vmatmul.mubr.bf16.gmra.mxu1 %v4613_v53  ;;  %v4654_v52 = vld [vmem:[%s5118_s11 + $0x360] ss:$16 sps:$4 sm:$0xff]   ;;  %v678_v53 = vld [vmem:[#allocation2 + $0x168] sm:$0xff] }
 0x172   : > { %1961 = vmatprep.mubr.bf16.mxu0 %v4614_v54  ;;  %2250 = vmatprep.mubr.bf16.mxu1 %v4616_v55  ;;  %v4655_v55 = vld [vmem:[%s5118_s11 + $0x368] ss:$16 sps:$4 sm:$0xff]  }
 0x179   : > { %1962 = vmatmul.mubr.bf16.gmra.mxu0 %v4618_v56  ;;  %2251 = vmatmul.mubr.bf16.gmra.mxu1 %v4619_v57  ;;  %v4658_v56 = vld [vmem:[%s5118_s11 + $0x384] ss:$16 sps:$4 sm:$0xff]  }
 0x17a   : > { %1969 = vmatprep.mubr.bf16.mxu0 %v4620_v58  ;;  %2258 = vmatprep.mubr.bf16.mxu1 %v4622_v59  ;;  %v4661_v59 = vld [vmem:[%s5118_s11 + $0x38c] ss:$16 sps:$4 sm:$0xff]  }
 0x181   : > { %1970 = vmatmul.mubr.bf16.gmra.mxu0 %v4624_v60  ;;  %2259 = vmatmul.mubr.bf16.gmra.mxu1 %v4625_v61 }
 0x182   : > { %1977 = vmatprep.mubr.bf16.mxu0 %v4626_v62  ;;  %2266 = vmatprep.mubr.bf16.mxu1 %v4628_v63  ;;  %v679_v63 = vld [vmem:[#allocation2 + $0x130] sm:$0xff] }
 0x189   : > { %1978 = vmatmul.mubr.bf16.gmra.mxu0 %v4630_v0  ;;  %2267 = vmatmul.mubr.bf16.gmra.mxu1 %v4631_v1 }
 0x18a   : > { %1985 = vmatprep.mubr.bf16.mxu0 %v4632_v2  ;;  %2274 = vmatprep.mubr.bf16.mxu1 %v4634_v3 }
 0x191   : > { %v1795_v8 = vpop.f32.mrf.mxu0  ;;  %1986 = vmatmul.mubr.bf16.gmra.mxu0 %v4636_v4  ;;  %v2084_v10 = vpop.f32.mrf.mxu1  ;;  %2275 = vmatmul.mubr.bf16.gmra.mxu1 %v4637_v5 }
 0x192   : > { %1993 = vmatprep.mubr.bf16.mxu0 %v4638_v6  ;;  %v2085_v11 = vadd.f32 %v2084_v10, %v1795_v8  ;;  %2282 = vmatprep.mubr.bf16.mxu1 %v4640_v7  ;;  %v4656_v6 = vld [vmem:[%s5118_s11 + $0x380] ss:$16 sps:$4 sm:$0xff]   ;;  %v680_v7 = vld [vmem:[#allocation2 + $0x48] sm:$0xff]  ;;  %v4664_v10 = vld [vmem:[%s5118_s11 + $0x3a4] ss:$16 sps:$4 sm:$0xff]  }
 0x193   : > { %v1797_v12 = vpop.f32.mrf.mxu0  ;;  %v2086_v13 = vpop.f32.mrf.mxu1 }
 0x194   : > { %v2339_v14 = vadd.f32 %v2085_v11, %v673_v9  ;;  %v4659_v9 = vld [vmem:[%s5118_s11 + $0x388] ss:$16 sps:$4 sm:$0xff]   ;;  %v4667_v13 = vld [vmem:[%s5118_s11 + $0x3ac] ss:$16 sps:$4 sm:$0xff]  }
 0x195   : > { %v1798_v15 = vpop.f32.mrf.mxu0  ;;  %v2087_v18 = vpop.f32.mrf.mxu1 }
 0x196   : > { %2403 = vst [vmem:[#allocation2 + $0xb0] sm:$0xff] %v2339_v14  ;;  %v2088_v21 = vadd.f32 %v2087_v18, %v1798_v15 }
 0x197   : > { %v1800_v22 = vpop.f32.mrf.mxu0  ;;  %v2089_v24 = vpop.f32.mrf.mxu1 }
 0x198   : > { %v2340_v25 = vadd.f32 %v2088_v21, %v674_v17  ;;  %v681_v17 = vld [vmem:[#allocation2 + $0x180] sm:$0xff] }
 0x199   : > { %v1803_v26 = vpop.f32.mrf.mxu0  ;;  %1994 = vmatmul.mubr.bf16.gmra.mxu0 %v4642_v16  ;;  %v2092_v28 = vpop.f32.mrf.mxu1  ;;  %2283 = vmatmul.mubr.bf16.gmra.mxu1 %v4643_v19  ;;  %v4662_v24 = vld [vmem:[%s5118_s11 + $0x3a0] ss:$16 sps:$4 sm:$0xff]  }
 0x19a   : > { %2001 = vmatprep.mubr.bf16.mxu0 %v4644_v20  ;;  %2404 = vst [vmem:[#allocation2 + $0x1b0] sm:$0xff] %v2340_v25  ;;  %v2093_v29 = vadd.f32 %v2092_v28, %v1803_v26  ;;  %2290 = vmatprep.mubr.bf16.mxu1 %v4646_v23  ;;  %v682_v25 = vld [vmem:[#allocation2 + $0x110] sm:$0xff] }
 0x19b   : > { %v1805_v30 = vpop.f32.mrf.mxu0  ;;  %v2094_v31 = vpop.f32.mrf.mxu1  ;;  %v4670_v28 = vld [vmem:[%s5118_s11 + $0x3c4] ss:$16 sps:$4 sm:$0xff]  }
 0x19c   : > { %v2341_v32 = vadd.f32 %v2093_v29, %v675_v27  ;;  %v4665_v27 = vld [vmem:[%s5118_s11 + $0x3a8] ss:$16 sps:$4 sm:$0xff]   ;;  %v4673_v31 = vld [vmem:[%s5118_s11 + $0x3cc] ss:$16 sps:$4 sm:$0xff]  }
 0x19d   : > { %v1806_v33 = vpop.f32.mrf.mxu0  ;;  %v2095_v36 = vpop.f32.mrf.mxu1 }
 0x19e   : > { %2405 = vst [vmem:[#allocation2 + $0xd8] sm:$0xff] %v2341_v32  ;;  %v2096_v39 = vadd.f32 %v2095_v36, %v1806_v33 }
 0x19f   : > { %v1808_v40 = vpop.f32.mrf.mxu0  ;;  %v2097_v42 = vpop.f32.mrf.mxu1 }
 0x1a0   : > { %v2342_v43 = vadd.f32 %v2096_v39, %v676_v35  ;;  %v683_v35 = vld [vmem:[#allocation2 + $0x118] sm:$0xff]  ;;  %v4668_v42 = vld [vmem:[%s5118_s11 + $0x3c0] ss:$16 sps:$4 sm:$0xff]  }
 0x1a1   : > { %v1811_v44 = vpop.f32.mrf.mxu0  ;;  %2002 = vmatmul.mubr.bf16.gmra.mxu0 %v4648_v34  ;;  %v2100_v46 = vpop.f32.mrf.mxu1  ;;  %2291 = vmatmul.mubr.bf16.gmra.mxu1 %v4649_v37 }
 0x1a2   : > { %2009 = vmatprep.mubr.bf16.mxu0 %v4650_v38  ;;  %2406 = vst [vmem:[#allocation2 + $0x18] sm:$0xff] %v2342_v43  ;;  %v2101_v47 = vadd.f32 %v2100_v46, %v1811_v44  ;;  %2298 = vmatprep.mubr.bf16.mxu1 %v4652_v41  ;;  %v684_v43 = vld [vmem:[#allocation2 + $0x98] sm:$0xff]  ;;  %v4676_v46 = vld [vmem:[%s5118_s11 + $0x3e4] ss:$16 sps:$4 sm:$0xff]  }
 0x1a3   : > { %v1813_v48 = vpop.f32.mrf.mxu0  ;;  %v2102_v49 = vpop.f32.mrf.mxu1 }
 0x1a4   : > { %v2343_v50 = vadd.f32 %v2101_v47, %v677_v45  ;;  %v4671_v45 = vld [vmem:[%s5118_s11 + $0x3c8] ss:$16 sps:$4 sm:$0xff]   ;;  %v4679_v49 = vld [vmem:[%s5118_s11 + $0x3ec] ss:$16 sps:$4 sm:$0xff]  }
 0x1a5   : > { %v1814_v51 = vpop.f32.mrf.mxu0  ;;  %v2103_v54 = vpop.f32.mrf.mxu1 }
 0x1a6   : > { %2407 = vst [vmem:[#allocation2 + $0x50] sm:$0xff] %v2343_v50  ;;  %v2104_v57 = vadd.f32 %v2103_v54, %v1814_v51 }
 0x1a7   : > { %v1816_v58 = vpop.f32.mrf.mxu0  ;;  %v2105_v60 = vpop.f32.mrf.mxu1 }
 0x1a8   : > { %v2344_v61 = vadd.f32 %v2104_v57, %v678_v53  ;;  %v685_v53 = vld [vmem:[#allocation2 + $0x120] sm:$0xff] }
 0x1a9   : > { %v1819_v62 = vpop.f32.mrf.mxu0  ;;  %2010 = vmatmul.mubr.bf16.gmra.mxu0 %v4654_v52  ;;  %v2108_v0 = vpop.f32.mrf.mxu1  ;;  %2299 = vmatmul.mubr.bf16.gmra.mxu1 %v4655_v55  ;;  %v4674_v60 = vld [vmem:[%s5118_s11 + $0x3e0] ss:$16 sps:$4 sm:$0xff]  }
 0x1aa   : > { %2017 = vmatprep.mubr.bf16.mxu0 %v4658_v56  ;;  %2408 = vst [vmem:[#allocation2 + $0x168] sm:$0xff] %v2344_v61  ;;  %v2109_v1 = vadd.f32 %v2108_v0, %v1819_v62  ;;  %2306 = vmatprep.mubr.bf16.mxu1 %v4661_v59  ;;  %v686_v61 = vld [vmem:[#allocation2 + $0x150] sm:$0xff] }
 0x1ab   : > { %v1821_v2 = vpop.f32.mrf.mxu0  ;;  %v2110_v3 = vpop.f32.mrf.mxu1 }
 0x1ac   : > { %v2345_v4 = vadd.f32 %v2109_v1, %v679_v63  ;;  %v4677_v63 = vld [vmem:[%s5118_s11 + $0x3e8] ss:$16 sps:$4 sm:$0xff]  }
 0x1ad   : > { %v1822_v5 = vpop.f32.mrf.mxu0  ;;  %v2111_v8 = vpop.f32.mrf.mxu1 }
 0x1ae   : > { %2409 = vst [vmem:[#allocation2 + $0x130] sm:$0xff] %v2345_v4  ;;  %v2112_v11 = vadd.f32 %v2111_v8, %v1822_v5  ;;  %v687_v5 = vld [vmem:[#allocation2 + $0x108] sm:$0xff] }
 0x1af   : > { %v1824_v12 = vpop.f32.mrf.mxu0  ;;  %v2113_v14 = vpop.f32.mrf.mxu1 }
 0x1b0   : > { %v2346_v15 = vadd.f32 %v2112_v11, %v680_v7  ;;  %v688_v12 = vld [vmem:[#allocation2 + $0x60] sm:$0xff] }
 0x1b1   : > { %v1827_v16 = vpop.f32.mrf.mxu0  ;;  %2018 = vmatmul.mubr.bf16.gmra.mxu0 %v4656_v6  ;;  %v2116_v18 = vpop.f32.mrf.mxu1  ;;  %2307 = vmatmul.mubr.bf16.gmra.mxu1 %v4659_v9 }
 0x1b2   : > { %2025 = vmatprep.mubr.bf16.mxu0 %v4664_v10  ;;  %2410 = vst [vmem:[#allocation2 + $0x48] sm:$0xff] %v2346_v15  ;;  %v2117_v19 = vadd.f32 %v2116_v18, %v1827_v16  ;;  %2314 = vmatprep.mubr.bf16.mxu1 %v4667_v13 }
 0x1b3   : > { %v1829_v20 = vpop.f32.mrf.mxu0  ;;  %v2118_v21 = vpop.f32.mrf.mxu1 }
 0x1b4   : > { %v2347_v22 = vadd.f32 %v2117_v19, %v681_v17  ;;  %v689_v19 = vld [vmem:[#allocation2 + $0xe0] sm:$0xff] }
 0x1b5   : > { %v1830_v23 = vpop.f32.mrf.mxu0  ;;  %v2119_v26 = vpop.f32.mrf.mxu1 }
 0x1b6   : > { %2411 = vst [vmem:[#allocation2 + $0x180] sm:$0xff] %v2347_v22  ;;  %v2120_v29 = vadd.f32 %v2119_v26, %v1830_v23  ;;  %v690_v26 = vld [vmem:[#allocation2 + $0x188] sm:$0xff] }
 0x1b7   : > { %v1832_v30 = vpop.f32.mrf.mxu0  ;;  %v2121_v32 = vpop.f32.mrf.mxu1 }
 0x1b8   : > { %v2348_v33 = vadd.f32 %v2120_v29, %v682_v25 }
 0x1b9   : > { %v1835_v34 = vpop.f32.mrf.mxu0  ;;  %2026 = vmatmul.mubr.bf16.gmra.mxu0 %v4662_v24  ;;  %v2124_v36 = vpop.f32.mrf.mxu1  ;;  %2315 = vmatmul.mubr.bf16.gmra.mxu1 %v4665_v27 }
 0x1ba   : > { %2033 = vmatprep.mubr.bf16.mxu0 %v4670_v28  ;;  %2412 = vst [vmem:[#allocation2 + $0x110] sm:$0xff] %v2348_v33  ;;  %v2125_v37 = vadd.f32 %v2124_v36, %v1835_v34  ;;  %2322 = vmatprep.mubr.bf16.mxu1 %v4673_v31  ;;  %v691_v33 = vld [vmem:[#allocation2 + $0x138] sm:$0xff] }
 0x1bb   : > { %v1837_v38 = vpop.f32.mrf.mxu0  ;;  %v2126_v39 = vpop.f32.mrf.mxu1 }
 0x1bc   : > { %v2349_v40 = vadd.f32 %v2125_v37, %v683_v35 }
 0x1bd   : > { %v1838_v41 = vpop.f32.mrf.mxu0  ;;  %v2127_v44 = vpop.f32.mrf.mxu1 }
 0x1be   : > { %2413 = vst [vmem:[#allocation2 + $0x118] sm:$0xff] %v2349_v40  ;;  %v2128_v47 = vadd.f32 %v2127_v44, %v1838_v41  ;;  %v692_v40 = vld [vmem:[#allocation2 + $0x140] sm:$0xff] }
 0x1bf   : > { %v1840_v48 = vpop.f32.mrf.mxu0  ;;  %v2129_v50 = vpop.f32.mrf.mxu1 }
 0x1c0   : > { %v2350_v51 = vadd.f32 %v2128_v47, %v684_v43  ;;  %v693_v47 = vld [vmem:[#allocation2 + $0x80] sm:$0xff] }
 0x1c1   : > { %v1843_v52 = vpop.f32.mrf.mxu0  ;;  %2034 = vmatmul.mubr.bf16.gmra.mxu0 %v4668_v42  ;;  %v2132_v54 = vpop.f32.mrf.mxu1  ;;  %2323 = vmatmul.mubr.bf16.gmra.mxu1 %v4671_v45 }
 0x1c2   : > { %2041 = vmatprep.mubr.bf16.mxu0 %v4676_v46  ;;  %2414 = vst [vmem:[#allocation2 + $0x98] sm:$0xff] %v2350_v51  ;;  %v2133_v55 = vadd.f32 %v2132_v54, %v1843_v52  ;;  %2330 = vmatprep.mubr.bf16.mxu1 %v4679_v49  ;;  %v694_v54 = vld [vmem:[#allocation2 + $0x1a8] sm:$0xff] }
 0x1c3   : > { %v1845_v56 = vpop.f32.mrf.mxu0  ;;  %v2134_v57 = vpop.f32.mrf.mxu1 }
 0x1c4   : > { %v2351_v58 = vadd.f32 %v2133_v55, %v685_v53 }
 0x1c5   : > { %v1846_v59 = vpop.f32.mrf.mxu0  ;;  %v2135_v62 = vpop.f32.mrf.mxu1 }
 0x1c6   : > { %2415 = vst [vmem:[#allocation2 + $0x120] sm:$0xff] %v2351_v58  ;;  %v2136_v0 = vadd.f32 %v2135_v62, %v1846_v59 }
 0x1c7   : > { %v1848_v1 = vpop.f32.mrf.mxu0  ;;  %v2137_v2 = vpop.f32.mrf.mxu1 }
 0x1c8   : > { %v2352_v3 = vadd.f32 %v2136_v0, %v686_v61  ;;  %v695_v61 = vld [vmem:[#allocation2 + $0x1b8] sm:$0xff] }
 0x1c9   : > { %v1851_v4 = vpop.f32.mrf.mxu0  ;;  %2042 = vmatmul.mubr.bf16.gmra.mxu0 %v4674_v60  ;;  %v2140_v6 = vpop.f32.mrf.mxu1  ;;  %2331 = vmatmul.mubr.bf16.gmra.mxu1 %v4677_v63 }
 0x1ca   : > { %2416 = vst [vmem:[#allocation2 + $0x150] sm:$0xff] %v2352_v3  ;;  %v2141_v7 = vadd.f32 %v2140_v6, %v1851_v4  ;;  %v696_v4 = vld [vmem:[#allocation2 + $0x28] sm:$0xff] }
 0x1cb   : > { %v1853_v8 = vpop.f32.mrf.mxu0  ;;  %v2142_v9 = vpop.f32.mrf.mxu1 }
 0x1cc   : > { %v2353_v10 = vadd.f32 %v2141_v7, %v687_v5 }
 0x1cd   : > { %v1854_v11 = vpop.f32.mrf.mxu0  ;;  %v2143_v13 = vpop.f32.mrf.mxu1 }
 0x1ce   : > { %2417 = vst [vmem:[#allocation2 + $0x108] sm:$0xff] %v2353_v10  ;;  %v2144_v14 = vadd.f32 %v2143_v13, %v1854_v11  ;;  %v697_v11 = vld [vmem:[#allocation2 + $0x1e8] sm:$0xff] }
 0x1cf   : > { %v1856_v15 = vpop.f32.mrf.mxu0  ;;  %v2145_v16 = vpop.f32.mrf.mxu1 }
 0x1d0   : > { %v2354_v17 = vadd.f32 %v2144_v14, %v688_v12 }
 0x1d1   : > { %v1859_v18 = vpop.f32.mrf.mxu0  ;;  %v2148_v20 = vpop.f32.mrf.mxu1 }
 0x1d2   : > { %2418 = vst [vmem:[#allocation2 + $0x60] sm:$0xff] %v2354_v17  ;;  %v2149_v21 = vadd.f32 %v2148_v20, %v1859_v18  ;;  %v698_v18 = vld [vmem:[#allocation2 + $0xf8] sm:$0xff] }
 0x1d3   : > { %v1861_v22 = vpop.f32.mrf.mxu0  ;;  %v2150_v23 = vpop.f32.mrf.mxu1 }
 0x1d4   : > { %v2355_v24 = vadd.f32 %v2149_v21, %v689_v19 }
 0x1d5   : > { %v1862_v25 = vpop.f32.mrf.mxu0  ;;  %v2151_v27 = vpop.f32.mrf.mxu1 }
 0x1d6   : > { %2419 = vst [vmem:[#allocation2 + $0xe0] sm:$0xff] %v2355_v24  ;;  %v2152_v28 = vadd.f32 %v2151_v27, %v1862_v25  ;;  %v699_v25 = vld [vmem:[#allocation2 + $0x160] sm:$0xff] }
 0x1d7   : > { %v1864_v29 = vpop.f32.mrf.mxu0  ;;  %v2153_v30 = vpop.f32.mrf.mxu1 }
 0x1d8   : > { %v2356_v31 = vadd.f32 %v2152_v28, %v690_v26 }
 0x1d9   : > { %v1867_v32 = vpop.f32.mrf.mxu0  ;;  %v2156_v34 = vpop.f32.mrf.mxu1 }
 0x1da   : > { %2420 = vst [vmem:[#allocation2 + $0x188] sm:$0xff] %v2356_v31  ;;  %v2157_v35 = vadd.f32 %v2156_v34, %v1867_v32  ;;  %v700_v32 = vld [vmem:[#allocation2 + $0x30] sm:$0xff] }
 0x1db   : > { %v1869_v36 = vpop.f32.mrf.mxu0  ;;  %v2158_v37 = vpop.f32.mrf.mxu1 }
 0x1dc   : > { %v2357_v38 = vadd.f32 %v2157_v35, %v691_v33 }
 0x1dd   : > { %v1870_v39 = vpop.f32.mrf.mxu0  ;;  %v2159_v41 = vpop.f32.mrf.mxu1 }
 0x1de   : > { %2421 = vst [vmem:[#allocation2 + $0x138] sm:$0xff] %v2357_v38  ;;  %v2160_v42 = vadd.f32 %v2159_v41, %v1870_v39  ;;  %v701_v39 = vld [vmem:[#allocation2 + $0x1e0] sm:$0xff] }
 0x1df   : > { %v1872_v43 = vpop.f32.mrf.mxu0  ;;  %v2161_v44 = vpop.f32.mrf.mxu1 }
 0x1e0   : > { %v2358_v45 = vadd.f32 %v2160_v42, %v692_v40 }
 0x1e1   : > { %v1875_v46 = vpop.f32.mrf.mxu0  ;;  %v2164_v48 = vpop.f32.mrf.mxu1 }
 0x1e2   : > { %2422 = vst [vmem:[#allocation2 + $0x140] sm:$0xff] %v2358_v45  ;;  %v2165_v49 = vadd.f32 %v2164_v48, %v1875_v46  ;;  %v702_v46 = vld [vmem:[#allocation2] sm:$0xff] }
 0x1e3   : > { %v1877_v50 = vpop.f32.mrf.mxu0  ;;  %v2166_v51 = vpop.f32.mrf.mxu1 }
 0x1e4   : > { %v2359_v52 = vadd.f32 %v2165_v49, %v693_v47 }
 0x1e5   : > { %v1878_v53 = vpop.f32.mrf.mxu0  ;;  %v2167_v55 = vpop.f32.mrf.mxu1 }
 0x1e6   : > { %2423 = vst [vmem:[#allocation2 + $0x80] sm:$0xff] %v2359_v52  ;;  %v2168_v56 = vadd.f32 %v2167_v55, %v1878_v53  ;;  %v703_v53 = vld [vmem:[#allocation2 + $0xf0] sm:$0xff] }
 0x1e7   : > { %v1880_v57 = vpop.f32.mrf.mxu0  ;;  %v2169_v58 = vpop.f32.mrf.mxu1 }
 0x1e8   : > { %v2360_v59 = vadd.f32 %v2168_v56, %v694_v54 }
 0x1e9   : > { %v1883_v60 = vpop.f32.mrf.mxu0  ;;  %v2172_v62 = vpop.f32.mrf.mxu1 }
 0x1ea   : > { %2424 = vst [vmem:[#allocation2 + $0x1a8] sm:$0xff] %v2360_v59  ;;  %v2173_v63 = vadd.f32 %v2172_v62, %v1883_v60  ;;  %v704_v60 = vld [vmem:[#allocation2 + $0x8] sm:$0xff] }
 0x1eb   : > { %v1885_v0 = vpop.f32.mrf.mxu0  ;;  %v2174_v1 = vpop.f32.mrf.mxu1 }
 0x1ec   : > { %v2361_v2 = vadd.f32 %v2173_v63, %v695_v61 }
 0x1ed   : > { %v1886_v3 = vpop.f32.mrf.mxu0  ;;  %v2175_v5 = vpop.f32.mrf.mxu1 }
 0x1ee   : > { %2425 = vst [vmem:[#allocation2 + $0x1b8] sm:$0xff] %v2361_v2  ;;  %v2176_v6 = vadd.f32 %v2175_v5, %v1886_v3  ;;  %v705_v3 = vld [vmem:[#allocation2 + $0x148] sm:$0xff] }
 0x1ef   : > { %v1888_v7 = vpop.f32.mrf.mxu0  ;;  %v2177_v8 = vpop.f32.mrf.mxu1 }
 0x1f0   : > { %v2362_v9 = vadd.f32 %v2176_v6, %v696_v4 }
 0x1f1   : > { %v1891_v10 = vpop.f32.mrf.mxu0  ;;  %v2180_v12 = vpop.f32.mrf.mxu1 }
 0x1f2   : > { %2426 = vst [vmem:[#allocation2 + $0x28] sm:$0xff] %v2362_v9  ;;  %v2181_v13 = vadd.f32 %v2180_v12, %v1891_v10  ;;  %v706_v10 = vld [vmem:[#allocation2 + $0x1d0] sm:$0xff] }
 0x1f3   : > { %v1893_v14 = vpop.f32.mrf.mxu0  ;;  %v2182_v15 = vpop.f32.mrf.mxu1 }
 0x1f4   : > { %v2363_v16 = vadd.f32 %v2181_v13, %v697_v11 }
 0x1f5   : > { %v1894_v17 = vpop.f32.mrf.mxu0  ;;  %v2183_v19 = vpop.f32.mrf.mxu1 }
 0x1f6   : > { %2427 = vst [vmem:[#allocation2 + $0x1e8] sm:$0xff] %v2363_v16  ;;  %v2184_v20 = vadd.f32 %v2183_v19, %v1894_v17  ;;  %v707_v17 = vld [vmem:[#allocation2 + $0x100] sm:$0xff] }
 0x1f7   : > { %v1896_v21 = vpop.f32.mrf.mxu0  ;;  %v2185_v22 = vpop.f32.mrf.mxu1 }
 0x1f8   : > { %v2364_v23 = vadd.f32 %v2184_v20, %v698_v18 }
 0x1f9   : > { %v1899_v24 = vpop.f32.mrf.mxu0  ;;  %v2188_v26 = vpop.f32.mrf.mxu1 }
 0x1fa   : > { %2428 = vst [vmem:[#allocation2 + $0xf8] sm:$0xff] %v2364_v23  ;;  %v2189_v27 = vadd.f32 %v2188_v26, %v1899_v24  ;;  %v708_v24 = vld [vmem:[#allocation2 + $0xc8] sm:$0xff] }
 0x1fb   : > { %v1901_v28 = vpop.f32.mrf.mxu0  ;;  %v2190_v29 = vpop.f32.mrf.mxu1 }
 0x1fc   : > { %v2365_v30 = vadd.f32 %v2189_v27, %v699_v25 }
 0x1fd   : > { %v1902_v31 = vpop.f32.mrf.mxu0  ;;  %v2191_v33 = vpop.f32.mrf.mxu1 }
 0x1fe   : > { %2429 = vst [vmem:[#allocation2 + $0x160] sm:$0xff] %v2365_v30  ;;  %v2192_v34 = vadd.f32 %v2191_v33, %v1902_v31  ;;  %v709_v31 = vld [vmem:[#allocation2 + $0x40] sm:$0xff] }
 0x1ff   : > { %v1904_v35 = vpop.f32.mrf.mxu0  ;;  %v2193_v36 = vpop.f32.mrf.mxu1 }
 0x200   : > { %v2366_v37 = vadd.f32 %v2192_v34, %v700_v32 }
 0x201   : > { %v1907_v38 = vpop.f32.mrf.mxu0  ;;  %v2196_v40 = vpop.f32.mrf.mxu1 }
 0x202   : > { %2430 = vst [vmem:[#allocation2 + $0x30] sm:$0xff] %v2366_v37  ;;  %v2197_v41 = vadd.f32 %v2196_v40, %v1907_v38  ;;  %v710_v38 = vld [vmem:[#allocation2 + $0x1f8] sm:$0xff] }
 0x203   : > { %v1909_v42 = vpop.f32.mrf.mxu0  ;;  %v2198_v43 = vpop.f32.mrf.mxu1 }
 0x204   : > { %v2367_v44 = vadd.f32 %v2197_v41, %v701_v39 }
 0x205   : > { %v1910_v45 = vpop.f32.mrf.mxu0  ;;  %v2199_v47 = vpop.f32.mrf.mxu1 }
 0x206   : > { %2431 = vst [vmem:[#allocation2 + $0x1e0] sm:$0xff] %v2367_v44  ;;  %v2200_v48 = vadd.f32 %v2199_v47, %v1910_v45  ;;  %v711_v45 = vld [vmem:[#allocation2 + $0x20] sm:$0xff] }
 0x207   : > { %v1912_v49 = vpop.f32.mrf.mxu0  ;;  %v2201_v50 = vpop.f32.mrf.mxu1 }
 0x208   : > { %v2368_v51 = vadd.f32 %v2200_v48, %v702_v46 }
 0x209   : > { %v1915_v52 = vpop.f32.mrf.mxu0  ;;  %v2204_v54 = vpop.f32.mrf.mxu1 }
 0x20a   : > { %2432 = vst [vmem:[#allocation2] sm:$0xff] %v2368_v51  ;;  %v2205_v55 = vadd.f32 %v2204_v54, %v1915_v52  ;;  %v712_v52 = vld [vmem:[#allocation2 + $0x128] sm:$0xff] }
 0x20b   : > { %v1917_v56 = vpop.f32.mrf.mxu0  ;;  %v2206_v57 = vpop.f32.mrf.mxu1 }
 0x20c   : > { %v2369_v58 = vadd.f32 %v2205_v55, %v703_v53 }
 0x20d   : > { %v1918_v59 = vpop.f32.mrf.mxu0  ;;  %v2207_v61 = vpop.f32.mrf.mxu1 }
 0x20e   : > { %2433 = vst [vmem:[#allocation2 + $0xf0] sm:$0xff] %v2369_v58  ;;  %v2208_v62 = vadd.f32 %v2207_v61, %v1918_v59  ;;  %v713_v59 = vld [vmem:[#allocation2 + $0x1a0] sm:$0xff] }
 0x20f   : > { %v1920_v63 = vpop.f32.mrf.mxu0  ;;  %v2209_v0 = vpop.f32.mrf.mxu1 }
 0x210   : > { %v2370_v1 = vadd.f32 %v2208_v62, %v704_v60 }
 0x211   : > { %v1923_v2 = vpop.f32.mrf.mxu0  ;;  %v2212_v4 = vpop.f32.mrf.mxu1 }
 0x212   : > { %2434 = vst [vmem:[#allocation2 + $0x8] sm:$0xff] %v2370_v1  ;;  %v2213_v5 = vadd.f32 %v2212_v4, %v1923_v2  ;;  %v714_v2 = vld [vmem:[#allocation2 + $0x1f0] sm:$0xff] }
 0x213   : > { %v1925_v6 = vpop.f32.mrf.mxu0  ;;  %v2214_v7 = vpop.f32.mrf.mxu1 }
 0x214   : > { %v2371_v8 = vadd.f32 %v2213_v5, %v705_v3 }
 0x215   : > { %v1926_v9 = vpop.f32.mrf.mxu0  ;;  %v2215_v11 = vpop.f32.mrf.mxu1 }
 0x216   : > { %2435 = vst [vmem:[#allocation2 + $0x148] sm:$0xff] %v2371_v8  ;;  %v2216_v12 = vadd.f32 %v2215_v11, %v1926_v9  ;;  %v715_v9 = vld [vmem:[#allocation2 + $0xe8] sm:$0xff] }
 0x217   : > { %v1928_v13 = vpop.f32.mrf.mxu0  ;;  %v2217_v14 = vpop.f32.mrf.mxu1 }
 0x218   : > { %v2372_v15 = vadd.f32 %v2216_v12, %v706_v10 }
 0x219   : > { %v1931_v16 = vpop.f32.mrf.mxu0  ;;  %v2220_v18 = vpop.f32.mrf.mxu1 }
 0x21a   : > { %2436 = vst [vmem:[#allocation2 + $0x1d0] sm:$0xff] %v2372_v15  ;;  %v2221_v19 = vadd.f32 %v2220_v18, %v1931_v16  ;;  %v716_v16 = vld [vmem:[#allocation2 + $0x78] sm:$0xff] }
 0x21b   : > { %v1933_v20 = vpop.f32.mrf.mxu0  ;;  %v2222_v21 = vpop.f32.mrf.mxu1 }
 0x21c   : > { %v2373_v22 = vadd.f32 %v2221_v19, %v707_v17 }
 0x21d   : > { %v1934_v23 = vpop.f32.mrf.mxu0  ;;  %v2223_v25 = vpop.f32.mrf.mxu1 }
 0x21e   : > { %2437 = vst [vmem:[#allocation2 + $0x100] sm:$0xff] %v2373_v22  ;;  %v2224_v26 = vadd.f32 %v2223_v25, %v1934_v23  ;;  %v717_v23 = vld [vmem:[#allocation2 + $0x70] sm:$0xff] }
 0x21f   : > { %v1936_v27 = vpop.f32.mrf.mxu0  ;;  %v2225_v28 = vpop.f32.mrf.mxu1 }
 0x220   : > { %v2374_v29 = vadd.f32 %v2224_v26, %v708_v24 }
 0x221   : > { %v1939_v30 = vpop.f32.mrf.mxu0  ;;  %v2228_v32 = vpop.f32.mrf.mxu1 }
 0x222   : > { %2438 = vst [vmem:[#allocation2 + $0xc8] sm:$0xff] %v2374_v29  ;;  %v2229_v33 = vadd.f32 %v2228_v32, %v1939_v30  ;;  %v718_v30 = vld [vmem:[#allocation2 + $0x90] sm:$0xff] }
 0x223   : > { %v1941_v34 = vpop.f32.mrf.mxu0  ;;  %v2230_v35 = vpop.f32.mrf.mxu1 }
 0x224   : > { %v2375_v36 = vadd.f32 %v2229_v33, %v709_v31 }
 0x225   : > { %v1942_v37 = vpop.f32.mrf.mxu0  ;;  %v2231_v39 = vpop.f32.mrf.mxu1 }
 0x226   : > { %2439 = vst [vmem:[#allocation2 + $0x40] sm:$0xff] %v2375_v36  ;;  %v2232_v40 = vadd.f32 %v2231_v39, %v1942_v37  ;;  %v719_v37 = vld [vmem:[#allocation2 + $0x1d8] sm:$0xff] }
 0x227   : > { %v1944_v41 = vpop.f32.mrf.mxu0  ;;  %v2233_v42 = vpop.f32.mrf.mxu1 }
 0x228   : > { %v2376_v43 = vadd.f32 %v2232_v40, %v710_v38 }
 0x229   : > { %v1947_v44 = vpop.f32.mrf.mxu0  ;;  %v2236_v46 = vpop.f32.mrf.mxu1 }
 0x22a   : > { %2440 = vst [vmem:[#allocation2 + $0x1f8] sm:$0xff] %v2376_v43  ;;  %v2237_v47 = vadd.f32 %v2236_v46, %v1947_v44  ;;  %v720_v44 = vld [vmem:[#allocation2 + $0xd0] sm:$0xff] }
 0x22b   : > { %v1949_v48 = vpop.f32.mrf.mxu0  ;;  %v2238_v49 = vpop.f32.mrf.mxu1 }
 0x22c   : > { %v2377_v50 = vadd.f32 %v2237_v47, %v711_v45 }
 0x22d   : > { %v1950_v51 = vpop.f32.mrf.mxu0  ;;  %v2239_v53 = vpop.f32.mrf.mxu1 }
 0x22e   : > { %2441 = vst [vmem:[#allocation2 + $0x20] sm:$0xff] %v2377_v50  ;;  %v2240_v54 = vadd.f32 %v2239_v53, %v1950_v51  ;;  %v721_v51 = vld [vmem:[#allocation2 + $0xb8] sm:$0xff] }
 0x22f   : > { %v1952_v55 = vpop.f32.mrf.mxu0  ;;  %v2241_v56 = vpop.f32.mrf.mxu1 }
 0x230   : > { %v2378_v57 = vadd.f32 %v2240_v54, %v712_v52 }
 0x231   : > { %v1955_v58 = vpop.f32.mrf.mxu0  ;;  %v2244_v60 = vpop.f32.mrf.mxu1 }
 0x232   : > { %2442 = vst [vmem:[#allocation2 + $0x128] sm:$0xff] %v2378_v57  ;;  %v2245_v61 = vadd.f32 %v2244_v60, %v1955_v58  ;;  %v722_v58 = vld [vmem:[#allocation2 + $0x88] sm:$0xff] }
 0x233   : > { %v1957_v62 = vpop.f32.mrf.mxu0  ;;  %v2246_v63 = vpop.f32.mrf.mxu1 }
 0x234   : > { %v2379_v0 = vadd.f32 %v2245_v61, %v713_v59 }
 0x235   : > { %v1958_v1 = vpop.f32.mrf.mxu0  ;;  %v2247_v3 = vpop.f32.mrf.mxu1 }
 0x236   : > { %2443 = vst [vmem:[#allocation2 + $0x1a0] sm:$0xff] %v2379_v0  ;;  %v2248_v4 = vadd.f32 %v2247_v3, %v1958_v1  ;;  %v723_v1 = vld [vmem:[#allocation2 + $0xa8] sm:$0xff] }
 0x237   : > { %v1960_v5 = vpop.f32.mrf.mxu0  ;;  %v2249_v6 = vpop.f32.mrf.mxu1 }
 0x238   : > { %v2380_v7 = vadd.f32 %v2248_v4, %v714_v2 }
 0x239   : > { %v1963_v8 = vpop.f32.mrf.mxu0  ;;  %v2252_v10 = vpop.f32.mrf.mxu1 }
 0x23a   : > { %2444 = vst [vmem:[#allocation2 + $0x1f0] sm:$0xff] %v2380_v7  ;;  %v2253_v11 = vadd.f32 %v2252_v10, %v1963_v8  ;;  %v724_v8 = vld [vmem:[#allocation2 + $0x1c8] sm:$0xff] }
 0x23b   : > { %v1965_v12 = vpop.f32.mrf.mxu0  ;;  %v2254_v13 = vpop.f32.mrf.mxu1 }
 0x23c   : > { %v2381_v14 = vadd.f32 %v2253_v11, %v715_v9 }
 0x23d   : > { %v1966_v15 = vpop.f32.mrf.mxu0  ;;  %v2255_v17 = vpop.f32.mrf.mxu1 }
 0x23e   : > { %2445 = vst [vmem:[#allocation2 + $0xe8] sm:$0xff] %v2381_v14  ;;  %v2256_v18 = vadd.f32 %v2255_v17, %v1966_v15  ;;  %v725_v15 = vld [vmem:[#allocation2 + $0x170] sm:$0xff] }
 0x23f   : > { %v1968_v19 = vpop.f32.mrf.mxu0  ;;  %v2257_v20 = vpop.f32.mrf.mxu1 }
 0x240   : > { %v2382_v21 = vadd.f32 %v2256_v18, %v716_v16 }
 0x241   : > { %v1971_v22 = vpop.f32.mrf.mxu0  ;;  %v2260_v24 = vpop.f32.mrf.mxu1 }
 0x242   : > { %2446 = vst [vmem:[#allocation2 + $0x78] sm:$0xff] %v2382_v21  ;;  %v2261_v25 = vadd.f32 %v2260_v24, %v1971_v22  ;;  %v726_v22 = vld [vmem:[#allocation2 + $0x178] sm:$0xff] }
 0x243   : > { %v1973_v26 = vpop.f32.mrf.mxu0  ;;  %v2262_v27 = vpop.f32.mrf.mxu1 }
 0x244   : > { %v2383_v28 = vadd.f32 %v2261_v25, %v717_v23 }
 0x245   : > { %v1974_v29 = vpop.f32.mrf.mxu0  ;;  %v2263_v31 = vpop.f32.mrf.mxu1 }
 0x246   : > { %2447 = vst [vmem:[#allocation2 + $0x70] sm:$0xff] %v2383_v28  ;;  %v2264_v32 = vadd.f32 %v2263_v31, %v1974_v29  ;;  %v727_v29 = vld [vmem:[#allocation2 + $0x68] sm:$0xff] }
 0x247   : > { %v1976_v33 = vpop.f32.mrf.mxu0  ;;  %v2265_v34 = vpop.f32.mrf.mxu1 }
 0x248   : > { %v2384_v35 = vadd.f32 %v2264_v32, %v718_v30 }
 0x249   : > { %v1979_v36 = vpop.f32.mrf.mxu0  ;;  %v2268_v38 = vpop.f32.mrf.mxu1 }
 0x24a   : > { %2448 = vst [vmem:[#allocation2 + $0x90] sm:$0xff] %v2384_v35  ;;  %v2269_v39 = vadd.f32 %v2268_v38, %v1979_v36  ;;  %v728_v36 = vld [vmem:[#allocation2 + $0x190] sm:$0xff] }
 0x24b   : > { %v1981_v40 = vpop.f32.mrf.mxu0  ;;  %v2270_v41 = vpop.f32.mrf.mxu1 }
 0x24c   : > { %v2385_v42 = vadd.f32 %v2269_v39, %v719_v37 }
 0x24d   : > { %v1982_v43 = vpop.f32.mrf.mxu0  ;;  %v2271_v45 = vpop.f32.mrf.mxu1 }
 0x24e   : > { %2449 = vst [vmem:[#allocation2 + $0x1d8] sm:$0xff] %v2385_v42  ;;  %v2272_v46 = vadd.f32 %v2271_v45, %v1982_v43  ;;  %v729_v43 = vld [vmem:[#allocation2 + $0x198] sm:$0xff] }
 0x24f   : > { %v1984_v47 = vpop.f32.mrf.mxu0  ;;  %v2273_v48 = vpop.f32.mrf.mxu1 }
 0x250   : > { %v2386_v49 = vadd.f32 %v2272_v46, %v720_v44 }
 0x251   : > { %v1987_v50 = vpop.f32.mrf.mxu0  ;;  %v2276_v52 = vpop.f32.mrf.mxu1 }
 0x252   : > { %2450 = vst [vmem:[#allocation2 + $0xd0] sm:$0xff] %v2386_v49  ;;  %v2277_v53 = vadd.f32 %v2276_v52, %v1987_v50  ;;  %v730_v50 = vld [vmem:[#allocation2 + $0x38] sm:$0xff] }
 0x253   : > { %v1989_v54 = vpop.f32.mrf.mxu0  ;;  %v2278_v55 = vpop.f32.mrf.mxu1 }
 0x254   : > { %v2387_v56 = vadd.f32 %v2277_v53, %v721_v51 }
 0x255   : > { %v1990_v57 = vpop.f32.mrf.mxu0  ;;  %v2279_v59 = vpop.f32.mrf.mxu1 }
 0x256   : > { %2451 = vst [vmem:[#allocation2 + $0xb8] sm:$0xff] %v2387_v56  ;;  %v2280_v60 = vadd.f32 %v2279_v59, %v1990_v57  ;;  %v731_v57 = vld [vmem:[#allocation2 + $0xc0] sm:$0xff] }
 0x257   : > { %v1992_v61 = vpop.f32.mrf.mxu0  ;;  %v2281_v62 = vpop.f32.mrf.mxu1 }
 0x258   : > { %v2388_v63 = vadd.f32 %v2280_v60, %v722_v58 }
 0x259   : > { %v1995_v0 = vpop.f32.mrf.mxu0  ;;  %v2284_v2 = vpop.f32.mrf.mxu1 }
 0x25a   : > { %2452 = vst [vmem:[#allocation2 + $0x88] sm:$0xff] %v2388_v63  ;;  %v2285_v3 = vadd.f32 %v2284_v2, %v1995_v0  ;;  %v732_v0 = vld [vmem:[#allocation2 + $0x1c0] sm:$0xff] }
 0x25b   : > { %v1997_v4 = vpop.f32.mrf.mxu0  ;;  %v2286_v5 = vpop.f32.mrf.mxu1 }
 0x25c   : > { %v2389_v6 = vadd.f32 %v2285_v3, %v723_v1 }
 0x25d   : > { %v1998_v7 = vpop.f32.mrf.mxu0  ;;  %v2287_v9 = vpop.f32.mrf.mxu1 }
 0x25e   : > { %2453 = vst [vmem:[#allocation2 + $0xa8] sm:$0xff] %v2389_v6  ;;  %v2288_v10 = vadd.f32 %v2287_v9, %v1998_v7  ;;  %v733_v7 = vld [vmem:[#allocation2 + $0x158] sm:$0xff] }
 0x25f   : > { %v2000_v11 = vpop.f32.mrf.mxu0  ;;  %v2289_v12 = vpop.f32.mrf.mxu1 }
 0x260   : > { %v2390_v13 = vadd.f32 %v2288_v10, %v724_v8 }
 0x261   : > { %v2003_v14 = vpop.f32.mrf.mxu0  ;;  %v2292_v16 = vpop.f32.mrf.mxu1 }
 0x262   : > { %2454 = vst [vmem:[#allocation2 + $0x1c8] sm:$0xff] %v2390_v13  ;;  %v2293_v17 = vadd.f32 %v2292_v16, %v2003_v14  ;;  %v734_v14 = vld [vmem:[#allocation2 + $0x10] sm:$0xff] }
 0x263   : > { %v2005_v18 = vpop.f32.mrf.mxu0  ;;  %v2294_v19 = vpop.f32.mrf.mxu1 }
 0x264   : > { %v2391_v20 = vadd.f32 %v2293_v17, %v725_v15 }
 0x265   : > { %v2006_v21 = vpop.f32.mrf.mxu0  ;;  %v2295_v23 = vpop.f32.mrf.mxu1 }
 0x266   : > { %2455 = vst [vmem:[#allocation2 + $0x170] sm:$0xff] %v2391_v20  ;;  %v2296_v24 = vadd.f32 %v2295_v23, %v2006_v21  ;;  %v735_v21 = vld [vmem:[#allocation2 + $0x58] sm:$0xff] }
 0x267   : > { %v2008_v25 = vpop.f32.mrf.mxu0  ;;  %v2297_v26 = vpop.f32.mrf.mxu1 }
 0x268   : > { %v2392_v27 = vadd.f32 %v2296_v24, %v726_v22 }
 0x269   : > { %v2011_v28 = vpop.f32.mrf.mxu0  ;;  %v2300_v30 = vpop.f32.mrf.mxu1 }
 0x26a   : > { %2456 = vst [vmem:[#allocation2 + $0x178] sm:$0xff] %v2392_v27  ;;  %v2301_v31 = vadd.f32 %v2300_v30, %v2011_v28  ;;  %v736_v28 = vld [vmem:[#allocation2 + $0xa0] sm:$0xff] }
 0x26b   : > { %v2013_v32 = vpop.f32.mrf.mxu0  ;;  %v2302_v33 = vpop.f32.mrf.mxu1 }
 0x26c   : > { %v2393_v34 = vadd.f32 %v2301_v31, %v727_v29 }
 0x26d   : > { %v2014_v35 = vpop.f32.mrf.mxu0  ;;  %v2303_v37 = vpop.f32.mrf.mxu1 }
 0x26e   : > { %2457 = vst [vmem:[#allocation2 + $0x68] sm:$0xff] %v2393_v34  ;;  %v2304_v38 = vadd.f32 %v2303_v37, %v2014_v35 }
 0x26f   : > { %v2016_v39 = vpop.f32.mrf.mxu0  ;;  %v2305_v40 = vpop.f32.mrf.mxu1 }
 0x270   : > { %v2394_v41 = vadd.f32 %v2304_v38, %v728_v36 }
 0x271   : > { %v2019_v42 = vpop.f32.mrf.mxu0  ;;  %v2308_v44 = vpop.f32.mrf.mxu1 }
 0x272   : > { %2458 = vst [vmem:[#allocation2 + $0x190] sm:$0xff] %v2394_v41  ;;  %v2309_v45 = vadd.f32 %v2308_v44, %v2019_v42 }
 0x273   : > { %v2021_v46 = vpop.f32.mrf.mxu0  ;;  %v2310_v47 = vpop.f32.mrf.mxu1 }
 0x274   : > { %v2395_v48 = vadd.f32 %v2309_v45, %v729_v43 }
 0x275   : > { %v2022_v49 = vpop.f32.mrf.mxu0  ;;  %v2311_v51 = vpop.f32.mrf.mxu1 }
 0x276   : > { %2459 = vst [vmem:[#allocation2 + $0x198] sm:$0xff] %v2395_v48  ;;  %v2312_v52 = vadd.f32 %v2311_v51, %v2022_v49 }
 0x277   : > { %v2024_v53 = vpop.f32.mrf.mxu0  ;;  %v2313_v54 = vpop.f32.mrf.mxu1 }
 0x278   : > { %v2396_v55 = vadd.f32 %v2312_v52, %v730_v50 }
 0x279   : > { %v2027_v56 = vpop.f32.mrf.mxu0  ;;  %v2316_v58 = vpop.f32.mrf.mxu1 }
 0x27a   : > { %2460 = vst [vmem:[#allocation2 + $0x38] sm:$0xff] %v2396_v55  ;;  %v2317_v59 = vadd.f32 %v2316_v58, %v2027_v56 }
 0x27b   : > { %v2029_v60 = vpop.f32.mrf.mxu0  ;;  %v2318_v61 = vpop.f32.mrf.mxu1 }
 0x27c   : > { %v2397_v62 = vadd.f32 %v2317_v59, %v731_v57 }
 0x27d   : > { %v2030_v63 = vpop.f32.mrf.mxu0  ;;  %v2319_v1 = vpop.f32.mrf.mxu1 }
 0x27e   : > { %2461 = vst [vmem:[#allocation2 + $0xc0] sm:$0xff] %v2397_v62  ;;  %v2320_v2 = vadd.f32 %v2319_v1, %v2030_v63 }
 0x27f   : > { %v2032_v3 = vpop.f32.mrf.mxu0  ;;  %v2321_v4 = vpop.f32.mrf.mxu1 }
 0x280   : > { %v2398_v5 = vadd.f32 %v2320_v2, %v732_v0 }
 0x281   : > { %v2035_v6 = vpop.f32.mrf.mxu0  ;;  %v2324_v8 = vpop.f32.mrf.mxu1 }
 0x282   : > { %2462 = vst [vmem:[#allocation2 + $0x1c0] sm:$0xff] %v2398_v5  ;;  %v2325_v9 = vadd.f32 %v2324_v8, %v2035_v6 }
 0x283   : > { %v2037_v10 = vpop.f32.mrf.mxu0  ;;  %v2326_v11 = vpop.f32.mrf.mxu1 }
 0x284   : > { %v2399_v12 = vadd.f32 %v2325_v9, %v733_v7 }
 0x285   : > { %v2038_v13 = vpop.f32.mrf.mxu0  ;;  %v2327_v15 = vpop.f32.mrf.mxu1 }
 0x286   : > { %2463 = vst [vmem:[#allocation2 + $0x158] sm:$0xff] %v2399_v12  ;;  %v2328_v16 = vadd.f32 %v2327_v15, %v2038_v13 }
 0x287   : > { %v2040_v17 = vpop.f32.mrf.mxu0  ;;  %v2329_v18 = vpop.f32.mrf.mxu1 }
 0x288   : > { %v2400_v19 = vadd.f32 %v2328_v16, %v734_v14 }
 0x289   : > { %v2043_v20 = vpop.f32.mrf.mxu0  ;;  %v2332_v22 = vpop.f32.mrf.mxu1 }
 0x28a   : > { %2464 = vst [vmem:[#allocation2 + $0x10] sm:$0xff] %v2400_v19  ;;  %v2333_v23 = vadd.f32 %v2332_v22, %v2043_v20 }
 0x28b   : > { %v2045_v24 = vpop.f32.mrf.mxu0  ;;  %v2334_v25 = vpop.f32.mrf.mxu1 }
 0x28c   : > { %v2401_v26 = vadd.f32 %v2333_v23, %v735_v21 }
 0x28d   : > { %v2046_v27 = vpop.f32.mrf.mxu0  ;;  %v2335_v29 = vpop.f32.mrf.mxu1 }
 0x28e   : > { %2465 = vst [vmem:[#allocation2 + $0x58] sm:$0xff] %v2401_v26  ;;  %v2336_v30 = vadd.f32 %v2335_v29, %v2046_v27  ;;  %2470 = sbr.rel (%p3834_p13) target bundleno = 957 (0x3bd), region = 71 }
 0x28f   : > { %v2048_v31 = vpop.f32.mrf.mxu0  ;;  %v2337_v32 = vpop.f32.mrf.mxu1 }
 0x290   : > { %v2402_v33 = vadd.f32 %v2336_v30, %v736_v28 }
 0x292   : > { %2466 = vst [vmem:[#allocation2 + $0xa0] sm:$0xff] %v2402_v33 }
 0x293   : > { %v2550_v34 = vld [vmem:[%s5679_s3 + $0x78] sm:$0xff]  ;;  %v2549_v35 = vld [vmem:[%s5679_s3 + $0x70] sm:$0xff]  ;;  %v2548_v36 = vld [vmem:[%s5679_s3 + $0x68] sm:$0xff] }
 0x294   : > { %4238 = vmatprep.subr.mxu0 %v2550_v34  ;;  %4366 = vmatprep.subr.mxu1 %v2550_v34  ;;  %v2547_v37 = vld [vmem:[%s5679_s3 + $0x60] sm:$0xff]  ;;  %v2546_v38 = vld [vmem:[%s5679_s3 + $0x58] sm:$0xff]  ;;  %v2545_v39 = vld [vmem:[%s5679_s3 + $0x50] sm:$0xff] }
 0x295   : > { %4239 = vmatpush3.msra.mxu0 %v2550_v34  ;;  %4382 = vmatpush3.msra.mxu1 %v2550_v34  ;;  %v2544_v40 = vld [vmem:[%s5679_s3 + $0x48] sm:$0xff]  ;;  %v2543_v41 = vld [vmem:[%s5679_s3 + $0x40] sm:$0xff]  ;;  %v2542_v42 = vld [vmem:[%s5679_s3 + $0x38] sm:$0xff] }
 0x296   : > { %4240 = vmatprep.subr.mxu0 %v2549_v35  ;;  %4367 = vmatprep.subr.mxu1 %v2549_v35  ;;  %v2541_v43 = vld [vmem:[%s5679_s3 + $0x30] sm:$0xff]  ;;  %v2540_v44 = vld [vmem:[%s5679_s3 + $0x28] sm:$0xff]  ;;  %v2539_v45 = vld [vmem:[%s5679_s3 + $0x20] sm:$0xff] }
 0x297   : > { %4241 = vmatpush3.msra.mxu0 %v2549_v35  ;;  %4383 = vmatpush3.msra.mxu1 %v2549_v35  ;;  %v2538_v46 = vld [vmem:[%s5679_s3 + $0x18] sm:$0xff]  ;;  %v2537_v47 = vld [vmem:[%s5679_s3 + $0x10] sm:$0xff]  ;;  %v2536_v48 = vld [vmem:[%s5679_s3 + $0x8] sm:$0xff] }
 0x298   : > { %4242 = vmatprep.subr.mxu0 %v2548_v36  ;;  %4368 = vmatprep.subr.mxu1 %v2548_v36  ;;  %v2535_v49 = vld [vmem:[%s5679_s3] sm:$0xff]  ;;  %v2471_v50 = vld [vmem:[#allocation2 + $0xb0] sm:$0xff]  ;;  %v2503_v51 = vld [vmem:[#allocation2 + $0x148] sm:$0xff] }
 0x299   : > { %4243 = vmatpush3.msra.mxu0 %v2548_v36  ;;  %4384 = vmatpush3.msra.mxu1 %v2548_v36  ;;  %v2472_v52 = vld [vmem:[#allocation2 + $0x1b0] sm:$0xff]  ;;  %v2473_v54 = vld [vmem:[#allocation2 + $0xd8] sm:$0xff]  ;;  %v2505_v55 = vld [vmem:[#allocation2 + $0x100] sm:$0xff] }
 0x29a   : > { %4244 = vmatprep.subr.mxu0 %v2547_v37  ;;  %4369 = vmatprep.subr.mxu1 %v2547_v37  ;;  %v2504_v53 = vld [vmem:[#allocation2 + $0x1d0] sm:$0xff]  ;;  %v2474_v56 = vld [vmem:[#allocation2 + $0x18] sm:$0xff]  ;;  %v2506_v57 = vld [vmem:[#allocation2 + $0xc8] sm:$0xff] }
 0x29b   : > { %4245 = vmatpush3.msra.mxu0 %v2547_v37  ;;  %4385 = vmatpush3.msra.mxu1 %v2547_v37  ;;  %v2475_v58 = vld [vmem:[#allocation2 + $0x50] sm:$0xff]  ;;  %v2507_v59 = vld [vmem:[#allocation2 + $0x40] sm:$0xff]  ;;  %v2476_v60 = vld [vmem:[#allocation2 + $0x168] sm:$0xff] }
 0x29c   : > { %4246 = vmatprep.subr.mxu0 %v2546_v38  ;;  %4370 = vmatprep.subr.mxu1 %v2546_v38  ;;  %v2508_v61 = vld [vmem:[#allocation2 + $0x1f8] sm:$0xff]  ;;  %v2477_v62 = vld [vmem:[#allocation2 + $0x130] sm:$0xff]  ;;  %v2509_v63 = vld [vmem:[#allocation2 + $0x20] sm:$0xff] }
 0x29d   : > { %4247 = vmatpush3.msra.mxu0 %v2546_v38  ;;  %4386 = vmatpush3.msra.mxu1 %v2546_v38  ;;  %v2478_v0 = vld [vmem:[#allocation2 + $0x48] sm:$0xff]  ;;  %v2479_v2 = vld [vmem:[#allocation2 + $0x180] sm:$0xff]  ;;  %v2480_v4 = vld [vmem:[#allocation2 + $0x110] sm:$0xff] }
 0x29e   : > { %4248 = vmatprep.subr.mxu0 %v2545_v39  ;;  %4371 = vmatprep.subr.mxu1 %v2545_v39  ;;  %v2510_v1 = vld [vmem:[#allocation2 + $0x128] sm:$0xff]  ;;  %v2511_v3 = vld [vmem:[#allocation2 + $0x1a0] sm:$0xff]  ;;  %v2512_v5 = vld [vmem:[#allocation2 + $0x1f0] sm:$0xff] }
 0x29f   : > { %4249 = vmatpush3.msra.mxu0 %v2545_v39  ;;  %4387 = vmatpush3.msra.mxu1 %v2545_v39  ;;  %v2481_v6 = vld [vmem:[#allocation2 + $0x118] sm:$0xff]  ;;  %v2513_v7 = vld [vmem:[#allocation2 + $0xe8] sm:$0xff]  ;;  %v2483_v10 = vld [vmem:[#allocation2 + $0x120] sm:$0xff] }
 0x2a0   : > { %4250 = vmatprep.subr.mxu0 %v2544_v40  ;;  %4372 = vmatprep.subr.mxu1 %v2544_v40  ;;  %v2482_v8 = vld [vmem:[#allocation2 + $0x98] sm:$0xff]  ;;  %v2515_v11 = vld [vmem:[#allocation2 + $0x70] sm:$0xff]  ;;  %v2485_v14 = vld [vmem:[#allocation2 + $0x108] sm:$0xff] }
 0x2a1   : > { %4251 = vmatpush3.msra.mxu0 %v2544_v40  ;;  %4388 = vmatpush3.msra.mxu1 %v2544_v40  ;;  %v2514_v9 = vld [vmem:[#allocation2 + $0x78] sm:$0xff]  ;;  %v2484_v12 = vld [vmem:[#allocation2 + $0x150] sm:$0xff]  ;;  %v2486_v16 = vld [vmem:[#allocation2 + $0x60] sm:$0xff] }
 0x2a2   : > { %4252 = vmatprep.subr.mxu0 %v2543_v41  ;;  %4373 = vmatprep.subr.mxu1 %v2543_v41  ;;  %v2516_v13 = vld [vmem:[#allocation2 + $0x90] sm:$0xff]  ;;  %v2517_v15 = vld [vmem:[#allocation2 + $0x1d8] sm:$0xff]  ;;  %v2487_v18 = vld [vmem:[#allocation2 + $0xe0] sm:$0xff] }
 0x2a3   : > { %4253 = vmatpush3.msra.mxu0 %v2543_v41  ;;  %4389 = vmatpush3.msra.mxu1 %v2543_v41  ;;  %v2518_v17 = vld [vmem:[#allocation2 + $0xd0] sm:$0xff]  ;;  %v2519_v19 = vld [vmem:[#allocation2 + $0xb8] sm:$0xff]  ;;  %v2488_v20 = vld [vmem:[#allocation2 + $0x188] sm:$0xff] }
 0x2a4   : > { %4254 = vmatprep.subr.mxu0 %v2542_v42  ;;  %4374 = vmatprep.subr.mxu1 %v2542_v42  ;;  %v2520_v21 = vld [vmem:[#allocation2 + $0x88] sm:$0xff]  ;;  %v2489_v22 = vld [vmem:[#allocation2 + $0x138] sm:$0xff]  ;;  %v2490_v24 = vld [vmem:[#allocation2 + $0x140] sm:$0xff] }
 0x2a5   : > { %4255 = vmatpush3.msra.mxu0 %v2542_v42  ;;  %4390 = vmatpush3.msra.mxu1 %v2542_v42  ;;  %v2521_v23 = vld [vmem:[#allocation2 + $0xa8] sm:$0xff]  ;;  %v2491_v26 = vld [vmem:[#allocation2 + $0x80] sm:$0xff]  ;;  %v2523_v27 = vld [vmem:[#allocation2 + $0x170] sm:$0xff] }
 0x2a6   : > { %4256 = vmatprep.subr.mxu0 %v2541_v43  ;;  %4375 = vmatprep.subr.mxu1 %v2541_v43  ;;  %v2522_v25 = vld [vmem:[#allocation2 + $0x1c8] sm:$0xff]  ;;  %v2524_v29 = vld [vmem:[#allocation2 + $0x178] sm:$0xff]  ;;  %v2526_v33 = vld [vmem:[#allocation2 + $0x190] sm:$0xff] }
 0x2a7   : > { %4257 = vmatpush3.msra.mxu0 %v2541_v43  ;;  %4391 = vmatpush3.msra.mxu1 %v2541_v43  ;;  %v2492_v28 = vld [vmem:[#allocation2 + $0x1a8] sm:$0xff]  ;;  %v2493_v30 = vld [vmem:[#allocation2 + $0x1b8] sm:$0xff]  ;;  %v2497_v38 = vld [vmem:[#allocation2 + $0x160] sm:$0xff] }
 0x2a8   : > { %4258 = vmatprep.subr.mxu0 %v2540_v44  ;;  %4376 = vmatprep.subr.mxu1 %v2540_v44  ;;  %v2525_v31 = vld [vmem:[#allocation2 + $0x68] sm:$0xff]  ;;  %v2527_v35 = vld [vmem:[#allocation2 + $0x198] sm:$0xff]  ;;  %v2529_v39 = vld [vmem:[#allocation2 + $0xc0] sm:$0xff] }
 0x2a9   : > { %4259 = vmatpush3.msra.mxu0 %v2540_v44  ;;  %4392 = vmatpush3.msra.mxu1 %v2540_v44  ;;  %v2494_v32 = vld [vmem:[#allocation2 + $0x28] sm:$0xff]  ;;  %v2496_v36 = vld [vmem:[#allocation2 + $0xf8] sm:$0xff]  ;;  %v2498_v40 = vld [vmem:[#allocation2 + $0x30] sm:$0xff] }
 0x2aa   : > { %4260 = vmatprep.subr.mxu0 %v2539_v45  ;;  %4377 = vmatprep.subr.mxu1 %v2539_v45  ;;  %v2495_v34 = vld [vmem:[#allocation2 + $0x1e8] sm:$0xff]  ;;  %v2528_v37 = vld [vmem:[#allocation2 + $0x38] sm:$0xff]  ;;  %v2530_v41 = vld [vmem:[#allocation2 + $0x1c0] sm:$0xff] }
 0x2ab   : > { %4261 = vmatpush3.msra.mxu0 %v2539_v45  ;;  %4393 = vmatpush3.msra.mxu1 %v2539_v45  ;;  %v2499_v42 = vld [vmem:[#allocation2 + $0x1e0] sm:$0xff]  ;;  %v2531_v43 = vld [vmem:[#allocation2 + $0x158] sm:$0xff]  ;;  %v2532_v45 = vld [vmem:[#allocation2 + $0x10] sm:$0xff] }
 0x2ac   : > { %4262 = vmatprep.subr.mxu0 %v2538_v46  ;;  %4378 = vmatprep.subr.mxu1 %v2538_v46  ;;  %v2500_v44 = vld [vmem:[#allocation2] sm:$0xff] }
 0x2ad   : > { %4263 = vmatpush3.msra.mxu0 %v2538_v46  ;;  %4394 = vmatpush3.msra.mxu1 %v2538_v46  ;;  %v2501_v46 = vld [vmem:[#allocation2 + $0xf0] sm:$0xff] }
 0x2ae   : > { %4264 = vmatprep.subr.mxu0 %v2537_v47  ;;  %4379 = vmatprep.subr.mxu1 %v2537_v47 }
 0x2af   : > { %4265 = vmatpush3.msra.mxu0 %v2537_v47  ;;  %4395 = vmatpush3.msra.mxu1 %v2537_v47  ;;  %v2533_v47 = vld [vmem:[#allocation2 + $0x58] sm:$0xff] }
 0x2b0   : > { %4266 = vmatprep.subr.mxu0 %v2536_v48  ;;  %4380 = vmatprep.subr.mxu1 %v2536_v48 }
 0x2b1   : > { %4267 = vmatpush3.msra.mxu0 %v2536_v48  ;;  %4396 = vmatpush3.msra.mxu1 %v2536_v48  ;;  %v2502_v48 = vld [vmem:[#allocation2 + $0x8] sm:$0xff] }
 0x2b2   : > { %4268 = vmatprep.subr.mxu0 %v2535_v49  ;;  %4381 = vmatprep.subr.mxu1 %v2535_v49 }
 0x2b3   : > { %4269 = vmatpush3.msra.mxu0 %v2535_v49  ;;  %4397 = vmatpush3.msra.mxu1 %v2535_v49  ;;  %v2534_v49 = vld [vmem:[#allocation2 + $0xa0] sm:$0xff] }
 0x2b4   : > { %4270 = vmatprep.mubr.f32.mxu0 %v2471_v50  ;;  %4318 = vmatprep.mubr.f32.mxu1 %v2503_v51  ;;  %v5429_v50 = vld [vmem:[%s5680_s4] ss:$0 sm:$0xff] }
 0x2b5   : > { %4271 = vmatmul.mubr.f32.vlgmr.msra.gmra.mxu0 %v2472_v52  ;;  %4319 = vmatmul.mubr.f32.vlgmr.msra.gmra.mxu1 %v2504_v53 }
 0x2b6   : > { %4273 = vmatprep.mubr.f32.mxu0 %v2473_v54  ;;  %4321 = vmatprep.mubr.f32.mxu1 %v2505_v55  ;;  %v3008_v55 = vld [vmem:[%s5106_s19 + $0x8] sm:$0xff] }
 0x2b9   : > { %4274 = vmatmul.mubr.f32.gmra.mxu0 %v2474_v56  ;;  %4322 = vmatmul.mubr.f32.gmra.mxu1 %v2506_v57  ;;  %v3040_v56 = vld [vmem:[%s5106_s19 + $0x108] sm:$0xff] }
 0x2ba   : > { %4276 = vmatprep.mubr.f32.mxu0 %v2475_v58  ;;  %4324 = vmatprep.mubr.f32.mxu1 %v2507_v59 }
 0x2bd   : > { %4277 = vmatmul.mubr.f32.gmra.mxu0 %v2476_v60  ;;  %4325 = vmatmul.mubr.f32.gmra.mxu1 %v2508_v61 }
 0x2be   : > { %4279 = vmatprep.mubr.f32.mxu0 %v2477_v62  ;;  %4327 = vmatprep.mubr.f32.mxu1 %v2509_v63  ;;  %v3007_v63 = vld [vmem:[%s5106_s19] sm:$0xff] }
 0x2c1   : > { %4280 = vmatmul.mubr.f32.gmra.mxu0 %v2478_v0  ;;  %4328 = vmatmul.mubr.f32.gmra.mxu1 %v2510_v1  ;;  %v3039_v0 = vld [vmem:[%s5106_s19 + $0x100] sm:$0xff] }
 0x2c2   : > { %4282 = vmatprep.mubr.f32.mxu0 %v2479_v2  ;;  %4330 = vmatprep.mubr.f32.mxu1 %v2511_v3 }
 0x2c5   : > { %4283 = vmatmul.mubr.f32.gmra.mxu0 %v2480_v4  ;;  %4331 = vmatmul.mubr.f32.gmra.mxu1 %v2512_v5 }
 0x2c6   : > { %4285 = vmatprep.mubr.f32.mxu0 %v2481_v6  ;;  %4333 = vmatprep.mubr.f32.mxu1 %v2513_v7 }
 0x2c9   : > { %4286 = vmatmul.mubr.f32.gmra.mxu0 %v2482_v8  ;;  %4334 = vmatmul.mubr.f32.gmra.mxu1 %v2514_v9 }
 0x2ca   : > { %4288 = vmatprep.mubr.f32.mxu0 %v2483_v10  ;;  %4336 = vmatprep.mubr.f32.mxu1 %v2515_v11 }
 0x2cd   : > { %4289 = vmatmul.mubr.f32.gmra.mxu0 %v2484_v12  ;;  %4337 = vmatmul.mubr.f32.gmra.mxu1 %v2516_v13  ;;  %v3010_v13 = vld [vmem:[%s5106_s19 + $0x18] sm:$0xff] }
 0x2ce   : > { %4291 = vmatprep.mubr.f32.mxu0 %v2485_v14  ;;  %4339 = vmatprep.mubr.f32.mxu1 %v2517_v15  ;;  %v3042_v14 = vld [vmem:[%s5106_s19 + $0x118] sm:$0xff] }
 0x2d1   : > { %4292 = vmatmul.mubr.f32.gmra.mxu0 %v2486_v16  ;;  %4340 = vmatmul.mubr.f32.gmra.mxu1 %v2518_v17 }
 0x2d2   : > { %4294 = vmatprep.mubr.f32.mxu0 %v2487_v18  ;;  %4342 = vmatprep.mubr.f32.mxu1 %v2519_v19  ;;  %v3009_v19 = vld [vmem:[%s5106_s19 + $0x10] sm:$0xff] }
 0x2d5   : > { %4295 = vmatmul.mubr.f32.gmra.mxu0 %v2488_v20  ;;  %4343 = vmatmul.mubr.f32.gmra.mxu1 %v2520_v21  ;;  %v3041_v20 = vld [vmem:[%s5106_s19 + $0x110] sm:$0xff] }
 0x2d6   : > { %4297 = vmatprep.mubr.f32.mxu0 %v2489_v22  ;;  %4345 = vmatprep.mubr.f32.mxu1 %v2521_v23 }
 0x2d9   : > { %4298 = vmatmul.mubr.f32.gmra.mxu0 %v2490_v24  ;;  %4346 = vmatmul.mubr.f32.gmra.mxu1 %v2522_v25 }
 0x2da   : > { %4300 = vmatprep.mubr.f32.mxu0 %v2491_v26  ;;  %4348 = vmatprep.mubr.f32.mxu1 %v2523_v27 }
 0x2dd   : > { %4301 = vmatmul.mubr.f32.gmra.mxu0 %v2492_v28  ;;  %4349 = vmatmul.mubr.f32.gmra.mxu1 %v2524_v29 }
 0x2de   : > { %4303 = vmatprep.mubr.f32.mxu0 %v2493_v30  ;;  %4351 = vmatprep.mubr.f32.mxu1 %v2525_v31 }
 0x2e1   : > { %4304 = vmatmul.mubr.f32.gmra.mxu0 %v2494_v32  ;;  %4352 = vmatmul.mubr.f32.gmra.mxu1 %v2526_v33 }
 0x2e2   : > { %4306 = vmatprep.mubr.f32.mxu0 %v2495_v34  ;;  %4354 = vmatprep.mubr.f32.mxu1 %v2527_v35  ;;  %v3012_v35 = vld [vmem:[%s5106_s19 + $0x28] sm:$0xff] }
 0x2e5   : > { %4307 = vmatmul.mubr.f32.gmra.mxu0 %v2496_v36  ;;  %4355 = vmatmul.mubr.f32.gmra.mxu1 %v2528_v37  ;;  %v3044_v36 = vld [vmem:[%s5106_s19 + $0x128] sm:$0xff] }
 0x2e6   : > { %4309 = vmatprep.mubr.f32.mxu0 %v2497_v38  ;;  %4357 = vmatprep.mubr.f32.mxu1 %v2529_v39 }
 0x2e9   : > { %4310 = vmatmul.mubr.f32.gmra.mxu0 %v2498_v40  ;;  %4358 = vmatmul.mubr.f32.gmra.mxu1 %v2530_v41  ;;  %v3011_v41 = vld [vmem:[%s5106_s19 + $0x20] sm:$0xff] }
 0x2ea   : > { %4312 = vmatprep.mubr.f32.mxu0 %v2499_v42  ;;  %4360 = vmatprep.mubr.f32.mxu1 %v2531_v43  ;;  %v3043_v42 = vld [vmem:[%s5106_s19 + $0x120] sm:$0xff] }
 0x2ed   : > { %4313 = vmatmul.mubr.f32.gmra.mxu0 %v2500_v44  ;;  %4361 = vmatmul.mubr.f32.gmra.mxu1 %v2532_v45 }
 0x2ee   : > { %4315 = vmatprep.mubr.f32.mxu0 %v2501_v46  ;;  %4363 = vmatprep.mubr.f32.mxu1 %v2533_v47 }
 0x2f1   : > { %4316 = vmatmul.mubr.f32.gmra.mxu0 %v2502_v48  ;;  %4364 = vmatmul.mubr.f32.gmra.mxu1 %v2534_v49 }
 0x375   : > { %v4272_v51 = vpop.f32.mrf.mxu0  ;;  %v4320_v52 = vpop.f32.mrf.mxu1 }
 0x376   : > { %v2630_v53 = vadd.f32 %v4272_v51, %v5429_v50  ;;  %v2790_v54 = vadd.f32 %v4320_v52, %v5429_v50 }
 0x377   : > { %v2624_v57 = vpop.f32.mrf.mxu0  ;;  %v2784_v58 = vpop.f32.mrf.mxu1 }
 0x378   : > { %v2944_v59 = vmax.f32 %v2630_v53, 0.0  ;;  %v2976_v60 = vmax.f32 %v2790_v54, 0.0  ;;  %v2625_v61 = vadd.f32 %v5429_v50, %v2624_v57  ;;  %v2785_v62 = vadd.f32 %v5429_v50, %v2784_v58  ;;  %v3014_v58 = vld [vmem:[%s5106_s19 + $0x38] sm:$0xff] }
 0x379   : > { %v4275_v1 = vpop.f32.mrf.mxu0  ;;  %v4323_v2 = vpop.f32.mrf.mxu1 }
 0x37a   : > { %v3072_v3 = vadd.f32 %v3008_v55, %v2944_v59  ;;  %v3104_v4 = vadd.f32 %v3040_v56, %v2976_v60  ;;  %v2943_v5 = vmax.f32 %v2625_v61, 0.0  ;;  %v2975_v6 = vmax.f32 %v2785_v62, 0.0  ;;  %v3046_v59 = vld [vmem:[%s5106_s19 + $0x138] sm:$0xff] }
 0x37b   : > { %v2640_v7 = vadd.f32 %v4275_v1, %v5429_v50  ;;  %v2800_v8 = vadd.f32 %v4323_v2, %v5429_v50  ;;  %v2634_v9 = vpop.f32.mrf.mxu0  ;;  %v2794_v10 = vpop.f32.mrf.mxu1  ;;  %v3045_v1 = vld [vmem:[%s5106_s19 + $0x130] sm:$0xff] }
 0x37c   : > { %3136 = vst [vmem:[%s5111_s24 + $0x8] sm:$0xff] %v3072_v3  ;;  %3168 = vst [vmem:[%s5111_s24 + $0x108] sm:$0xff] %v3104_v4  ;;  %v3071_v11 = vadd.f32 %v3007_v63, %v2943_v5  ;;  %v3103_v12 = vadd.f32 %v3039_v0, %v2975_v6  ;;  %v2635_v15 = vadd.f32 %v5429_v50, %v2634_v9  ;;  %v3013_v0 = vld [vmem:[%s5106_s19 + $0x30] sm:$0xff] }
 0x37d   : > { %v2795_v16 = vadd.f32 %v5429_v50, %v2794_v10  ;;  %v2946_v17 = vmax.f32 %v2640_v7, 0.0  ;;  %v2978_v18 = vmax.f32 %v2800_v8, 0.0  ;;  %v4278_v21 = vpop.f32.mrf.mxu0  ;;  %v4326_v22 = vpop.f32.mrf.mxu1 }
 0x37e   : > { %3135 = vst [vmem:[%s5111_s24] sm:$0xff] %v3071_v11  ;;  %v3970_v23 = vpack.c.bf16 %v3072_v3, %v3071_v11  ;;  %3167 = vst [vmem:[%s5111_s24 + $0x100] sm:$0xff] %v3103_v12  ;;  %v4050_v24 = vpack.c.bf16 %v3104_v4, %v3103_v12  ;;  %v2945_v25 = vmax.f32 %v2635_v15, 0.0  ;;  %v2650_v29 = vadd.f32 %v4278_v21, %v5429_v50 }
 0x37f   : > { %v2977_v26 = vmax.f32 %v2795_v16, 0.0  ;;  %v3074_v27 = vadd.f32 %v3010_v13, %v2946_v17  ;;  %v3106_v28 = vadd.f32 %v3042_v14, %v2978_v18  ;;  %v2810_v30 = vadd.f32 %v4326_v22, %v5429_v50  ;;  %v2644_v31 = vpop.f32.mrf.mxu0  ;;  %v2804_v32 = vpop.f32.mrf.mxu1  ;;  %v3016_v16 = vld [vmem:[%s5106_s19 + $0x48] sm:$0xff]  ;;  %v3015_v22 = vld [vmem:[%s5106_s19 + $0x40] sm:$0xff] }
 0x380   : > { %3971 = vst [vmem:[%s5116_s0] sm:$0xff] %v3970_v23   ;;  %4142 = vst [vmem:[%s5116_s0 + $0x80] sm:$0xff] %v4050_v24   ;;  %v3073_v33 = vadd.f32 %v3009_v19, %v2945_v25  ;;  %v2645_v37 = vadd.f32 %v5429_v50, %v2644_v31  ;;  %v2805_v38 = vadd.f32 %v5429_v50, %v2804_v32  ;;  %v2948_v39 = vmax.f32 %v2650_v29, 0.0  ;;  %v3048_v17 = vld [vmem:[%s5106_s19 + $0x148] sm:$0xff]  ;;  %v3047_v23 = vld [vmem:[%s5106_s19 + $0x140] sm:$0xff] }
 0x381   : > { %v3105_v34 = vadd.f32 %v3041_v20, %v2977_v26  ;;  %3138 = vst [vmem:[%s5111_s24 + $0x18] sm:$0xff] %v3074_v27  ;;  %3170 = vst [vmem:[%s5111_s24 + $0x118] sm:$0xff] %v3106_v28  ;;  %v2980_v40 = vmax.f32 %v2810_v30, 0.0  ;;  %v4281_v43 = vpop.f32.mrf.mxu0  ;;  %v4329_v44 = vpop.f32.mrf.mxu1 }
 0x382   : > { %3137 = vst [vmem:[%s5111_s24 + $0x10] sm:$0xff] %v3073_v33  ;;  %v3975_v45 = vpack.c.bf16 %v3074_v27, %v3073_v33  ;;  %v2947_v47 = vmax.f32 %v2645_v37, 0.0  ;;  %v2979_v48 = vmax.f32 %v2805_v38, 0.0  ;;  %v3076_v49 = vadd.f32 %v3012_v35, %v2948_v39  ;;  %v3018_v38 = vld [vmem:[%s5106_s19 + $0x58] sm:$0xff] }
 0x383   : > { %3169 = vst [vmem:[%s5111_s24 + $0x110] sm:$0xff] %v3105_v34  ;;  %v4055_v46 = vpack.c.bf16 %v3106_v28, %v3105_v34  ;;  %v3108_v51 = vadd.f32 %v3044_v36, %v2980_v40  ;;  %v2660_v52 = vadd.f32 %v4281_v43, %v5429_v50  ;;  %v2820_v53 = vadd.f32 %v4329_v44, %v5429_v50  ;;  %v2654_v54 = vpop.f32.mrf.mxu0  ;;  %v2814_v55 = vpop.f32.mrf.mxu1  ;;  %v3050_v39 = vld [vmem:[%s5106_s19 + $0x158] sm:$0xff]  ;;  %v3017_v44 = vld [vmem:[%s5106_s19 + $0x50] sm:$0xff] }
 0x384   : > { %4127 = vst [vmem:[%s5116_s0 + $0x8] sm:$0xff] %v3975_v45   ;;  %v3075_v56 = vadd.f32 %v3011_v41, %v2947_v47  ;;  %v3107_v57 = vadd.f32 %v3043_v42, %v2979_v48  ;;  %v2655_v60 = vadd.f32 %v5429_v50, %v2654_v54  ;;  %v2815_v61 = vadd.f32 %v5429_v50, %v2814_v55  ;;  %v3049_v45 = vld [vmem:[%s5106_s19 + $0x150] sm:$0xff] }
 0x385   : > { %4143 = vst [vmem:[%s5116_s0 + $0x88] sm:$0xff] %v4055_v46   ;;  %3140 = vst [vmem:[%s5111_s24 + $0x28] sm:$0xff] %v3076_v49  ;;  %v2950_v62 = vmax.f32 %v2660_v52, 0.0  ;;  %v2982_v63 = vmax.f32 %v2820_v53, 0.0  ;;  %v4284_v2 = vpop.f32.mrf.mxu0  ;;  %v4332_v3 = vpop.f32.mrf.mxu1 }
 0x386   : > { %3172 = vst [vmem:[%s5111_s24 + $0x128] sm:$0xff] %v3108_v51  ;;  %3139 = vst [vmem:[%s5111_s24 + $0x20] sm:$0xff] %v3075_v56  ;;  %v3980_v4 = vpack.c.bf16 %v3076_v49, %v3075_v56  ;;  %v4060_v5 = vpack.c.bf16 %v3108_v51, %v3107_v57  ;;  %v2949_v6 = vmax.f32 %v2655_v60, 0.0  ;;  %v2981_v7 = vmax.f32 %v2815_v61, 0.0  ;;  %v3020_v61 = vld [vmem:[%s5106_s19 + $0x68] sm:$0xff] }
 0x387   : > { %3171 = vst [vmem:[%s5111_s24 + $0x120] sm:$0xff] %v3107_v57  ;;  %v3078_v8 = vadd.f32 %v3014_v58, %v2950_v62  ;;  %v3110_v9 = vadd.f32 %v3046_v59, %v2982_v63  ;;  %v2670_v10 = vadd.f32 %v4284_v2, %v5429_v50  ;;  %v2830_v11 = vadd.f32 %v4332_v3, %v5429_v50  ;;  %v2664_v12 = vpop.f32.mrf.mxu0  ;;  %v2824_v13 = vpop.f32.mrf.mxu1  ;;  %v3052_v62 = vld [vmem:[%s5106_s19 + $0x168] sm:$0xff]  ;;  %v3019_v3 = vld [vmem:[%s5106_s19 + $0x60] sm:$0xff] }
 0x388   : > { %4128 = vst [vmem:[%s5116_s0 + $0x10] sm:$0xff] %v3980_v4   ;;  %4144 = vst [vmem:[%s5116_s0 + $0x90] sm:$0xff] %v4060_v5   ;;  %v3077_v14 = vadd.f32 %v3013_v0, %v2949_v6  ;;  %v3109_v15 = vadd.f32 %v3045_v1, %v2981_v7  ;;  %v2665_v18 = vadd.f32 %v5429_v50, %v2664_v12  ;;  %v3051_v4 = vld [vmem:[%s5106_s19 + $0x160] sm:$0xff] }
 0x389   : > { %v2825_v19 = vadd.f32 %v5429_v50, %v2824_v13  ;;  %3142 = vst [vmem:[%s5111_s24 + $0x38] sm:$0xff] %v3078_v8  ;;  %3174 = vst [vmem:[%s5111_s24 + $0x138] sm:$0xff] %v3110_v9  ;;  %v2952_v20 = vmax.f32 %v2670_v10, 0.0  ;;  %v2984_v21 = vmax.f32 %v2830_v11, 0.0  ;;  %v4287_v24 = vpop.f32.mrf.mxu0  ;;  %v4335_v25 = vpop.f32.mrf.mxu1 }
 0x38a   : > { %3141 = vst [vmem:[%s5111_s24 + $0x30] sm:$0xff] %v3077_v14  ;;  %v3985_v26 = vpack.c.bf16 %v3078_v8, %v3077_v14  ;;  %3173 = vst [vmem:[%s5111_s24 + $0x130] sm:$0xff] %v3109_v15  ;;  %v4065_v27 = vpack.c.bf16 %v3110_v9, %v3109_v15  ;;  %v2951_v28 = vmax.f32 %v2665_v18, 0.0  ;;  %v2680_v32 = vadd.f32 %v4287_v24, %v5429_v50 }
 0x38b   : > { %v2983_v29 = vmax.f32 %v2825_v19, 0.0  ;;  %v3080_v30 = vadd.f32 %v3016_v16, %v2952_v20  ;;  %v3112_v31 = vadd.f32 %v3048_v17, %v2984_v21  ;;  %v2840_v33 = vadd.f32 %v4335_v25, %v5429_v50  ;;  %v2674_v34 = vpop.f32.mrf.mxu0  ;;  %v2834_v35 = vpop.f32.mrf.mxu1  ;;  %v3022_v19 = vld [vmem:[%s5106_s19 + $0x78] sm:$0xff]  ;;  %v3021_v25 = vld [vmem:[%s5106_s19 + $0x70] sm:$0xff] }
 0x38c   : > { %4129 = vst [vmem:[%s5116_s0 + $0x18] sm:$0xff] %v3985_v26   ;;  %4145 = vst [vmem:[%s5116_s0 + $0x98] sm:$0xff] %v4065_v27   ;;  %v3079_v36 = vadd.f32 %v3015_v22, %v2951_v28  ;;  %v2675_v40 = vadd.f32 %v5429_v50, %v2674_v34  ;;  %v2835_v41 = vadd.f32 %v5429_v50, %v2834_v35  ;;  %v2954_v42 = vmax.f32 %v2680_v32, 0.0  ;;  %v3054_v20 = vld [vmem:[%s5106_s19 + $0x178] sm:$0xff]  ;;  %v3053_v26 = vld [vmem:[%s5106_s19 + $0x170] sm:$0xff] }
 0x38d   : > { %v3111_v37 = vadd.f32 %v3047_v23, %v2983_v29  ;;  %3144 = vst [vmem:[%s5111_s24 + $0x48] sm:$0xff] %v3080_v30  ;;  %3176 = vst [vmem:[%s5111_s24 + $0x148] sm:$0xff] %v3112_v31  ;;  %v2986_v43 = vmax.f32 %v2840_v33, 0.0  ;;  %v4290_v46 = vpop.f32.mrf.mxu0  ;;  %v4338_v47 = vpop.f32.mrf.mxu1 }
 0x38e   : > { %3143 = vst [vmem:[%s5111_s24 + $0x40] sm:$0xff] %v3079_v36  ;;  %v3990_v48 = vpack.c.bf16 %v3080_v30, %v3079_v36  ;;  %v2953_v51 = vmax.f32 %v2675_v40, 0.0  ;;  %v2985_v52 = vmax.f32 %v2835_v41, 0.0  ;;  %v3082_v53 = vadd.f32 %v3018_v38, %v2954_v42  ;;  %v3024_v41 = vld [vmem:[%s5106_s19 + $0x88] sm:$0xff] }
 0x38f   : > { %3175 = vst [vmem:[%s5111_s24 + $0x140] sm:$0xff] %v3111_v37  ;;  %v4070_v49 = vpack.c.bf16 %v3112_v31, %v3111_v37  ;;  %v3114_v54 = vadd.f32 %v3050_v39, %v2986_v43  ;;  %v2690_v55 = vadd.f32 %v4290_v46, %v5429_v50  ;;  %v2850_v56 = vadd.f32 %v4338_v47, %v5429_v50  ;;  %v2684_v57 = vpop.f32.mrf.mxu0  ;;  %v2844_v58 = vpop.f32.mrf.mxu1  ;;  %v3056_v42 = vld [vmem:[%s5106_s19 + $0x188] sm:$0xff]  ;;  %v3023_v47 = vld [vmem:[%s5106_s19 + $0x80] sm:$0xff] }
 0x390   : > { %4130 = vst [vmem:[%s5116_s0 + $0x20] sm:$0xff] %v3990_v48   ;;  %v3081_v59 = vadd.f32 %v3017_v44, %v2953_v51  ;;  %v3113_v60 = vadd.f32 %v3049_v45, %v2985_v52  ;;  %v2685_v63 = vadd.f32 %v5429_v50, %v2684_v57  ;;  %v2845_v0 = vadd.f32 %v5429_v50, %v2844_v58  ;;  %v3055_v48 = vld [vmem:[%s5106_s19 + $0x180] sm:$0xff] }
 0x391   : > { %4146 = vst [vmem:[%s5116_s0 + $0xa0] sm:$0xff] %v4070_v49   ;;  %3146 = vst [vmem:[%s5111_s24 + $0x58] sm:$0xff] %v3082_v53  ;;  %v2956_v1 = vmax.f32 %v2690_v55, 0.0  ;;  %v2988_v2 = vmax.f32 %v2850_v56, 0.0  ;;  %v4293_v5 = vpop.f32.mrf.mxu0  ;;  %v4341_v6 = vpop.f32.mrf.mxu1 }
 0x392   : > { %3178 = vst [vmem:[%s5111_s24 + $0x158] sm:$0xff] %v3114_v54  ;;  %3145 = vst [vmem:[%s5111_s24 + $0x50] sm:$0xff] %v3081_v59  ;;  %v3995_v7 = vpack.c.bf16 %v3082_v53, %v3081_v59  ;;  %v4075_v8 = vpack.c.bf16 %v3114_v54, %v3113_v60  ;;  %v2955_v9 = vmax.f32 %v2685_v63, 0.0  ;;  %v2987_v10 = vmax.f32 %v2845_v0, 0.0  ;;  %v3026_v0 = vld [vmem:[%s5106_s19 + $0x98] sm:$0xff] }
 0x393   : > { %3177 = vst [vmem:[%s5111_s24 + $0x150] sm:$0xff] %v3113_v60  ;;  %v3084_v11 = vadd.f32 %v3020_v61, %v2956_v1  ;;  %v3116_v12 = vadd.f32 %v3052_v62, %v2988_v2  ;;  %v2700_v13 = vadd.f32 %v4293_v5, %v5429_v50  ;;  %v2860_v14 = vadd.f32 %v4341_v6, %v5429_v50  ;;  %v2694_v15 = vpop.f32.mrf.mxu0  ;;  %v2854_v16 = vpop.f32.mrf.mxu1  ;;  %v3058_v1 = vld [vmem:[%s5106_s19 + $0x198] sm:$0xff]  ;;  %v3025_v6 = vld [vmem:[%s5106_s19 + $0x90] sm:$0xff] }
 0x394   : > { %4131 = vst [vmem:[%s5116_s0 + $0x28] sm:$0xff] %v3995_v7   ;;  %4147 = vst [vmem:[%s5116_s0 + $0xa8] sm:$0xff] %v4075_v8   ;;  %v3083_v17 = vadd.f32 %v3019_v3, %v2955_v9  ;;  %v3115_v18 = vadd.f32 %v3051_v4, %v2987_v10  ;;  %v2695_v21 = vadd.f32 %v5429_v50, %v2694_v15  ;;  %v3057_v7 = vld [vmem:[%s5106_s19 + $0x190] sm:$0xff] }
 0x395   : > { %v2855_v22 = vadd.f32 %v5429_v50, %v2854_v16  ;;  %3148 = vst [vmem:[%s5111_s24 + $0x68] sm:$0xff] %v3084_v11  ;;  %3180 = vst [vmem:[%s5111_s24 + $0x168] sm:$0xff] %v3116_v12  ;;  %v2958_v23 = vmax.f32 %v2700_v13, 0.0  ;;  %v2990_v24 = vmax.f32 %v2860_v14, 0.0  ;;  %v4296_v27 = vpop.f32.mrf.mxu0  ;;  %v4344_v28 = vpop.f32.mrf.mxu1 }
 0x396   : > { %3147 = vst [vmem:[%s5111_s24 + $0x60] sm:$0xff] %v3083_v17  ;;  %v4000_v29 = vpack.c.bf16 %v3084_v11, %v3083_v17  ;;  %3179 = vst [vmem:[%s5111_s24 + $0x160] sm:$0xff] %v3115_v18  ;;  %v4080_v30 = vpack.c.bf16 %v3116_v12, %v3115_v18  ;;  %v2957_v31 = vmax.f32 %v2695_v21, 0.0  ;;  %v2710_v35 = vadd.f32 %v4296_v27, %v5429_v50 }
 0x397   : > { %v2989_v32 = vmax.f32 %v2855_v22, 0.0  ;;  %v3086_v33 = vadd.f32 %v3022_v19, %v2958_v23  ;;  %v3118_v34 = vadd.f32 %v3054_v20, %v2990_v24  ;;  %v2870_v36 = vadd.f32 %v4344_v28, %v5429_v50  ;;  %v2704_v37 = vpop.f32.mrf.mxu0  ;;  %v2864_v38 = vpop.f32.mrf.mxu1  ;;  %v3028_v22 = vld [vmem:[%s5106_s19 + $0xa8] sm:$0xff]  ;;  %v3027_v28 = vld [vmem:[%s5106_s19 + $0xa0] sm:$0xff] }
 0x398   : > { %4132 = vst [vmem:[%s5116_s0 + $0x30] sm:$0xff] %v4000_v29   ;;  %4148 = vst [vmem:[%s5116_s0 + $0xb0] sm:$0xff] %v4080_v30   ;;  %v3085_v39 = vadd.f32 %v3021_v25, %v2957_v31  ;;  %v2705_v43 = vadd.f32 %v5429_v50, %v2704_v37  ;;  %v2865_v44 = vadd.f32 %v5429_v50, %v2864_v38  ;;  %v2960_v45 = vmax.f32 %v2710_v35, 0.0  ;;  %v3060_v23 = vld [vmem:[%s5106_s19 + $0x1a8] sm:$0xff]  ;;  %v3059_v29 = vld [vmem:[%s5106_s19 + $0x1a0] sm:$0xff] }
 0x399   : > { %v3117_v40 = vadd.f32 %v3053_v26, %v2989_v32  ;;  %3150 = vst [vmem:[%s5111_s24 + $0x78] sm:$0xff] %v3086_v33  ;;  %3182 = vst [vmem:[%s5111_s24 + $0x178] sm:$0xff] %v3118_v34  ;;  %v2992_v46 = vmax.f32 %v2870_v36, 0.0  ;;  %v4299_v49 = vpop.f32.mrf.mxu0  ;;  %v4347_v51 = vpop.f32.mrf.mxu1 }
 0x39a   : > { %3149 = vst [vmem:[%s5111_s24 + $0x70] sm:$0xff] %v3085_v39  ;;  %v4005_v52 = vpack.c.bf16 %v3086_v33, %v3085_v39  ;;  %v2959_v54 = vmax.f32 %v2705_v43, 0.0  ;;  %v2991_v55 = vmax.f32 %v2865_v44, 0.0  ;;  %v3088_v56 = vadd.f32 %v3024_v41, %v2960_v45  ;;  %v3030_v44 = vld [vmem:[%s5106_s19 + $0xb8] sm:$0xff] }
 0x39b   : > { %3181 = vst [vmem:[%s5111_s24 + $0x170] sm:$0xff] %v3117_v40  ;;  %v4085_v53 = vpack.c.bf16 %v3118_v34, %v3117_v40  ;;  %v3120_v57 = vadd.f32 %v3056_v42, %v2992_v46  ;;  %v2720_v58 = vadd.f32 %v4299_v49, %v5429_v50  ;;  %v2880_v59 = vadd.f32 %v4347_v51, %v5429_v50  ;;  %v2714_v60 = vpop.f32.mrf.mxu0  ;;  %v2874_v61 = vpop.f32.mrf.mxu1  ;;  %v3062_v45 = vld [vmem:[%s5106_s19 + $0x1b8] sm:$0xff]  ;;  %v3029_v51 = vld [vmem:[%s5106_s19 + $0xb0] sm:$0xff] }
 0x39c   : > { %4133 = vst [vmem:[%s5116_s0 + $0x38] sm:$0xff] %v4005_v52   ;;  %v3087_v62 = vadd.f32 %v3023_v47, %v2959_v54  ;;  %v3119_v63 = vadd.f32 %v3055_v48, %v2991_v55  ;;  %v2715_v2 = vadd.f32 %v5429_v50, %v2714_v60  ;;  %v2875_v3 = vadd.f32 %v5429_v50, %v2874_v61  ;;  %v3061_v52 = vld [vmem:[%s5106_s19 + $0x1b0] sm:$0xff] }
 0x39d   : > { %4149 = vst [vmem:[%s5116_s0 + $0xb8] sm:$0xff] %v4085_v53   ;;  %3152 = vst [vmem:[%s5111_s24 + $0x88] sm:$0xff] %v3088_v56  ;;  %v2962_v4 = vmax.f32 %v2720_v58, 0.0  ;;  %v2994_v5 = vmax.f32 %v2880_v59, 0.0  ;;  %v4302_v8 = vpop.f32.mrf.mxu0  ;;  %v4350_v9 = vpop.f32.mrf.mxu1 }
 0x39e   : > { %3184 = vst [vmem:[%s5111_s24 + $0x188] sm:$0xff] %v3120_v57  ;;  %3151 = vst [vmem:[%s5111_s24 + $0x80] sm:$0xff] %v3087_v62  ;;  %v4010_v10 = vpack.c.bf16 %v3088_v56, %v3087_v62  ;;  %v4090_v11 = vpack.c.bf16 %v3120_v57, %v3119_v63  ;;  %v2961_v12 = vmax.f32 %v2715_v2, 0.0  ;;  %v2993_v13 = vmax.f32 %v2875_v3, 0.0  ;;  %v3032_v3 = vld [vmem:[%s5106_s19 + $0xc8] sm:$0xff] }
 0x39f   : > { %3183 = vst [vmem:[%s5111_s24 + $0x180] sm:$0xff] %v3119_v63  ;;  %v3090_v14 = vadd.f32 %v3026_v0, %v2962_v4  ;;  %v3122_v15 = vadd.f32 %v3058_v1, %v2994_v5  ;;  %v2730_v16 = vadd.f32 %v4302_v8, %v5429_v50  ;;  %v2890_v17 = vadd.f32 %v4350_v9, %v5429_v50  ;;  %v2724_v18 = vpop.f32.mrf.mxu0  ;;  %v2884_v19 = vpop.f32.mrf.mxu1  ;;  %v3064_v4 = vld [vmem:[%s5106_s19 + $0x1c8] sm:$0xff]  ;;  %v3031_v9 = vld [vmem:[%s5106_s19 + $0xc0] sm:$0xff] }
 0x3a0   : > { %4134 = vst [vmem:[%s5116_s0 + $0x40] sm:$0xff] %v4010_v10   ;;  %4150 = vst [vmem:[%s5116_s0 + $0xc0] sm:$0xff] %v4090_v11   ;;  %v3089_v20 = vadd.f32 %v3025_v6, %v2961_v12  ;;  %v3121_v21 = vadd.f32 %v3057_v7, %v2993_v13  ;;  %v2725_v24 = vadd.f32 %v5429_v50, %v2724_v18  ;;  %v3063_v10 = vld [vmem:[%s5106_s19 + $0x1c0] sm:$0xff] }
 0x3a1   : > { %v2885_v25 = vadd.f32 %v5429_v50, %v2884_v19  ;;  %3154 = vst [vmem:[%s5111_s24 + $0x98] sm:$0xff] %v3090_v14  ;;  %3186 = vst [vmem:[%s5111_s24 + $0x198] sm:$0xff] %v3122_v15  ;;  %v2964_v26 = vmax.f32 %v2730_v16, 0.0  ;;  %v2996_v27 = vmax.f32 %v2890_v17, 0.0  ;;  %v4305_v30 = vpop.f32.mrf.mxu0  ;;  %v4353_v31 = vpop.f32.mrf.mxu1 }
 0x3a2   : > { %3153 = vst [vmem:[%s5111_s24 + $0x90] sm:$0xff] %v3089_v20  ;;  %v4015_v32 = vpack.c.bf16 %v3090_v14, %v3089_v20  ;;  %3185 = vst [vmem:[%s5111_s24 + $0x190] sm:$0xff] %v3121_v21  ;;  %v4095_v33 = vpack.c.bf16 %v3122_v15, %v3121_v21  ;;  %v2963_v34 = vmax.f32 %v2725_v24, 0.0  ;;  %v2740_v38 = vadd.f32 %v4305_v30, %v5429_v50 }
 0x3a3   : > { %v2995_v35 = vmax.f32 %v2885_v25, 0.0  ;;  %v3092_v36 = vadd.f32 %v3028_v22, %v2964_v26  ;;  %v3124_v37 = vadd.f32 %v3060_v23, %v2996_v27  ;;  %v2900_v39 = vadd.f32 %v4353_v31, %v5429_v50  ;;  %v2734_v40 = vpop.f32.mrf.mxu0  ;;  %v2894_v41 = vpop.f32.mrf.mxu1  ;;  %v3034_v25 = vld [vmem:[%s5106_s19 + $0xd8] sm:$0xff]  ;;  %v3033_v31 = vld [vmem:[%s5106_s19 + $0xd0] sm:$0xff] }
 0x3a4   : > { %4135 = vst [vmem:[%s5116_s0 + $0x48] sm:$0xff] %v4015_v32   ;;  %4151 = vst [vmem:[%s5116_s0 + $0xc8] sm:$0xff] %v4095_v33   ;;  %v3091_v42 = vadd.f32 %v3027_v28, %v2963_v34  ;;  %v2735_v46 = vadd.f32 %v5429_v50, %v2734_v40  ;;  %v2895_v47 = vadd.f32 %v5429_v50, %v2894_v41  ;;  %v2966_v48 = vmax.f32 %v2740_v38, 0.0  ;;  %v3066_v26 = vld [vmem:[%s5106_s19 + $0x1d8] sm:$0xff]  ;;  %v3065_v32 = vld [vmem:[%s5106_s19 + $0x1d0] sm:$0xff] }
 0x3a5   : > { %v3123_v43 = vadd.f32 %v3059_v29, %v2995_v35  ;;  %3156 = vst [vmem:[%s5111_s24 + $0xa8] sm:$0xff] %v3092_v36  ;;  %3188 = vst [vmem:[%s5111_s24 + $0x1a8] sm:$0xff] %v3124_v37  ;;  %v2998_v49 = vmax.f32 %v2900_v39, 0.0  ;;  %v4308_v53 = vpop.f32.mrf.mxu0  ;;  %v4356_v54 = vpop.f32.mrf.mxu1 }
 0x3a6   : > { %3155 = vst [vmem:[%s5111_s24 + $0xa0] sm:$0xff] %v3091_v42  ;;  %v4020_v55 = vpack.c.bf16 %v3092_v36, %v3091_v42  ;;  %v2965_v57 = vmax.f32 %v2735_v46, 0.0  ;;  %v2997_v58 = vmax.f32 %v2895_v47, 0.0  ;;  %v3094_v59 = vadd.f32 %v3030_v44, %v2966_v48  ;;  %v3036_v47 = vld [vmem:[%s5106_s19 + $0xe8] sm:$0xff] }
 0x3a7   : > { %3187 = vst [vmem:[%s5111_s24 + $0x1a0] sm:$0xff] %v3123_v43  ;;  %v4100_v56 = vpack.c.bf16 %v3124_v37, %v3123_v43  ;;  %v3126_v60 = vadd.f32 %v3062_v45, %v2998_v49  ;;  %v2750_v61 = vadd.f32 %v4308_v53, %v5429_v50  ;;  %v2910_v62 = vadd.f32 %v4356_v54, %v5429_v50  ;;  %v2744_v63 = vpop.f32.mrf.mxu0  ;;  %v2904_v0 = vpop.f32.mrf.mxu1  ;;  %v3068_v48 = vld [vmem:[%s5106_s19 + $0x1e8] sm:$0xff]  ;;  %v3035_v54 = vld [vmem:[%s5106_s19 + $0xe0] sm:$0xff] }
 0x3a8   : > { %4136 = vst [vmem:[%s5116_s0 + $0x50] sm:$0xff] %v4020_v55   ;;  %v3093_v1 = vadd.f32 %v3029_v51, %v2965_v57  ;;  %v3125_v2 = vadd.f32 %v3061_v52, %v2997_v58  ;;  %v2745_v5 = vadd.f32 %v5429_v50, %v2744_v63  ;;  %v2905_v6 = vadd.f32 %v5429_v50, %v2904_v0  ;;  %v3067_v55 = vld [vmem:[%s5106_s19 + $0x1e0] sm:$0xff] }
 0x3a9   : > { %4152 = vst [vmem:[%s5116_s0 + $0xd0] sm:$0xff] %v4100_v56   ;;  %3158 = vst [vmem:[%s5111_s24 + $0xb8] sm:$0xff] %v3094_v59  ;;  %v2968_v7 = vmax.f32 %v2750_v61, 0.0  ;;  %v3000_v8 = vmax.f32 %v2910_v62, 0.0  ;;  %v4311_v11 = vpop.f32.mrf.mxu0  ;;  %v4359_v12 = vpop.f32.mrf.mxu1 }
 0x3aa   : > { %3190 = vst [vmem:[%s5111_s24 + $0x1b8] sm:$0xff] %v3126_v60  ;;  %3157 = vst [vmem:[%s5111_s24 + $0xb0] sm:$0xff] %v3093_v1  ;;  %v4025_v13 = vpack.c.bf16 %v3094_v59, %v3093_v1  ;;  %v4105_v14 = vpack.c.bf16 %v3126_v60, %v3125_v2  ;;  %v2967_v15 = vmax.f32 %v2745_v5, 0.0  ;;  %v2999_v16 = vmax.f32 %v2905_v6, 0.0  ;;  %v3038_v6 = vld [vmem:[%s5106_s19 + $0xf8] sm:$0xff] }
 0x3ab   : > { %3189 = vst [vmem:[%s5111_s24 + $0x1b0] sm:$0xff] %v3125_v2  ;;  %v3096_v17 = vadd.f32 %v3032_v3, %v2968_v7  ;;  %v3128_v18 = vadd.f32 %v3064_v4, %v3000_v8  ;;  %v2760_v19 = vadd.f32 %v4311_v11, %v5429_v50  ;;  %v2920_v20 = vadd.f32 %v4359_v12, %v5429_v50  ;;  %v2754_v21 = vpop.f32.mrf.mxu0  ;;  %v2914_v22 = vpop.f32.mrf.mxu1  ;;  %v3070_v7 = vld [vmem:[%s5106_s19 + $0x1f8] sm:$0xff]  ;;  %v3037_v12 = vld [vmem:[%s5106_s19 + $0xf0] sm:$0xff] }
 0x3ac   : > { %4137 = vst [vmem:[%s5116_s0 + $0x58] sm:$0xff] %v4025_v13   ;;  %4153 = vst [vmem:[%s5116_s0 + $0xd8] sm:$0xff] %v4105_v14   ;;  %v3095_v23 = vadd.f32 %v3031_v9, %v2967_v15  ;;  %v3127_v24 = vadd.f32 %v3063_v10, %v2999_v16  ;;  %v2755_v27 = vadd.f32 %v5429_v50, %v2754_v21  ;;  %v3069_v13 = vld [vmem:[%s5106_s19 + $0x1f0] sm:$0xff] }
 0x3ad   : > { %v2915_v28 = vadd.f32 %v5429_v50, %v2914_v22  ;;  %3160 = vst [vmem:[%s5111_s24 + $0xc8] sm:$0xff] %v3096_v17  ;;  %3192 = vst [vmem:[%s5111_s24 + $0x1c8] sm:$0xff] %v3128_v18  ;;  %v2970_v29 = vmax.f32 %v2760_v19, 0.0  ;;  %v3002_v30 = vmax.f32 %v2920_v20, 0.0  ;;  %v4314_v33 = vpop.f32.mrf.mxu0  ;;  %v4362_v34 = vpop.f32.mrf.mxu1 }
 0x3ae   : > { %3159 = vst [vmem:[%s5111_s24 + $0xc0] sm:$0xff] %v3095_v23  ;;  %v4030_v35 = vpack.c.bf16 %v3096_v17, %v3095_v23  ;;  %3191 = vst [vmem:[%s5111_s24 + $0x1c0] sm:$0xff] %v3127_v24  ;;  %v4110_v36 = vpack.c.bf16 %v3128_v18, %v3127_v24  ;;  %v2969_v37 = vmax.f32 %v2755_v27, 0.0  ;;  %v2770_v41 = vadd.f32 %v4314_v33, %v5429_v50 }
 0x3af   : > { %v3001_v38 = vmax.f32 %v2915_v28, 0.0  ;;  %v3098_v39 = vadd.f32 %v3034_v25, %v2970_v29  ;;  %v3130_v40 = vadd.f32 %v3066_v26, %v3002_v30  ;;  %v2930_v42 = vadd.f32 %v4362_v34, %v5429_v50  ;;  %v2764_v43 = vpop.f32.mrf.mxu0  ;;  %v2924_v44 = vpop.f32.mrf.mxu1 }
 0x3b0   : > { %4138 = vst [vmem:[%s5116_s0 + $0x60] sm:$0xff] %v4030_v35   ;;  %4154 = vst [vmem:[%s5116_s0 + $0xe0] sm:$0xff] %v4110_v36   ;;  %v3097_v45 = vadd.f32 %v3033_v31, %v2969_v37  ;;  %v2765_v49 = vadd.f32 %v5429_v50, %v2764_v43  ;;  %v2925_v51 = vadd.f32 %v5429_v50, %v2924_v44  ;;  %v2972_v52 = vmax.f32 %v2770_v41, 0.0 }
 0x3b1   : > { %v3129_v46 = vadd.f32 %v3065_v32, %v3001_v38  ;;  %3162 = vst [vmem:[%s5111_s24 + $0xd8] sm:$0xff] %v3098_v39  ;;  %3194 = vst [vmem:[%s5111_s24 + $0x1d8] sm:$0xff] %v3130_v40  ;;  %v3004_v53 = vmax.f32 %v2930_v42, 0.0  ;;  %v4317_v56 = vpop.f32.mrf.mxu0  ;;  %v4365_v57 = vpop.f32.mrf.mxu1 }
 0x3b2   : > { %3161 = vst [vmem:[%s5111_s24 + $0xd0] sm:$0xff] %v3097_v45  ;;  %v4035_v58 = vpack.c.bf16 %v3098_v39, %v3097_v45  ;;  %v2971_v60 = vmax.f32 %v2765_v49, 0.0  ;;  %v3003_v61 = vmax.f32 %v2925_v51, 0.0  ;;  %v3100_v62 = vadd.f32 %v3036_v47, %v2972_v52 }
 0x3b3   : > { %3193 = vst [vmem:[%s5111_s24 + $0x1d0] sm:$0xff] %v3129_v46  ;;  %v4115_v59 = vpack.c.bf16 %v3130_v40, %v3129_v46  ;;  %v3132_v63 = vadd.f32 %v3068_v48, %v3004_v53  ;;  %v2780_v0 = vadd.f32 %v4317_v56, %v5429_v50  ;;  %v2940_v1 = vadd.f32 %v4365_v57, %v5429_v50  ;;  %v2774_v2 = vpop.f32.mrf.mxu0  ;;  %v2934_v3 = vpop.f32.mrf.mxu1 }
 0x3b4   : > { %4139 = vst [vmem:[%s5116_s0 + $0x68] sm:$0xff] %v4035_v58   ;;  %v3099_v4 = vadd.f32 %v3035_v54, %v2971_v60  ;;  %v3131_v5 = vadd.f32 %v3067_v55, %v3003_v61  ;;  %v2775_v8 = vadd.f32 %v5429_v50, %v2774_v2  ;;  %v2935_v9 = vadd.f32 %v5429_v50, %v2934_v3 }
 0x3b5   : > { %4155 = vst [vmem:[%s5116_s0 + $0xe8] sm:$0xff] %v4115_v59   ;;  %3164 = vst [vmem:[%s5111_s24 + $0xe8] sm:$0xff] %v3100_v62  ;;  %v2974_v10 = vmax.f32 %v2780_v0, 0.0  ;;  %v3006_v11 = vmax.f32 %v2940_v1, 0.0 }
 0x3b6   : > { %3196 = vst [vmem:[%s5111_s24 + $0x1e8] sm:$0xff] %v3132_v63  ;;  %3163 = vst [vmem:[%s5111_s24 + $0xe0] sm:$0xff] %v3099_v4  ;;  %v4040_v14 = vpack.c.bf16 %v3100_v62, %v3099_v4  ;;  %v4120_v15 = vpack.c.bf16 %v3132_v63, %v3131_v5  ;;  %v2973_v16 = vmax.f32 %v2775_v8, 0.0  ;;  %v3005_v17 = vmax.f32 %v2935_v9, 0.0 }
 0x3b7   : > { %3195 = vst [vmem:[%s5111_s24 + $0x1e0] sm:$0xff] %v3131_v5  ;;  %v3102_v50 = vadd.f32 %v3038_v6, %v2974_v10  ;;  %v3134_v18 = vadd.f32 %v3070_v7, %v3006_v11 }
 0x3b8   : > { %4140 = vst [vmem:[%s5116_s0 + $0x70] sm:$0xff] %v4040_v14   ;;  %4156 = vst [vmem:[%s5116_s0 + $0xf0] sm:$0xff] %v4120_v15   ;;  %v3101_v19 = vadd.f32 %v3037_v12, %v2973_v16  ;;  %v3133_v20 = vadd.f32 %v3069_v13, %v3005_v17 }
 0x3b9   : > { %3166 = vst [vmem:[%s5111_s24 + $0xf8] sm:$0xff] %v3102_v50  ;;  %3198 = vst [vmem:[%s5111_s24 + $0x1f8] sm:$0xff] %v3134_v18 }
 0x3ba   : > { %3165 = vst [vmem:[%s5111_s24 + $0xf0] sm:$0xff] %v3101_v19  ;;  %v4045_v21 = vpack.c.bf16 %v3102_v50, %v3101_v19  ;;  %3197 = vst [vmem:[%s5111_s24 + $0x1f0] sm:$0xff] %v3133_v20  ;;  %v4125_v22 = vpack.c.bf16 %v3134_v18, %v3133_v20 }
 0x3bc   : > { %4141 = vst [vmem:[%s5116_s0 + $0x78] sm:$0xff] %v4045_v21   ;;  %4157 = vst [vmem:[%s5116_s0 + $0xf8] sm:$0xff] %v4125_v22  }
 0x3bd PF: > { %s17_s27 = sadd.s32 1, %s4734_s27   ;;  %s5685_s21 = smov %s4714_s22 }
 0x3be   : > { %p14_p0 = scmp.ge.s32.totalorder %s17_s27, 6   ;;  %s5686_s22 = smov %s4824_s10 }
 0x3bf   : > { %s5687_s23 = smov %s4726_s25  ;;  %s5688_s24 = smov %s4730_s26 }
 0x3c0   : > { %s5689_s25 = smov %s5692_s28  ;;  %s5690_s26 = smov %s5696_s29 }
 0x3c1   :  { %16 = sbr.rel (!%p14_p0) target bundleno = 6 (0x6), region = 124 }

</bundles_post_ra>
